<compile_context>
chip_gen: v7x
topology: tpu7x:2x2x1
jax: 0.10.0
libtpu: 0.0.40
codegen_flags: <defaults>
</compile_context>

<pallas_src>
import jax
import jax.numpy as jnp
from jax.experimental import pallas as pl
from jax.experimental.pallas import tpu as pltpu

HIDDEN = 1024
NUM_CLASSES = 9
NUM_SOURCE = 1
NUM_OUT = NUM_CLASSES * NUM_SOURCE          # 9
OUT_PAD = 128                               # lane-aligned padded output width


def _round_up(x, m):
    return (x + m - 1) // m * m


def discriminator_kernel(x_ref, w1_ref, b1_ref, w2_ref, b2_ref, w3_ref, b3_ref,
                         o_ref):
    # Grid: (batch_tile i,).  Per step we see:
    #   x_ref  : (TB, 1024)      f32   batch tile i
    #   w1_ref : (1024, 1024)    bf16  resident (constant block index)
    #   b1_ref : (1, 1024)       f32   resident
    #   w2_ref : (1024, 1024)    bf16  resident
    #   b2_ref : (1, 1024)       f32   resident
    #   w3_ref : (1024, 128)     bf16  resident, lane-padded final weight
    #   b3_ref : (1, 128)        f32   resident, lane-padded final bias
    x = x_ref[...].astype(jnp.bfloat16)                       # cast on VPU

    # Layer 1: h1 = relu(x @ W1 + b1)
    h1 = jnp.dot(x, w1_ref[...], preferred_element_type=jnp.float32)
    h1 = jnp.maximum(h1 + b1_ref[...], 0.0)                   # (TB, 1024) f32

    # Layer 2: h2 = relu(h1 @ W2 + b2)
    h2 = jnp.dot(h1.astype(jnp.bfloat16), w2_ref[...],
                 preferred_element_type=jnp.float32)
    h2 = jnp.maximum(h2 + b2_ref[...], 0.0)                   # (TB, 1024) f32

    # Layer 3 + masked softmax over the real (unpadded) output columns.
    logits = jnp.dot(h2.astype(jnp.bfloat16), w3_ref[...],
                     preferred_element_type=jnp.float32)
    logits = logits + b3_ref[...]                              # (TB, OUT_PAD)

    # Mask padded columns with -inf so they get exactly zero softmax mass.
    col = jax.lax.broadcasted_iota(jnp.int32, logits.shape, 1)
    logits = jnp.where(col < NUM_OUT, logits, -jnp.inf)

    m = jnp.max(logits, axis=-1, keepdims=True)
    e = jnp.exp(logits - m)
    s = jnp.sum(e, axis=-1, keepdims=True)
    o_ref[...] = (e * pl.reciprocal(s, approx=False)).astype(o_ref.dtype)


def prepare_params(params):
    """One-time weight prep: bf16 cast, lane-dense padding, bias reshape."""
    w1, b1, w2, b2, w3, b3 = params
    w1 = w1.astype(jnp.bfloat16)
    w2 = w2.astype(jnp.bfloat16)
    w3p = (jnp.zeros((HIDDEN, OUT_PAD), jnp.float32)
           .at[:, :NUM_OUT].set(w3).astype(jnp.bfloat16))
    b1 = b1.reshape(1, HIDDEN).astype(jnp.float32)
    b2 = b2.reshape(1, HIDDEN).astype(jnp.float32)
    b3p = (jnp.zeros((1, OUT_PAD), jnp.float32)
           .at[:, :NUM_OUT].set(b3.reshape(1, -1)))
    return (w1, b1, w2, b2, w3p, b3p)


def discriminator_forward(data, prepped, *, batch_tile=None):
    """data: (B, 1024) float -> (B, NUM_OUT) softmax probabilities."""
    w1, b1, w2, b2, w3p, b3p = prepped
    B = data.shape[0]

    if batch_tile is None:
        # Up to 256 rows per tile to fill the 256-wide MXU on v6e/v7x;
        # small batches just round up to the sublane granule.
        batch_tile = min(256, _round_up(B, 8))
    tb = batch_tile
    Bp = _round_up(B, tb)

    x = data.astype(jnp.float32)            # cast to bf16 happens in-kernel
    if Bp != B:
        x = jnp.pad(x, ((0, Bp - B), (0, 0)))

    n_b = Bp // tb

    out_padded = pl.pallas_call(
        discriminator_kernel,
        out_shape=jax.ShapeDtypeStruct((Bp, OUT_PAD), jnp.float32),
        grid_spec=pltpu.PrefetchScalarGridSpec(
            num_scalar_prefetch=0,
            grid=(n_b,),
            in_specs=[
                pl.BlockSpec((tb, HIDDEN), lambda i: (i, 0)),        # x tile
                pl.BlockSpec((HIDDEN, HIDDEN), lambda i: (0, 0)),    # W1 (resident)
                pl.BlockSpec((1, HIDDEN), lambda i: (0, 0)),         # b1
                pl.BlockSpec((HIDDEN, HIDDEN), lambda i: (0, 0)),    # W2 (resident)
                pl.BlockSpec((1, HIDDEN), lambda i: (0, 0)),         # b2
                pl.BlockSpec((HIDDEN, OUT_PAD), lambda i: (0, 0)),   # W3 padded
                pl.BlockSpec((1, OUT_PAD), lambda i: (0, 0)),        # b3 padded
            ],
            out_specs=pl.BlockSpec((tb, OUT_PAD), lambda i: (i, 0)),
        ),
        compiler_params=pltpu.CompilerParams(
            dimension_semantics=("parallel",),
            vmem_limit_bytes=32 << 20,
        ),
    )(x, w1, b1, w2, b2, w3p, b3p)

    return out_padded[:B, :NUM_OUT]


def init_params(key):
    """Deterministic synthetic parameters matching the module's layer shapes."""
    k1, k2, k3, k4, k5, k6 = jax.random.split(key, 6)
    scale1 = 1.0 / jnp.sqrt(HIDDEN)
    w1 = jax.random.uniform(k1, (HIDDEN, HIDDEN), jnp.float32, -scale1, scale1)
    b1 = jax.random.uniform(k2, (HIDDEN,), jnp.float32, -scale1, scale1)
    w2 = jax.random.uniform(k3, (HIDDEN, HIDDEN), jnp.float32, -scale1, scale1)
    b2 = jax.random.uniform(k4, (HIDDEN,), jnp.float32, -scale1, scale1)
    w3 = jax.random.uniform(k5, (HIDDEN, NUM_OUT), jnp.float32, -scale1, scale1)
    b3 = jax.random.uniform(k6, (NUM_OUT,), jnp.float32, -scale1, scale1)
    return (w1, b1, w2, b2, w3, b3)


def reference_forward(data, params):
    """Pure-JAX f32 reference of the PyTorch forward (for a sanity check)."""
    w1, b1, w2, b2, w3, b3 = params
    h = jnp.maximum(data @ w1 + b1, 0.0)
    h = jnp.maximum(h @ w2 + b2, 0.0)
    logits = h @ w3 + b3
    return jax.nn.softmax(logits, axis=-1)


if __name__ == "__main__":
    key = jax.random.PRNGKey(0)
    k_param, k_data = jax.random.split(key)

    params = init_params(k_param)
    prepped = prepare_params(params)          # one-time bf16 cast + padding

    B = 8
    data = jax.random.normal(k_data, (B, HIDDEN), jnp.float32)

    out = discriminator_forward(data, prepped)
    out = jax.block_until_ready(out)

    ref = reference_forward(data, params)
    assert out.shape == (B, NUM_OUT), out.shape
    # bf16 weights => looser tolerance than the f32 reference.
    assert jnp.allclose(out, ref, atol=2e-2, rtol=2e-2), float(
        jnp.max(jnp.abs(out - ref)))
    assert jnp.allclose(jnp.sum(out, axis=-1), 1.0, atol=1e-4)

    print("KERNEL_OK")
</pallas_src>

<mosaic_0001>
module attributes {stable_mosaic.version = 11 : i64} {
  func.func @discriminator_kernel(%arg0: i32, %arg1: memref<8x1024xf32, #tpu.memory_space<vmem>>, %arg2: memref<1024x1024xbf16, #tpu.memory_space<vmem>>, %arg3: memref<1x1024xf32, #tpu.memory_space<vmem>>, %arg4: memref<1024x1024xbf16, #tpu.memory_space<vmem>>, %arg5: memref<1x1024xf32, #tpu.memory_space<vmem>>, %arg6: memref<1024x128xbf16, #tpu.memory_space<vmem>>, %arg7: memref<1x128xf32, #tpu.memory_space<vmem>>, %arg8: memref<8x128xf32, #tpu.memory_space<vmem>>) attributes {dimension_semantics = [#tpu.dimension_semantics<parallel>], iteration_bounds = array<i64: 1>, scalar_prefetch = 0 : i64, scratch_operands = 0 : i64, tpu.core_type = #tpu.core_type<tc>, window_params = [{transform_indices = @transform_0, window_bounds = array<i64: 8, 1024>}, {pipeline_mode = #tpu.pipeline_mode<synchronous>, transform_indices = @transform_1, window_bounds = array<i64: 1024, 1024>}, {pipeline_mode = #tpu.pipeline_mode<synchronous>, transform_indices = @transform_2, window_bounds = array<i64: 1, 1024>}, {pipeline_mode = #tpu.pipeline_mode<synchronous>, transform_indices = @transform_3, window_bounds = array<i64: 1024, 1024>}, {pipeline_mode = #tpu.pipeline_mode<synchronous>, transform_indices = @transform_4, window_bounds = array<i64: 1, 1024>}, {pipeline_mode = #tpu.pipeline_mode<synchronous>, transform_indices = @transform_5, window_bounds = array<i64: 1024, 128>}, {pipeline_mode = #tpu.pipeline_mode<synchronous>, transform_indices = @transform_6, window_bounds = array<i64: 1, 128>}, {transform_indices = @transform_7, window_bounds = array<i64: 8, 128>}]} {
    %c0 = arith.constant 0 : index
    %c0_0 = arith.constant 0 : index
    %0 = vector.load %arg1[%c0, %c0_0] : memref<8x1024xf32, #tpu.memory_space<vmem>>, vector<8x1024xf32>
    %1 = arith.truncf %0 : vector<8x1024xf32> to vector<8x1024xbf16>
    %c0_1 = arith.constant 0 : index
    %c0_2 = arith.constant 0 : index
    %2 = vector.load %arg2[%c0_1, %c0_2] : memref<1024x1024xbf16, #tpu.memory_space<vmem>>, vector<1024x1024xbf16>
    %cst = arith.constant dense<0.000000e+00> : vector<8x1024xf32>
    %3 = tpu.matmul %1, %2, %cst {dimension_numbers = #tpu.dot_dimension_numbers<[1], [0], [0], [1], [0, 0, 1, 1], [], []>} : vector<8x1024xbf16>, vector<1024x1024xbf16>, vector<8x1024xf32> -> vector<8x1024xf32>
    %c0_3 = arith.constant 0 : index
    %c0_4 = arith.constant 0 : index
    %4 = vector.load %arg3[%c0_3, %c0_4] : memref<1x1024xf32, #tpu.memory_space<vmem>>, vector<1x1024xf32>
    %5 = vector.broadcast %4 : vector<1x1024xf32> to vector<8x1024xf32>
    %6 = arith.addf %3, %5 : vector<8x1024xf32>
    %cst_5 = arith.constant 0.000000e+00 : f32
    %7 = vector.broadcast %cst_5 : f32 to vector<8x1024xf32>
    %8 = arith.maximumf %6, %7 : vector<8x1024xf32>
    %9 = arith.truncf %8 : vector<8x1024xf32> to vector<8x1024xbf16>
    %c0_6 = arith.constant 0 : index
    %c0_7 = arith.constant 0 : index
    %10 = vector.load %arg4[%c0_6, %c0_7] : memref<1024x1024xbf16, #tpu.memory_space<vmem>>, vector<1024x1024xbf16>
    %cst_8 = arith.constant dense<0.000000e+00> : vector<8x1024xf32>
    %11 = tpu.matmul %9, %10, %cst_8 {dimension_numbers = #tpu.dot_dimension_numbers<[1], [0], [0], [1], [0, 0, 1, 1], [], []>} : vector<8x1024xbf16>, vector<1024x1024xbf16>, vector<8x1024xf32> -> vector<8x1024xf32>
    %c0_9 = arith.constant 0 : index
    %c0_10 = arith.constant 0 : index
    %12 = vector.load %arg5[%c0_9, %c0_10] : memref<1x1024xf32, #tpu.memory_space<vmem>>, vector<1x1024xf32>
    %13 = vector.broadcast %12 : vector<1x1024xf32> to vector<8x1024xf32>
    %14 = arith.addf %11, %13 : vector<8x1024xf32>
    %cst_11 = arith.constant 0.000000e+00 : f32
    %15 = vector.broadcast %cst_11 : f32 to vector<8x1024xf32>
    %16 = arith.maximumf %14, %15 : vector<8x1024xf32>
    %17 = arith.truncf %16 : vector<8x1024xf32> to vector<8x1024xbf16>
    %c0_12 = arith.constant 0 : index
    %c0_13 = arith.constant 0 : index
    %18 = vector.load %arg6[%c0_12, %c0_13] : memref<1024x128xbf16, #tpu.memory_space<vmem>>, vector<1024x128xbf16>
    %cst_14 = arith.constant dense<0.000000e+00> : vector<8x128xf32>
    %19 = tpu.matmul %17, %18, %cst_14 {dimension_numbers = #tpu.dot_dimension_numbers<[1], [0], [0], [1], [0, 0, 1, 1], [], []>} : vector<8x1024xbf16>, vector<1024x128xbf16>, vector<8x128xf32> -> vector<8x128xf32>
    %c0_15 = arith.constant 0 : index
    %c0_16 = arith.constant 0 : index
    %20 = vector.load %arg7[%c0_15, %c0_16] : memref<1x128xf32, #tpu.memory_space<vmem>>, vector<1x128xf32>
    %21 = vector.broadcast %20 : vector<1x128xf32> to vector<8x128xf32>
    %22 = arith.addf %19, %21 : vector<8x128xf32>
    %23 = tpu.iota {dimensions = array<i32: 1>} : vector<8x128xi32>
    %c9_i32 = arith.constant 9 : i32
    %24 = vector.broadcast %c9_i32 : i32 to vector<8x128xi32>
    %25 = arith.cmpi slt, %23, %24 : vector<8x128xi32>
    %cst_17 = arith.constant 0xFF800000 : f32
    %26 = vector.broadcast %cst_17 : f32 to vector<8x128xf32>
    %27 = arith.select %25, %22, %26 : vector<8x128xi1>, vector<8x128xf32>
    %cst_18 = arith.constant dense<0xFF800000> : vector<8xf32>
    %28 = vector.multi_reduction <maximumf>, %27, %cst_18 [1] : vector<8x128xf32> to vector<8xf32>
    %29 = vector.shape_cast %28 : vector<8xf32> to vector<8x1xf32>
    %30 = vector.broadcast %29 : vector<8x1xf32> to vector<8x128xf32>
    %31 = arith.subf %27, %30 : vector<8x128xf32>
    %32 = math.exp %31 : vector<8x128xf32>
    %cst_19 = arith.constant dense<0.000000e+00> : vector<8xf32>
    %33 = vector.multi_reduction <add>, %32, %cst_19 [1] : vector<8x128xf32> to vector<8xf32>
    %34 = vector.shape_cast %33 : vector<8xf32> to vector<8x1xf32>
    %35 = tpu.reciprocal %34 : vector<8x1xf32> -> vector<8x1xf32>
    %36 = vector.broadcast %35 : vector<8x1xf32> to vector<8x128xf32>
    %37 = arith.mulf %32, %36 : vector<8x128xf32>
    %c0_20 = arith.constant 0 : index
    %c0_21 = arith.constant 0 : index
    %38 = vector.load %arg8[%c0_20, %c0_21] : memref<8x128xf32, #tpu.memory_space<vmem>>, vector<8x128xf32>
    tpu.vector_store %arg8[%c0_20, %c0_21], %37 {strides = array<i32>} : memref<8x128xf32, #tpu.memory_space<vmem>>, vector<8x128xf32>,
    return
  }
  func.func @transform_0(%arg0: i32) -> (i32, i32) {
    %c0_i32 = arith.constant 0 : i32
    %c0_i32_0 = arith.constant 0 : i32
    return %arg0, %c0_i32 : i32, i32
  }
  func.func @transform_1(%arg0: i32) -> (i32, i32) {
    %c0_i32 = arith.constant 0 : i32
    %c0_i32_0 = arith.constant 0 : i32
    %c0_i32_1 = arith.constant 0 : i32
    return %c0_i32, %c0_i32_0 : i32, i32
  }
  func.func @transform_2(%arg0: i32) -> (i32, i32) {
    %c0_i32 = arith.constant 0 : i32
    %c0_i32_0 = arith.constant 0 : i32
    %c0_i32_1 = arith.constant 0 : i32
    return %c0_i32, %c0_i32_0 : i32, i32
  }
  func.func @transform_3(%arg0: i32) -> (i32, i32) {
    %c0_i32 = arith.constant 0 : i32
    %c0_i32_0 = arith.constant 0 : i32
    %c0_i32_1 = arith.constant 0 : i32
    return %c0_i32, %c0_i32_0 : i32, i32
  }
  func.func @transform_4(%arg0: i32) -> (i32, i32) {
    %c0_i32 = arith.constant 0 : i32
    %c0_i32_0 = arith.constant 0 : i32
    %c0_i32_1 = arith.constant 0 : i32
    return %c0_i32, %c0_i32_0 : i32, i32
  }
  func.func @transform_5(%arg0: i32) -> (i32, i32) {
    %c0_i32 = arith.constant 0 : i32
    %c0_i32_0 = arith.constant 0 : i32
    %c0_i32_1 = arith.constant 0 : i32
    return %c0_i32, %c0_i32_0 : i32, i32
  }
  func.func @transform_6(%arg0: i32) -> (i32, i32) {
    %c0_i32 = arith.constant 0 : i32
    %c0_i32_0 = arith.constant 0 : i32
    %c0_i32_1 = arith.constant 0 : i32
    return %c0_i32, %c0_i32_0 : i32, i32
  }
  func.func @transform_7(%arg0: i32) -> (i32, i32) {
    %c0_i32 = arith.constant 0 : i32
    %c0_i32_0 = arith.constant 0 : i32
    return %arg0, %c0_i32 : i32, i32
  }
}

</mosaic_0001>

<bundles_post_ra>
// kernel: tpu_custom_call.1
= control target key start
LH: loop header
LB: loop body
LE: loop exit
PB: predicated region body
PF: predicated region fallthrough
CT: control target
= control target key end

     0   :  { %12 = vsyncpa [#allocation3], 0  ;;  %s10307_s0 = inlined_call_operand.hbm [shape: f32[8,1024], index: 0, kind: input, shape index: {}]   ;;  %s10308_s1 = inlined_call_operand.hbm [shape: bf16[1024,1024], index: 1, kind: input, shape index: {}]   ;;  %s10309_s2 = inlined_call_operand.hbm [shape: f32[1,1024], index: 2, kind: input, shape index: {}]   ;;  %s10310_s3 = inlined_call_operand.hbm [shape: bf16[1024,1024], index: 3, kind: input, shape index: {}]   ;;  %s10311_s4 = inlined_call_operand.hbm [shape: f32[1,1024], index: 4, kind: input, shape index: {}]   ;;  %s10312_s5 = inlined_call_operand.hbm [shape: bf16[1024,128], index: 5, kind: input, shape index: {}]   ;;  %s10313_s6 = inlined_call_operand.hbm [shape: f32[1,128], index: 6, kind: input, shape index: {}]   ;;  %s10314_s7 = inlined_call_operand.hbm [shape: f32[8,128], index: 7, kind: output, shape index: {}]  }
   0x1   :  { %13 = vsyncpa [#allocation6], 0 }
   0x2   :  { %14 = vsyncpa [#allocation9], 0 }
   0x3   :  { %15 = vsyncpa [#allocation12], 0 }
   0x4   :  { %16 = vsyncpa [#allocation4], 0  ;;  %s9970_s24 = smov [#allocation5]   ;;  %s9784_s28 = scalar_lea.hbm %s10308_s1, 65536 }
   0x5   :  { %s32_s25 = sshll.u32 %s9970_s24, 4  ;;  %p9785_p0 = scmp.ne.s32.totalorder %s10308_s1, %s9784_s28  ;;  %s33_s25 = int_to_ptr.vmem [resolvable:$true] %s32_s25 }
   0x6   :  { %p9788_p1 = scmp.lt.u32.totalorder %s9784_s28, %s10308_s1 }
   0x8   :  { %p9790_p2 = pnand %p9788_p1, %p9785_p0 }
   0xa   :  { %9793 = shalt.err (!%p9790_p2)
}
   0xb   :  { %s9794_s10 = scalar_lea.vmem %s33_s25, 65536  ;;  %p9799_p4 = scmp.lt.s32.totalorder %s33_s25, %s33_s25 }
   0xc   :  { %p9795_p3 = scmp.ne.s32.totalorder %s33_s25, %s9794_s10  ;;  %p9800_p5 = scmp.lt.s32.totalorder %s9794_s10, %s9794_s10 }
   0xe   :  { %p9801_p6 = por %p9800_p5, %p9799_p4 }
  0x10   :  { %p9802_p7 = pnand %p9801_p6, %p9795_p3 }
  0x12   :  { %9805 = shalt.err (!%p9802_p7)
}
  0x13   :  { %s9971_s11 = smov 512   ;;  %s9972_s12 = smov 32  }
  0x14   :  { %38 = dma.hbm_to_vmem [thread:$0]  %s10308_s1, 65536, %s33_s25, [#allocation6], %s9971_s11, %s9971_s11, %s9972_s12  }
  0x15   :  { %s9973_s15 = smov [#allocation8]   ;;  %s9974_s17 = smov [#allocation11]  }
  0x16   :  { %s54_s16 = sshll.u32 %s9973_s15, 4  ;;  %s76_s18 = sshll.u32 %s9974_s17, 4  ;;  %s55_s16 = int_to_ptr.vmem [resolvable:$true] %s54_s16  ;;  %s77_s18 = int_to_ptr.vmem [resolvable:$true] %s76_s18 }
  0x17   :  { %s9806_s21 = scalar_lea.hbm %s10310_s3, 65536 }
  0x18   :  { %p9807_p8 = scmp.ne.s32.totalorder %s10310_s3, %s9806_s21  ;;  %p9810_p9 = scmp.lt.u32.totalorder %s9806_s21, %s10310_s3 }
  0x1a   :  { %p9812_p10 = pnand %p9810_p9, %p9807_p8 }
  0x1c   :  { %9815 = shalt.err (!%p9812_p10)
}
  0x1d   :  { %s9816_s1 = scalar_lea.vmem %s55_s16, 65536  ;;  %p9821_p12 = scmp.lt.s32.totalorder %s55_s16, %s55_s16 }
  0x1e   :  { %p9817_p11 = scmp.ne.s32.totalorder %s55_s16, %s9816_s1  ;;  %p9822_p13 = scmp.lt.s32.totalorder %s9816_s1, %s9816_s1 }
  0x20   :  { %p9823_p0 = por %p9822_p13, %p9821_p12 }
  0x22   :  { %p9824_p1 = pnand %p9823_p0, %p9817_p11 }
  0x24   :  { %9827 = shalt.err (!%p9824_p1)
}
  0x25   :  { %60 = dma.hbm_to_vmem [thread:$0]  %s10310_s3, 65536, %s55_s16, [#allocation9], %s9971_s11, %s9971_s11, %s9972_s12  }
  0x26   :  { %s9828_s30 = scalar_lea.hbm %s10312_s5, 8192 }
  0x27   :  { %p9829_p2 = scmp.ne.s32.totalorder %s10312_s5, %s9828_s30  ;;  %p9832_p3 = scmp.lt.u32.totalorder %s9828_s30, %s10312_s5 }
  0x29   :  { %p9834_p4 = pnand %p9832_p3, %p9829_p2 }
  0x2b   :  { %9837 = shalt.err (!%p9834_p4)
}
  0x2c   :  { %s9838_s14 = scalar_lea.vmem %s77_s18, 8192  ;;  %p9843_p6 = scmp.lt.s32.totalorder %s77_s18, %s77_s18 }
  0x2d   :  { %p9839_p5 = scmp.ne.s32.totalorder %s77_s18, %s9838_s14  ;;  %p9844_p7 = scmp.lt.s32.totalorder %s9838_s14, %s9838_s14 }
  0x2f   :  { %p9845_p8 = por %p9844_p7, %p9843_p6 }
  0x31   :  { %p9846_p9 = pnand %p9845_p8, %p9839_p5 }
  0x33   :  { %9849 = shalt.err (!%p9846_p9)
}
  0x34   :  { %s9975_s3 = smov 64   ;;  %s9976_s11 = smov 4  }
  0x35   :  { %82 = dma.hbm_to_vmem [thread:$0]  %s10312_s5, 8192, %s77_s18, [#allocation12], %s9975_s3, %s9975_s3, %s9976_s11  }
  0x36   :  { %s9977_s16 = smov [#allocation2]   ;;  %s9978_s19 = smov [#allocation7]  }
  0x37   :  { %s23_s17 = sshll.u32 %s9977_s16, 4  ;;  %s45_s20 = sshll.u32 %s9978_s19, 4  ;;  %s24_s17 = int_to_ptr.vmem [resolvable:$true] %s23_s17  ;;  %s46_s20 = int_to_ptr.vmem [resolvable:$true] %s45_s20 }
  0x38   :  { %s9850_s23 = scalar_lea.hbm %s10307_s0, 1024 }
  0x39   :  { %p9851_p10 = scmp.ne.s32.totalorder %s10307_s0, %s9850_s23  ;;  %p9854_p11 = scmp.lt.u32.totalorder %s9850_s23, %s10307_s0 }
  0x3b   :  { %p9856_p12 = pnand %p9854_p11, %p9851_p10 }
  0x3d   :  { %9859 = shalt.err (!%p9856_p12)
}
  0x3e   :  { %s9860_s5 = scalar_lea.vmem %s24_s17, 1024  ;;  %p9865_p0 = scmp.lt.s32.totalorder %s24_s17, %s24_s17 }
  0x3f   :  { %p9861_p13 = scmp.ne.s32.totalorder %s24_s17, %s9860_s5  ;;  %p9866_p1 = scmp.lt.s32.totalorder %s9860_s5, %s9860_s5 }
  0x41   :  { %p9867_p2 = por %p9866_p1, %p9865_p0 }
  0x43   :  { %p9868_p3 = pnand %p9867_p2, %p9861_p13 }
  0x45   :  { %9871 = shalt.err (!%p9868_p3)
}
  0x46   :  { %26 = dma.hbm_to_vmem [thread:$0]  %s10307_s0, 1024, %s24_s17, [#allocation3]  }
  0x47   :  { %s9872_s30 = scalar_lea.hbm %s10309_s2, 128 }
  0x48   :  { %p9873_p4 = scmp.ne.s32.totalorder %s10309_s2, %s9872_s30  ;;  %p9876_p5 = scmp.lt.u32.totalorder %s9872_s30, %s10309_s2 }
  0x4a   :  { %p9878_p6 = pnand %p9876_p5, %p9873_p4 }
  0x4c   :  { %9881 = shalt.err (!%p9878_p6)
}
  0x4d   :  { %s9882_s14 = scalar_lea.vmem %s46_s20, 128  ;;  %p9887_p8 = scmp.lt.s32.totalorder %s46_s20, %s46_s20 }
  0x4e   :  { %p9883_p7 = scmp.ne.s32.totalorder %s46_s20, %s9882_s14  ;;  %p9888_p9 = scmp.lt.s32.totalorder %s9882_s14, %s9882_s14 }
  0x50   :  { %p9889_p10 = por %p9888_p9, %p9887_p8 }
  0x52   :  { %p9890_p11 = pnand %p9889_p10, %p9883_p7 }
  0x54   :  { %9893 = shalt.err (!%p9890_p11)
}
  0x55   :  { %48 = dma.hbm_to_vmem [thread:$0]  %s10309_s2, 128, %s46_s20, [#allocation6]  }
  0x56   :  { %s9979_s11 = smov [#allocation10]   ;;  %s9980_s15 = smov [#allocation13]  }
  0x57   :  { %s67_s12 = sshll.u32 %s9979_s11, 4  ;;  %s89_s16 = sshll.u32 %s9980_s15, 4  ;;  %s68_s12 = int_to_ptr.vmem [resolvable:$true] %s67_s12  ;;  %s90_s16 = int_to_ptr.vmem [resolvable:$true] %s89_s16 }
  0x58   :  { %s9894_s21 = scalar_lea.hbm %s10311_s4, 128 }
  0x59   :  { %p9895_p12 = scmp.ne.s32.totalorder %s10311_s4, %s9894_s21  ;;  %p9898_p13 = scmp.lt.u32.totalorder %s9894_s21, %s10311_s4 }
  0x5b   :  { %p9900_p0 = pnand %p9898_p13, %p9895_p12 }
  0x5d   :  { %9903 = shalt.err (!%p9900_p0)
}
  0x5e   :  { %s9904_s2 = scalar_lea.vmem %s68_s12, 128  ;;  %p9909_p2 = scmp.lt.s32.totalorder %s68_s12, %s68_s12 }
  0x5f   :  { %p9905_p1 = scmp.ne.s32.totalorder %s68_s12, %s9904_s2  ;;  %p9910_p3 = scmp.lt.s32.totalorder %s9904_s2, %s9904_s2 }
  0x61   :  { %p9911_p4 = por %p9910_p3, %p9909_p2 }
  0x63   :  { %p9912_p5 = pnand %p9911_p4, %p9905_p1 }
  0x65   :  { %9915 = shalt.err (!%p9912_p5)
}
  0x66   :  { %70 = dma.hbm_to_vmem [thread:$0]  %s10311_s4, 128, %s68_s12, [#allocation9]  }
  0x67   :  { %s9916_s18 = scalar_lea.hbm %s10313_s6, 16 }
  0x68   :  { %p9917_p6 = scmp.ne.s32.totalorder %s10313_s6, %s9916_s18  ;;  %p9920_p7 = scmp.lt.u32.totalorder %s9916_s18, %s10313_s6 }
  0x6a   :  { %p9922_p8 = pnand %p9920_p7, %p9917_p6 }
  0x6c   :  { %9925 = shalt.err (!%p9922_p8)
}
  0x6d   :  { %s9926_s8 = scalar_lea.vmem %s90_s16, 16  ;;  %s9930_s9 = scalar_lea.vmem %s90_s16, 32 }
  0x6e   :  { %p9927_p9 = scmp.ne.s32.totalorder %s90_s16, %s9926_s8  ;;  %p9931_p10 = scmp.lt.s32.totalorder %s90_s16, %s90_s16 }
  0x6f   :  { %p9932_p11 = scmp.lt.s32.totalorder %s9930_s9, %s9926_s8 }
  0x71   :  { %p9933_p12 = por %p9932_p11, %p9931_p10 }
  0x73   :  { %p9934_p13 = pnand %p9933_p12, %p9927_p9 }
  0x75   :  { %9937 = shalt.err (!%p9934_p13)
}
  0x76   :  { %92 = dma.hbm_to_vmem [thread:$0]  %s10313_s6, 16, %s90_s16, [#allocation12]  }
  0x77   :  { %9960 = dma.done.wait [#allocation3], 1024  }
  0x78   :  { %9961 = vsyncadd [#allocation3], 4294966272 }
  0x79   :  { %9962 = dma.done.wait [#allocation6], 65664  }
  0x7a   :  { %9963 = vsyncadd [#allocation6], 4294901632 }
  0x7b   :  { %9964 = dma.done.wait [#allocation9], 65664  }
  0x7c   :  { %9965 = vsyncadd [#allocation9], 4294901632 }
  0x7d   :  { %9966 = dma.done.wait [#allocation12], 8208  }
  0x7e   :  { %9967 = vsyncadd [#allocation12], 4294959088  ;;  %v131_v0 = vld [vmem:[#allocation5] sm:$0xff]  ;;  %v132_v2 = vld [vmem:[#allocation5 + $0x8] sm:$0xff]  ;;  %s9981_s6 = smov [#allocation14]  }
  0x7f   :  { %v135_v1 = vld [vmem:[#allocation5 + $0x20] sm:$0xff]  ;;  %v136_v4 = vld [vmem:[#allocation5 + $0x28] sm:$0xff]  ;;  %s8402_s13 = sshll.u32 %s9981_s6, 4  ;;  %s8403_s13 = int_to_ptr.vmem [resolvable:$true] %s8402_s13 }
  0x80   :  { %v8415_v3 = vcombine.high %v131_v0, %v135_v1  ;;  %v8414_v5 = vcombine.low %v131_v0, %v135_v1  ;;  %v139_v6 = vld [vmem:[#allocation5 + $0x40] sm:$0xff]  ;;  %v8417_v8 = vcombine.high %v132_v2, %v136_v4  ;;  %v8416_v9 = vcombine.low %v132_v2, %v136_v4  ;;  %v140_v11 = vld [vmem:[#allocation5 + $0x48] sm:$0xff]  ;;  %s9938_s14 = scalar_lea.vmem %s8403_s13, 128  ;;  %p9943_p1 = scmp.lt.s32.totalorder %s8403_s13, %s8403_s13 }
  0x81   :  { %v143_v7 = vld [vmem:[#allocation5 + $0x60] sm:$0xff]  ;;  %v144_v12 = vld [vmem:[#allocation5 + $0x68] sm:$0xff]  ;;  %p9939_p0 = scmp.ne.s32.totalorder %s8403_s13, %s9938_s14  ;;  %p9944_p2 = scmp.lt.s32.totalorder %s9938_s14, %s9938_s14 }
  0x82   :  { %v8423_v10 = vcombine.high %v139_v6, %v143_v7  ;;  %v147_v13 = vld [vmem:[#allocation5 + $0x80] sm:$0xff]  ;;  %3245 = vmatprep.subr.bf16.mxu0 %v8415_v3  ;;  %v8425_v14 = vcombine.high %v140_v11, %v144_v12  ;;  %v148_v16 = vld [vmem:[#allocation5 + $0x88] sm:$0xff]  ;;  %3409 = vmatprep.subr.bf16.mxu1 %v8417_v8  ;;  %v8422_v18 = vcombine.low %v139_v6, %v143_v7 }
  0x83   :  { %v151_v15 = vld [vmem:[#allocation5 + $0xa0] sm:$0xff]  ;;  %v152_v17 = vld [vmem:[#allocation5 + $0xa8] sm:$0xff]  ;;  %3246 = vmatpush1.bf16.msra.mxu0 %v8414_v5  ;;  %3410 = vmatpush1.bf16.msra.mxu1 %v8416_v9  ;;  %v8424_v19 = vcombine.low %v140_v11, %v144_v12  ;;  %p9945_p3 = por %p9944_p2, %p9943_p1 }
  0x84   :  { %3247 = vmatprep.subr.bf16.mxu0 %v8423_v10  ;;  %v8431_v20 = vcombine.high %v147_v13, %v151_v15  ;;  %3411 = vmatprep.subr.bf16.mxu1 %v8425_v14  ;;  %v8433_v21 = vcombine.high %v148_v16, %v152_v17  ;;  %v155_v22 = vld [vmem:[#allocation5 + $0xc0] sm:$0xff]  ;;  %v156_v24 = vld [vmem:[#allocation5 + $0xc8] sm:$0xff]  ;;  %v8430_v26 = vcombine.low %v147_v13, %v151_v15 }
  0x85   :  { %v159_v23 = vld [vmem:[#allocation5 + $0xe0] sm:$0xff]  ;;  %v160_v25 = vld [vmem:[#allocation5 + $0xe8] sm:$0xff]  ;;  %v8432_v27 = vcombine.low %v148_v16, %v152_v17  ;;  %p9946_p4 = pnand %p9945_p3, %p9939_p0 }
  0x86   :  { %v8439_v28 = vcombine.high %v155_v22, %v159_v23  ;;  %v8441_v29 = vcombine.high %v156_v24, %v160_v25  ;;  %v163_v30 = vld [vmem:[#allocation5 + $0x100] sm:$0xff]  ;;  %v164_v32 = vld [vmem:[#allocation5 + $0x108] sm:$0xff]  ;;  %v8438_v34 = vcombine.low %v155_v22, %v159_v23  ;;  %v8440_v35 = vcombine.low %v156_v24, %v160_v25 }
  0x87   :  { %3248 = vmatpush1.bf16.msra.mxu0 %v8422_v18  ;;  %3412 = vmatpush1.bf16.msra.mxu1 %v8424_v19  ;;  %v167_v31 = vld [vmem:[#allocation5 + $0x120] sm:$0xff]  ;;  %v168_v33 = vld [vmem:[#allocation5 + $0x128] sm:$0xff] }
  0x88   :  { %3249 = vmatprep.subr.bf16.mxu0 %v8431_v20  ;;  %3413 = vmatprep.subr.bf16.mxu1 %v8433_v21  ;;  %v8447_v36 = vcombine.high %v163_v30, %v167_v31  ;;  %v8449_v37 = vcombine.high %v164_v32, %v168_v33  ;;  %v171_v38 = vld [vmem:[#allocation5 + $0x140] sm:$0xff]  ;;  %v172_v40 = vld [vmem:[#allocation5 + $0x148] sm:$0xff]  ;;  %v8446_v42 = vcombine.low %v163_v30, %v167_v31 }
  0x89   :  { %v175_v39 = vld [vmem:[#allocation5 + $0x160] sm:$0xff]  ;;  %v176_v41 = vld [vmem:[#allocation5 + $0x168] sm:$0xff]  ;;  %v8448_v43 = vcombine.low %v164_v32, %v168_v33 }
  0x8a   :  { %v8455_v44 = vcombine.high %v171_v38, %v175_v39  ;;  %v8457_v45 = vcombine.high %v172_v40, %v176_v41  ;;  %v179_v46 = vld [vmem:[#allocation5 + $0x180] sm:$0xff]  ;;  %v180_v48 = vld [vmem:[#allocation5 + $0x188] sm:$0xff]  ;;  %v8454_v50 = vcombine.low %v171_v38, %v175_v39  ;;  %v8456_v51 = vcombine.low %v172_v40, %v176_v41 }
  0x8b   :  { %3250 = vmatpush1.bf16.msra.mxu0 %v8430_v26  ;;  %3414 = vmatpush1.bf16.msra.mxu1 %v8432_v27  ;;  %v183_v47 = vld [vmem:[#allocation5 + $0x1a0] sm:$0xff]  ;;  %v184_v49 = vld [vmem:[#allocation5 + $0x1a8] sm:$0xff] }
  0x8c   :  { %3251 = vmatprep.subr.bf16.mxu0 %v8439_v28  ;;  %3415 = vmatprep.subr.bf16.mxu1 %v8441_v29  ;;  %v8463_v52 = vcombine.high %v179_v46, %v183_v47  ;;  %v116_v53 = vld [vmem:[#allocation2 + $0x8] sm:$0xff]  ;;  %v8465_v54 = vcombine.high %v180_v48, %v184_v49  ;;  %v187_v55 = vld [vmem:[#allocation5 + $0x1c0] sm:$0xff]  ;;  %v8462_v60 = vcombine.low %v179_v46, %v183_v47 }
  0x8d   :  { %v191_v56 = vld [vmem:[#allocation5 + $0x1e0] sm:$0xff]  ;;  %v10106_v57 = vpack.c.bf16 %v116_v53, %v116_v53  ;;  %v188_v58 = vld [vmem:[#allocation5 + $0x1c8] sm:$0xff]  ;;  %v8464_v61 = vcombine.low %v180_v48, %v184_v49 }
  0x8e   :  { %v192_v59 = vld [vmem:[#allocation5 + $0x1e8] sm:$0xff]  ;;  %v8471_v62 = vcombine.high %v187_v55, %v191_v56  ;;  %v195_v0 = vld [vmem:[#allocation5 + $0x200] sm:$0xff]  ;;  %v8470_v4 = vcombine.low %v187_v55, %v191_v56 }
  0x8f   :  { %3252 = vmatpush1.bf16.msra.mxu0 %v8438_v34  ;;  %3416 = vmatpush1.bf16.msra.mxu1 %v8440_v35  ;;  %v8473_v63 = vcombine.high %v188_v58, %v192_v59  ;;  %v199_v1 = vld [vmem:[#allocation5 + $0x220] sm:$0xff]  ;;  %v196_v2 = vld [vmem:[#allocation5 + $0x208] sm:$0xff]  ;;  %v8472_v5 = vcombine.low %v188_v58, %v192_v59 }
  0x90   :  { %3253 = vmatprep.subr.bf16.mxu0 %v8447_v36  ;;  %3417 = vmatprep.subr.bf16.mxu1 %v8449_v37  ;;  %v200_v3 = vld [vmem:[#allocation5 + $0x228] sm:$0xff]  ;;  %v8479_v6 = vcombine.high %v195_v0, %v199_v1  ;;  %v203_v8 = vld [vmem:[#allocation5 + $0x240] sm:$0xff]  ;;  %v8478_v12 = vcombine.low %v195_v0, %v199_v1 }
  0x91   :  { %3277 = vmatprep.mubr.bf16.mxu0 %v10106_v57  ;;  %3441 = vmatprep.mubr.bf16.mxu1 %v10106_v57  ;;  %v8481_v7 = vcombine.high %v196_v2, %v200_v3  ;;  %v207_v9 = vld [vmem:[#allocation5 + $0x260] sm:$0xff]  ;;  %v204_v10 = vld [vmem:[#allocation5 + $0x248] sm:$0xff]  ;;  %v8480_v13 = vcombine.low %v196_v2, %v200_v3 }
  0x92   :  { %v208_v11 = vld [vmem:[#allocation5 + $0x268] sm:$0xff]  ;;  %v8487_v14 = vcombine.high %v203_v8, %v207_v9  ;;  %v211_v16 = vld [vmem:[#allocation5 + $0x280] sm:$0xff]  ;;  %v8486_v20 = vcombine.low %v203_v8, %v207_v9 }
  0x93   :  { %3254 = vmatpush1.bf16.msra.mxu0 %v8446_v42  ;;  %3418 = vmatpush1.bf16.msra.mxu1 %v8448_v43  ;;  %v8489_v15 = vcombine.high %v204_v10, %v208_v11  ;;  %v215_v17 = vld [vmem:[#allocation5 + $0x2a0] sm:$0xff]  ;;  %v212_v18 = vld [vmem:[#allocation5 + $0x288] sm:$0xff]  ;;  %v8488_v21 = vcombine.low %v204_v10, %v208_v11 }
  0x94   :  { %3255 = vmatprep.subr.bf16.mxu0 %v8455_v44  ;;  %3419 = vmatprep.subr.bf16.mxu1 %v8457_v45  ;;  %v216_v19 = vld [vmem:[#allocation5 + $0x2a8] sm:$0xff]  ;;  %v8495_v22 = vcombine.high %v211_v16, %v215_v17  ;;  %v219_v24 = vld [vmem:[#allocation5 + $0x2c0] sm:$0xff]  ;;  %v8494_v28 = vcombine.low %v211_v16, %v215_v17 }
  0x95   :  { %v8497_v23 = vcombine.high %v212_v18, %v216_v19  ;;  %v223_v25 = vld [vmem:[#allocation5 + $0x2e0] sm:$0xff]  ;;  %v220_v26 = vld [vmem:[#allocation5 + $0x2c8] sm:$0xff]  ;;  %v8496_v29 = vcombine.low %v212_v18, %v216_v19 }
  0x96   :  { %v224_v27 = vld [vmem:[#allocation5 + $0x2e8] sm:$0xff]  ;;  %v8503_v30 = vcombine.high %v219_v24, %v223_v25  ;;  %v227_v32 = vld [vmem:[#allocation5 + $0x300] sm:$0xff]  ;;  %v8502_v36 = vcombine.low %v219_v24, %v223_v25 }
  0x97   :  { %3256 = vmatpush1.bf16.msra.mxu0 %v8454_v50  ;;  %3420 = vmatpush1.bf16.msra.mxu1 %v8456_v51  ;;  %v8505_v31 = vcombine.high %v220_v26, %v224_v27  ;;  %v231_v33 = vld [vmem:[#allocation5 + $0x320] sm:$0xff]  ;;  %v228_v34 = vld [vmem:[#allocation5 + $0x308] sm:$0xff]  ;;  %v8504_v37 = vcombine.low %v220_v26, %v224_v27 }
  0x98   :  { %3257 = vmatprep.subr.bf16.mxu0 %v8463_v52  ;;  %3421 = vmatprep.subr.bf16.mxu1 %v8465_v54  ;;  %v232_v35 = vld [vmem:[#allocation5 + $0x328] sm:$0xff]  ;;  %v8511_v38 = vcombine.high %v227_v32, %v231_v33  ;;  %v235_v40 = vld [vmem:[#allocation5 + $0x340] sm:$0xff]  ;;  %v8510_v44 = vcombine.low %v227_v32, %v231_v33 }
  0x99   :  { %v8513_v39 = vcombine.high %v228_v34, %v232_v35  ;;  %v239_v41 = vld [vmem:[#allocation5 + $0x360] sm:$0xff]  ;;  %v236_v42 = vld [vmem:[#allocation5 + $0x348] sm:$0xff]  ;;  %v8512_v45 = vcombine.low %v228_v34, %v232_v35 }
  0x9a   :  { %v240_v43 = vld [vmem:[#allocation5 + $0x368] sm:$0xff]  ;;  %v8519_v46 = vcombine.high %v235_v40, %v239_v41  ;;  %v243_v48 = vld [vmem:[#allocation5 + $0x380] sm:$0xff]  ;;  %v8518_v52 = vcombine.low %v235_v40, %v239_v41 }
  0x9b   :  { %3258 = vmatpush1.bf16.msra.mxu0 %v8462_v60  ;;  %3422 = vmatpush1.bf16.msra.mxu1 %v8464_v61  ;;  %v8521_v47 = vcombine.high %v236_v42, %v240_v43  ;;  %v247_v49 = vld [vmem:[#allocation5 + $0x3a0] sm:$0xff]  ;;  %v244_v50 = vld [vmem:[#allocation5 + $0x388] sm:$0xff]  ;;  %v8520_v53 = vcombine.low %v236_v42, %v240_v43 }
  0x9c   :  { %3259 = vmatprep.subr.bf16.mxu0 %v8471_v62  ;;  %3423 = vmatprep.subr.bf16.mxu1 %v8473_v63  ;;  %v248_v51 = vld [vmem:[#allocation5 + $0x3a8] sm:$0xff]  ;;  %v8527_v54 = vcombine.high %v243_v48, %v247_v49  ;;  %v251_v56 = vld [vmem:[#allocation5 + $0x3c0] sm:$0xff]  ;;  %v8526_v61 = vcombine.low %v243_v48, %v247_v49 }
  0x9d   :  { %v8529_v55 = vcombine.high %v244_v50, %v248_v51  ;;  %v255_v58 = vld [vmem:[#allocation5 + $0x3e0] sm:$0xff]  ;;  %v252_v59 = vld [vmem:[#allocation5 + $0x3c8] sm:$0xff]  ;;  %v8528_v62 = vcombine.low %v244_v50, %v248_v51 }
  0x9e   :  { %v256_v60 = vld [vmem:[#allocation5 + $0x3e8] sm:$0xff]  ;;  %v8535_v63 = vcombine.high %v251_v56, %v255_v58  ;;  %v259_v1 = vld [vmem:[#allocation5 + $0x400] sm:$0xff] }
  0x9f   :  { %3260 = vmatpush1.bf16.msra.mxu0 %v8470_v4  ;;  %3424 = vmatpush1.bf16.msra.mxu1 %v8472_v5  ;;  %v8537_v0 = vcombine.high %v252_v59, %v256_v60  ;;  %v263_v2 = vld [vmem:[#allocation5 + $0x420] sm:$0xff]  ;;  %v260_v3 = vld [vmem:[#allocation5 + $0x408] sm:$0xff]  ;;  %v8534_v5 = vcombine.low %v251_v56, %v255_v58 }
  0xa0   :  { %3261 = vmatprep.subr.bf16.mxu0 %v8479_v6  ;;  %3425 = vmatprep.subr.bf16.mxu1 %v8481_v7  ;;  %v264_v4 = vld [vmem:[#allocation5 + $0x428] sm:$0xff]  ;;  %v115_v6 = vld [vmem:[#allocation2] sm:$0xff]  ;;  %v8536_v7 = vcombine.low %v252_v59, %v256_v60  ;;  %v8543_v8 = vcombine.high %v259_v1, %v263_v2  ;;  %v8542_v16 = vcombine.low %v259_v1, %v263_v2 }
  0xa1   :  { %v8545_v9 = vcombine.high %v260_v3, %v264_v4  ;;  %v267_v10 = vld [vmem:[#allocation5 + $0x440] sm:$0xff]  ;;  %v8544_v17 = vcombine.low %v260_v3, %v264_v4  ;;  %v280_v24 = vld [vmem:[#allocation5 + $0x4a8] sm:$0xff] }
  0xa2   :  { %v271_v11 = vld [vmem:[#allocation5 + $0x460] sm:$0xff]  ;;  %v288_v32 = vld [vmem:[#allocation5 + $0x4e8] sm:$0xff] }
  0xa3   :  { %3262 = vmatpush1.bf16.msra.mxu0 %v8478_v12  ;;  %3426 = vmatpush1.bf16.msra.mxu1 %v8480_v13  ;;  %v10110_v12 = vpack.c.bf16 %v115_v6, %v115_v6  ;;  %v268_v13 = vld [vmem:[#allocation5 + $0x448] sm:$0xff]  ;;  %v8551_v18 = vcombine.high %v267_v10, %v271_v11  ;;  %v8550_v25 = vcombine.low %v267_v10, %v271_v11  ;;  %v327_v6 = vld [vmem:[#allocation5 + $0x620] sm:$0xff] }
  0xa4   :  { %3263 = vmatprep.subr.bf16.mxu0 %v8487_v14  ;;  %3427 = vmatprep.subr.bf16.mxu1 %v8489_v15  ;;  %v272_v14 = vld [vmem:[#allocation5 + $0x468] sm:$0xff]  ;;  %v118_v15 = vld [vmem:[#allocation2 + $0x18] sm:$0xff] }
  0xa5   :  { %v8553_v19 = vcombine.high %v268_v13, %v272_v14  ;;  %v8552_v26 = vcombine.low %v268_v13, %v272_v14  ;;  %v296_v40 = vld [vmem:[#allocation5 + $0x528] sm:$0xff]  ;;  %v331_v14 = vld [vmem:[#allocation5 + $0x640] sm:$0xff] }
  0xa6   :  { %v304_v48 = vld [vmem:[#allocation5 + $0x568] sm:$0xff] }
  0xa7   :  { %3264 = vmatpush1.bf16.msra.mxu0 %v8486_v20  ;;  %3428 = vmatpush1.bf16.msra.mxu1 %v8488_v21  ;;  %v275_v20 = vld [vmem:[#allocation5 + $0x480] sm:$0xff]  ;;  %v312_v56 = vld [vmem:[#allocation5 + $0x5a8] sm:$0xff] }
  0xa8   :  { %3265 = vmatprep.subr.bf16.mxu0 %v8495_v22  ;;  %3429 = vmatprep.subr.bf16.mxu1 %v8497_v23  ;;  %v279_v21 = vld [vmem:[#allocation5 + $0x4a0] sm:$0xff]  ;;  %v276_v22 = vld [vmem:[#allocation5 + $0x488] sm:$0xff]  ;;  %v10112_v23 = vpack.c.bf16 %v118_v15, %v118_v15 }
  0xa9   :  { %v8559_v27 = vcombine.high %v275_v20, %v279_v21  ;;  %v8558_v33 = vcombine.low %v275_v20, %v279_v21  ;;  %v8560_v34 = vcombine.low %v276_v22, %v280_v24  ;;  %v320_v1 = vld [vmem:[#allocation5 + $0x5e8] sm:$0xff]  ;;  %v335_v15 = vld [vmem:[#allocation5 + $0x660] sm:$0xff] }
  0xaa   :  { %v8615_v21 = vcombine.high %v331_v14, %v335_v15 }
  0xab   :  { %3266 = vmatpush1.bf16.msra.mxu0 %v8494_v28  ;;  %3430 = vmatpush1.bf16.msra.mxu1 %v8496_v29  ;;  %v283_v28 = vld [vmem:[#allocation5 + $0x4c0] sm:$0xff] }
  0xac   :  { %3267 = vmatprep.subr.bf16.mxu0 %v8503_v30  ;;  %3431 = vmatprep.subr.bf16.mxu1 %v8505_v31  ;;  %v287_v29 = vld [vmem:[#allocation5 + $0x4e0] sm:$0xff]  ;;  %v284_v30 = vld [vmem:[#allocation5 + $0x4c8] sm:$0xff]  ;;  %v8561_v31 = vcombine.high %v276_v22, %v280_v24 }
  0xad   :  { %v8567_v35 = vcombine.high %v283_v28, %v287_v29  ;;  %v8566_v41 = vcombine.low %v283_v28, %v287_v29  ;;  %v8568_v42 = vcombine.low %v284_v30, %v288_v32  ;;  %v339_v22 = vld [vmem:[#allocation5 + $0x680] sm:$0xff]  ;;  %v8614_v28 = vcombine.low %v331_v14, %v335_v15  ;;  %v117_v14 = vld [vmem:[#allocation2 + $0x10] sm:$0xff] }
  0xae   :  { %v343_v24 = vld [vmem:[#allocation5 + $0x6a0] sm:$0xff] }
  0xaf   :  { %3268 = vmatpush1.bf16.msra.mxu0 %v8502_v36  ;;  %3432 = vmatpush1.bf16.msra.mxu1 %v8504_v37  ;;  %v291_v36 = vld [vmem:[#allocation5 + $0x500] sm:$0xff] }
  0xb0   :  { %3269 = vmatprep.subr.bf16.mxu0 %v8511_v38  ;;  %3433 = vmatprep.subr.bf16.mxu1 %v8513_v39  ;;  %v295_v37 = vld [vmem:[#allocation5 + $0x520] sm:$0xff]  ;;  %v292_v38 = vld [vmem:[#allocation5 + $0x508] sm:$0xff]  ;;  %v8569_v39 = vcombine.high %v284_v30, %v288_v32  ;;  %v8623_v30 = vcombine.high %v339_v22, %v343_v24 }
  0xb1   :  { %v8575_v43 = vcombine.high %v291_v36, %v295_v37  ;;  %v8574_v49 = vcombine.low %v291_v36, %v295_v37  ;;  %v8576_v50 = vcombine.low %v292_v38, %v296_v40  ;;  %v351_v32 = vld [vmem:[#allocation5 + $0x6e0] sm:$0xff]  ;;  %v8622_v36 = vcombine.low %v339_v22, %v343_v24  ;;  %v120_v24 = vld [vmem:[#allocation2 + $0x28] sm:$0xff] }
  0xb3   :  { %3270 = vmatpush1.bf16.msra.mxu0 %v8510_v44  ;;  %3434 = vmatpush1.bf16.msra.mxu1 %v8512_v45  ;;  %v299_v44 = vld [vmem:[#allocation5 + $0x540] sm:$0xff] }
  0xb4   :  { %3271 = vmatprep.subr.bf16.mxu0 %v8519_v46  ;;  %3435 = vmatprep.subr.bf16.mxu1 %v8521_v47  ;;  %v303_v45 = vld [vmem:[#allocation5 + $0x560] sm:$0xff]  ;;  %v300_v46 = vld [vmem:[#allocation5 + $0x548] sm:$0xff]  ;;  %v8577_v47 = vcombine.high %v292_v38, %v296_v40 }
  0xb5   :  { %v8583_v51 = vcombine.high %v299_v44, %v303_v45  ;;  %v8582_v58 = vcombine.low %v299_v44, %v303_v45  ;;  %v8584_v59 = vcombine.low %v300_v46, %v304_v48  ;;  %v359_v40 = vld [vmem:[#allocation5 + $0x720] sm:$0xff] }
  0xb7   :  { %3272 = vmatpush1.bf16.msra.mxu0 %v8518_v52  ;;  %3436 = vmatpush1.bf16.msra.mxu1 %v8520_v53  ;;  %v307_v52 = vld [vmem:[#allocation5 + $0x580] sm:$0xff] }
  0xb8   :  { %3273 = vmatprep.subr.bf16.mxu0 %v8527_v54  ;;  %3437 = vmatprep.subr.bf16.mxu1 %v8529_v55  ;;  %v311_v53 = vld [vmem:[#allocation5 + $0x5a0] sm:$0xff]  ;;  %v308_v54 = vld [vmem:[#allocation5 + $0x588] sm:$0xff]  ;;  %v8585_v55 = vcombine.high %v300_v46, %v304_v48 }
  0xb9   :  { %v8591_v60 = vcombine.high %v307_v52, %v311_v53  ;;  %v8590_v2 = vcombine.low %v307_v52, %v311_v53  ;;  %v8592_v3 = vcombine.low %v308_v54, %v312_v56  ;;  %v367_v48 = vld [vmem:[#allocation5 + $0x760] sm:$0xff] }
  0xbb   :  { %3274 = vmatpush1.bf16.msra.mxu0 %v8526_v61  ;;  %3438 = vmatpush1.bf16.msra.mxu1 %v8528_v62  ;;  %v315_v61 = vld [vmem:[#allocation5 + $0x5c0] sm:$0xff] }
  0xbc   :  { %3275 = vmatprep.subr.bf16.mxu0 %v8535_v63  ;;  %3439 = vmatprep.subr.bf16.mxu1 %v8537_v0  ;;  %v319_v62 = vld [vmem:[#allocation5 + $0x5e0] sm:$0xff]  ;;  %v316_v63 = vld [vmem:[#allocation5 + $0x5c8] sm:$0xff]  ;;  %v8593_v0 = vcombine.high %v308_v54, %v312_v56 }
  0xbd   :  { %v8599_v4 = vcombine.high %v315_v61, %v319_v62  ;;  %v8598_v10 = vcombine.low %v315_v61, %v319_v62  ;;  %v8600_v11 = vcombine.low %v316_v63, %v320_v1  ;;  %v375_v56 = vld [vmem:[#allocation5 + $0x7a0] sm:$0xff] }
  0xbf   :  { %3276 = vmatpush1.bf16.msra.mxu0 %v8534_v5  ;;  %3440 = vmatpush1.bf16.msra.mxu1 %v8536_v7  ;;  %v323_v5 = vld [vmem:[#allocation5 + $0x600] sm:$0xff]  ;;  %v324_v7 = vld [vmem:[#allocation5 + $0x608] sm:$0xff] }
  0xc0   :  { %3286 = vmatprep.subr.bf16.mxu0 %v8543_v8  ;;  %3450 = vmatprep.subr.bf16.mxu1 %v8545_v9  ;;  %v8601_v8 = vcombine.high %v316_v63, %v320_v1  ;;  %v328_v9 = vld [vmem:[#allocation5 + $0x628] sm:$0xff]  ;;  %v8607_v13 = vcombine.high %v323_v5, %v327_v6  ;;  %v383_v1 = vld [vmem:[#allocation5 + $0x7e0] sm:$0xff] }
  0xc1   :  { %v8608_v20 = vcombine.low %v324_v7, %v328_v9 }
  0xc2   :  { %3278 = vmatmul.mubr.bf16.vlgmr.msra.gmra.mrb[0].mxu0 %v10110_v12  ;;  %3442 = vmatmul.mubr.bf16.vlgmr.msra.gmra.mrb[0].mxu1 %v10110_v12 }
  0xc3   :  { %3287 = vmatpush1.bf16.msra.mxu0 %v8542_v16  ;;  %3451 = vmatpush1.bf16.msra.mxu1 %v8544_v17  ;;  %v332_v16 = vld [vmem:[#allocation5 + $0x648] sm:$0xff]  ;;  %v8609_v17 = vcombine.high %v324_v7, %v328_v9  ;;  %v391_v9 = vld [vmem:[#allocation5 + $0x820] sm:$0xff] }
  0xc4   :  { %3288 = vmatprep.subr.bf16.mxu0 %v8551_v18  ;;  %3452 = vmatprep.subr.bf16.mxu1 %v8553_v19  ;;  %v336_v18 = vld [vmem:[#allocation5 + $0x668] sm:$0xff]  ;;  %v8606_v19 = vcombine.low %v323_v5, %v327_v6  ;;  %v387_v6 = vld [vmem:[#allocation5 + $0x800] sm:$0xff] }
  0xc5   :  { %3318 = vmatprep.mubr.bf16.mxu0 %v10112_v23  ;;  %3482 = vmatprep.mubr.bf16.mxu1 %v10112_v23  ;;  %v8616_v29 = vcombine.low %v332_v16, %v336_v18 }
  0xc7   :  { %3289 = vmatpush1.bf16.msra.mxu0 %v8550_v25  ;;  %3453 = vmatpush1.bf16.msra.mxu1 %v8552_v26  ;;  %v340_v25 = vld [vmem:[#allocation5 + $0x688] sm:$0xff]  ;;  %v8617_v26 = vcombine.high %v332_v16, %v336_v18  ;;  %v395_v16 = vld [vmem:[#allocation5 + $0x840] sm:$0xff]  ;;  %v8671_v18 = vcombine.high %v387_v6, %v391_v9 }
  0xc8   :  { %3290 = vmatprep.subr.bf16.mxu0 %v8559_v27  ;;  %3454 = vmatprep.subr.bf16.mxu1 %v8561_v31  ;;  %v344_v27 = vld [vmem:[#allocation5 + $0x6a8] sm:$0xff]  ;;  %v347_v31 = vld [vmem:[#allocation5 + $0x6c0] sm:$0xff] }
  0xc9   :  { %v8624_v37 = vcombine.low %v340_v25, %v344_v27  ;;  %v8631_v38 = vcombine.high %v347_v31, %v351_v32  ;;  %v8630_v44 = vcombine.low %v347_v31, %v351_v32  ;;  %v404_v32 = vld [vmem:[#allocation5 + $0x888] sm:$0xff] }
  0xcb   :  { %3291 = vmatpush1.bf16.msra.mxu0 %v8558_v33  ;;  %3455 = vmatpush1.bf16.msra.mxu1 %v8560_v34  ;;  %v348_v33 = vld [vmem:[#allocation5 + $0x6c8] sm:$0xff]  ;;  %v8625_v34 = vcombine.high %v340_v25, %v344_v27  ;;  %v10118_v25 = vpack.c.bf16 %v117_v14, %v117_v14 }
  0xcc   :  { %3292 = vmatprep.subr.bf16.mxu0 %v8567_v35  ;;  %3456 = vmatprep.subr.bf16.mxu1 %v8569_v39  ;;  %v352_v35 = vld [vmem:[#allocation5 + $0x6e8] sm:$0xff]  ;;  %v355_v39 = vld [vmem:[#allocation5 + $0x700] sm:$0xff] }
  0xcd   :  { %v8632_v45 = vcombine.low %v348_v33, %v352_v35  ;;  %v8639_v46 = vcombine.high %v355_v39, %v359_v40  ;;  %v8638_v52 = vcombine.low %v355_v39, %v359_v40  ;;  %v411_v39 = vld [vmem:[#allocation5 + $0x8c0] sm:$0xff] }
  0xce   :  { %v415_v40 = vld [vmem:[#allocation5 + $0x8e0] sm:$0xff] }
  0xcf   :  { %3293 = vmatpush1.bf16.msra.mxu0 %v8566_v41  ;;  %3457 = vmatpush1.bf16.msra.mxu1 %v8568_v42  ;;  %v356_v41 = vld [vmem:[#allocation5 + $0x708] sm:$0xff]  ;;  %v8633_v42 = vcombine.high %v348_v33, %v352_v35 }
  0xd0   :  { %3294 = vmatprep.subr.bf16.mxu0 %v8575_v43  ;;  %3458 = vmatprep.subr.bf16.mxu1 %v8577_v47  ;;  %v360_v43 = vld [vmem:[#allocation5 + $0x728] sm:$0xff]  ;;  %v363_v47 = vld [vmem:[#allocation5 + $0x740] sm:$0xff] }
  0xd1   :  { %v8640_v53 = vcombine.low %v356_v41, %v360_v43  ;;  %v8647_v54 = vcombine.high %v363_v47, %v367_v48  ;;  %v8646_v61 = vcombine.low %v363_v47, %v367_v48  ;;  %v408_v33 = vld [vmem:[#allocation5 + $0x8a8] sm:$0xff]  ;;  %v419_v47 = vld [vmem:[#allocation5 + $0x900] sm:$0xff] }
  0xd2   :  { %v423_v48 = vld [vmem:[#allocation5 + $0x920] sm:$0xff] }
  0xd3   :  { %3295 = vmatpush1.bf16.msra.mxu0 %v8574_v49  ;;  %3459 = vmatpush1.bf16.msra.mxu1 %v8576_v50  ;;  %v364_v49 = vld [vmem:[#allocation5 + $0x748] sm:$0xff]  ;;  %v8641_v50 = vcombine.high %v356_v41, %v360_v43 }
  0xd4   :  { %3296 = vmatprep.subr.bf16.mxu0 %v8583_v51  ;;  %3460 = vmatprep.subr.bf16.mxu1 %v8585_v55  ;;  %v368_v51 = vld [vmem:[#allocation5 + $0x768] sm:$0xff]  ;;  %v371_v55 = vld [vmem:[#allocation5 + $0x780] sm:$0xff] }
  0xd5   :  { %v8648_v62 = vcombine.low %v364_v49, %v368_v51  ;;  %v8655_v63 = vcombine.high %v371_v55, %v375_v56  ;;  %v8654_v5 = vcombine.low %v371_v55, %v375_v56  ;;  %v412_v41 = vld [vmem:[#allocation5 + $0x8c8] sm:$0xff]  ;;  %v427_v55 = vld [vmem:[#allocation5 + $0x940] sm:$0xff] }
  0xd6   :  { %v431_v56 = vld [vmem:[#allocation5 + $0x960] sm:$0xff] }
  0xd7   :  { %3297 = vmatpush1.bf16.msra.mxu0 %v8582_v58  ;;  %3461 = vmatpush1.bf16.msra.mxu1 %v8584_v59  ;;  %v372_v58 = vld [vmem:[#allocation5 + $0x788] sm:$0xff]  ;;  %v8649_v59 = vcombine.high %v364_v49, %v368_v51  ;;  %v8694_v51 = vcombine.low %v411_v39, %v415_v40 }
  0xd8   :  { %3298 = vmatprep.subr.bf16.mxu0 %v8591_v60  ;;  %3462 = vmatprep.subr.bf16.mxu1 %v8593_v0  ;;  %v376_v60 = vld [vmem:[#allocation5 + $0x7a8] sm:$0xff]  ;;  %v379_v0 = vld [vmem:[#allocation5 + $0x7c0] sm:$0xff] }
  0xd9   :  { %v8656_v7 = vcombine.low %v372_v58, %v376_v60  ;;  %v8662_v15 = vcombine.low %v379_v0, %v383_v1  ;;  %v420_v49 = vld [vmem:[#allocation5 + $0x908] sm:$0xff] }
  0xdb   :  { %3299 = vmatpush1.bf16.msra.mxu0 %v8590_v2  ;;  %3463 = vmatpush1.bf16.msra.mxu1 %v8592_v3  ;;  %v380_v2 = vld [vmem:[#allocation5 + $0x7c8] sm:$0xff]  ;;  %v8657_v3 = vcombine.high %v372_v58, %v376_v60  ;;  %v8702_v60 = vcombine.low %v419_v47, %v423_v48 }
  0xdc   :  { %3300 = vmatprep.subr.bf16.mxu0 %v8599_v4  ;;  %3464 = vmatprep.subr.bf16.mxu1 %v8601_v8  ;;  %v384_v4 = vld [vmem:[#allocation5 + $0x7e8] sm:$0xff]  ;;  %v8663_v8 = vcombine.high %v379_v0, %v383_v1  ;;  %v435_v0 = vld [vmem:[#allocation5 + $0x980] sm:$0xff] }
  0xdd   :  { %v428_v58 = vld [vmem:[#allocation5 + $0x948] sm:$0xff]  ;;  %v439_v1 = vld [vmem:[#allocation5 + $0x9a0] sm:$0xff] }
  0xdf   :  { %3301 = vmatpush1.bf16.msra.mxu0 %v8598_v10  ;;  %3465 = vmatpush1.bf16.msra.mxu1 %v8600_v11  ;;  %v388_v10 = vld [vmem:[#allocation5 + $0x808] sm:$0xff] }
  0xe0   :  { %3302 = vmatprep.subr.bf16.mxu0 %v8607_v13  ;;  %3466 = vmatprep.subr.bf16.mxu1 %v8609_v17  ;;  %v392_v11 = vld [vmem:[#allocation5 + $0x828] sm:$0xff]  ;;  %v8665_v13 = vcombine.high %v380_v2, %v384_v4  ;;  %v8664_v17 = vcombine.low %v380_v2, %v384_v4  ;;  %v8710_v4 = vcombine.low %v427_v55, %v431_v56 }
  0xe1   :  { %v8673_v22 = vcombine.high %v388_v10, %v392_v11  ;;  %v8672_v27 = vcombine.low %v388_v10, %v392_v11  ;;  %v436_v2 = vld [vmem:[#allocation5 + $0x988] sm:$0xff] }
  0xe2   :  { %v444_v10 = vld [vmem:[#allocation5 + $0x9c8] sm:$0xff] }
  0xe3   :  { %3303 = vmatpush1.bf16.msra.mxu0 %v8606_v19  ;;  %3467 = vmatpush1.bf16.msra.mxu1 %v8608_v20  ;;  %v399_v19 = vld [vmem:[#allocation5 + $0x860] sm:$0xff]  ;;  %v396_v20 = vld [vmem:[#allocation5 + $0x848] sm:$0xff] }
  0xe4   :  { %3304 = vmatprep.subr.bf16.mxu0 %v8615_v21  ;;  %3468 = vmatprep.subr.bf16.mxu1 %v8617_v26  ;;  %v400_v21 = vld [vmem:[#allocation5 + $0x868] sm:$0xff]  ;;  %v8670_v26 = vcombine.low %v387_v6, %v391_v9  ;;  %v8678_v35 = vcombine.low %v395_v16, %v399_v19  ;;  %v8719_v6 = vcombine.high %v435_v0, %v439_v1  ;;  %v447_v9 = vld [vmem:[#allocation5 + $0x9e0] sm:$0xff] }
  0xe5   :  { %v8681_v31 = vcombine.high %v396_v20, %v400_v21  ;;  %v448_v11 = vld [vmem:[#allocation5 + $0x9e8] sm:$0xff] }
  0xe7   :  { %3305 = vmatpush1.bf16.msra.mxu0 %v8614_v28  ;;  %3469 = vmatpush1.bf16.msra.mxu1 %v8616_v29  ;;  %v8679_v28 = vcombine.high %v395_v16, %v399_v19  ;;  %v403_v29 = vld [vmem:[#allocation5 + $0x880] sm:$0xff]  ;;  %v8729_v16 = vcombine.high %v444_v10, %v448_v11  ;;  %v452_v19 = vld [vmem:[#allocation5 + $0xa08] sm:$0xff] }
  0xe8   :  { %3306 = vmatprep.subr.bf16.mxu0 %v8623_v30  ;;  %3470 = vmatprep.subr.bf16.mxu1 %v8625_v34  ;;  %v407_v30 = vld [vmem:[#allocation5 + $0x8a0] sm:$0xff]  ;;  %v10120_v34 = vpack.c.bf16 %v120_v24, %v120_v24 }
  0xe9   :  { %v8686_v43 = vcombine.low %v403_v29, %v407_v30 }
  0xeb   :  { %3307 = vmatpush1.bf16.msra.mxu0 %v8622_v36  ;;  %3471 = vmatpush1.bf16.msra.mxu1 %v8624_v37  ;;  %v8680_v36 = vcombine.low %v396_v20, %v400_v21  ;;  %v8687_v37 = vcombine.high %v403_v29, %v407_v30  ;;  %v456_v20 = vld [vmem:[#allocation5 + $0xa28] sm:$0xff] }
  0xec   :  { %3308 = vmatprep.subr.bf16.mxu0 %v8631_v38  ;;  %3472 = vmatprep.subr.bf16.mxu1 %v8633_v42  ;;  %v8689_v38 = vcombine.high %v404_v32, %v408_v33  ;;  %v416_v42 = vld [vmem:[#allocation5 + $0x8e8] sm:$0xff] }
  0xed   :  { %v460_v29 = vld [vmem:[#allocation5 + $0xa48] sm:$0xff] }
  0xee   :  { %v464_v30 = vld [vmem:[#allocation5 + $0xa68] sm:$0xff] }
  0xef   :  { %3309 = vmatpush1.bf16.msra.mxu0 %v8630_v44  ;;  %3473 = vmatpush1.bf16.msra.mxu1 %v8632_v45  ;;  %v8688_v44 = vcombine.low %v404_v32, %v408_v33  ;;  %v8695_v45 = vcombine.high %v411_v39, %v415_v40  ;;  %v8736_v32 = vcombine.low %v452_v19, %v456_v20  ;;  %v472_v39 = vld [vmem:[#allocation5 + $0xaa8] sm:$0xff] }
  0xf0   :  { %3310 = vmatprep.subr.bf16.mxu0 %v8639_v46  ;;  %3474 = vmatprep.subr.bf16.mxu1 %v8641_v50  ;;  %v8697_v46 = vcombine.high %v412_v41, %v416_v42  ;;  %v424_v50 = vld [vmem:[#allocation5 + $0x928] sm:$0xff] }
  0xf3   :  { %3311 = vmatpush1.bf16.msra.mxu0 %v8638_v52  ;;  %3475 = vmatpush1.bf16.msra.mxu1 %v8640_v53  ;;  %v8696_v52 = vcombine.low %v412_v41, %v416_v42  ;;  %v8703_v53 = vcombine.high %v419_v47, %v423_v48  ;;  %v8744_v41 = vcombine.low %v460_v29, %v464_v30  ;;  %v480_v47 = vld [vmem:[#allocation5 + $0xae8] sm:$0xff] }
  0xf4   :  { %3312 = vmatprep.subr.bf16.mxu0 %v8647_v54  ;;  %3476 = vmatprep.subr.bf16.mxu1 %v8649_v59  ;;  %v8705_v54 = vcombine.high %v420_v49, %v424_v50  ;;  %v432_v59 = vld [vmem:[#allocation5 + $0x968] sm:$0xff] }
  0xf7   :  { %3313 = vmatpush1.bf16.msra.mxu0 %v8646_v61  ;;  %3477 = vmatpush1.bf16.msra.mxu1 %v8648_v62  ;;  %v8704_v61 = vcombine.low %v420_v49, %v424_v50  ;;  %v8711_v62 = vcombine.high %v427_v55, %v431_v56  ;;  %v488_v55 = vld [vmem:[#allocation5 + $0xb28] sm:$0xff] }
  0xf8   :  { %3314 = vmatprep.subr.bf16.mxu0 %v8655_v63  ;;  %3478 = vmatprep.subr.bf16.mxu1 %v8657_v3  ;;  %v8713_v63 = vcombine.high %v428_v58, %v432_v59  ;;  %v440_v3 = vld [vmem:[#allocation5 + $0x9a8] sm:$0xff] }
  0xf9   :  { %v8720_v14 = vcombine.low %v436_v2, %v440_v3 }
  0xfb   :  { %3315 = vmatpush1.bf16.msra.mxu0 %v8654_v5  ;;  %3479 = vmatpush1.bf16.msra.mxu1 %v8656_v7  ;;  %v8712_v5 = vcombine.low %v428_v58, %v432_v59  ;;  %v8721_v7 = vcombine.high %v436_v2, %v440_v3 }
  0xfc   :  { %3316 = vmatprep.subr.bf16.mxu0 %v8663_v8  ;;  %3480 = vmatprep.subr.bf16.mxu1 %v8665_v13  ;;  %v443_v8 = vld [vmem:[#allocation5 + $0x9c0] sm:$0xff]  ;;  %v8718_v13 = vcombine.low %v435_v0, %v439_v1  ;;  %v496_v0 = vld [vmem:[#allocation5 + $0xb68] sm:$0xff] }
  0xfd   :  { %v8726_v21 = vcombine.low %v443_v8, %v447_v9 }
  0xff   :  { %3317 = vmatpush1.bf16.msra.mxu0 %v8662_v15  ;;  %3481 = vmatpush1.bf16.msra.mxu1 %v8664_v17  ;;  %v8727_v15 = vcombine.high %v443_v8, %v447_v9  ;;  %v451_v17 = vld [vmem:[#allocation5 + $0xa00] sm:$0xff]  ;;  %v504_v8 = vld [vmem:[#allocation5 + $0xba8] sm:$0xff] }
 0x100   :  { %3327 = vmatprep.subr.bf16.mxu0 %v8671_v18  ;;  %3491 = vmatprep.subr.bf16.mxu1 %v8673_v22  ;;  %v455_v18 = vld [vmem:[#allocation5 + $0xa20] sm:$0xff]  ;;  %v8728_v22 = vcombine.low %v444_v10, %v448_v11 }
 0x101   :  { %v8735_v24 = vcombine.high %v451_v17, %v455_v18 }
 0x102   :  { %3319 = vmatmul.mubr.bf16.vlgmr.msra.gmra.mrb[0].mxu0 %v10118_v25  ;;  %3483 = vmatmul.mubr.bf16.vlgmr.msra.gmra.mrb[0].mxu1 %v10118_v25 }
 0x103   :  { %3328 = vmatpush1.bf16.msra.mxu0 %v8670_v26  ;;  %3492 = vmatpush1.bf16.msra.mxu1 %v8672_v27  ;;  %v8737_v26 = vcombine.high %v452_v19, %v456_v20  ;;  %v459_v27 = vld [vmem:[#allocation5 + $0xa40] sm:$0xff] }
 0x104   :  { %3329 = vmatprep.subr.bf16.mxu0 %v8679_v28  ;;  %3493 = vmatprep.subr.bf16.mxu1 %v8681_v31  ;;  %v463_v28 = vld [vmem:[#allocation5 + $0xa60] sm:$0xff]  ;;  %v8734_v31 = vcombine.low %v451_v17, %v455_v18  ;;  %v512_v17 = vld [vmem:[#allocation5 + $0xbe8] sm:$0xff] }
 0x105   :  { %3359 = vmatprep.mubr.bf16.mxu0 %v10120_v34  ;;  %3523 = vmatprep.mubr.bf16.mxu1 %v10120_v34  ;;  %v8743_v33 = vcombine.high %v459_v27, %v463_v28  ;;  %v8742_v40 = vcombine.low %v459_v27, %v463_v28  ;;  %v520_v27 = vld [vmem:[#allocation5 + $0xc28] sm:$0xff] }
 0x107   :  { %3330 = vmatpush1.bf16.msra.mxu0 %v8678_v35  ;;  %3494 = vmatpush1.bf16.msra.mxu1 %v8680_v36  ;;  %v8745_v35 = vcombine.high %v460_v29, %v464_v30  ;;  %v467_v36 = vld [vmem:[#allocation5 + $0xa80] sm:$0xff] }
 0x108   :  { %3331 = vmatprep.subr.bf16.mxu0 %v8687_v37  ;;  %3495 = vmatprep.subr.bf16.mxu1 %v8689_v38  ;;  %v471_v37 = vld [vmem:[#allocation5 + $0xaa0] sm:$0xff]  ;;  %v468_v38 = vld [vmem:[#allocation5 + $0xa88] sm:$0xff] }
 0x109   :  { %v8751_v42 = vcombine.high %v467_v36, %v471_v37  ;;  %v8750_v48 = vcombine.low %v467_v36, %v471_v37  ;;  %v8752_v49 = vcombine.low %v468_v38, %v472_v39  ;;  %v119_v29 = vld [vmem:[#allocation2 + $0x20] sm:$0xff]  ;;  %v524_v37 = vld [vmem:[#allocation5 + $0xc48] sm:$0xff] }
 0x10a   :  { %v10126_v36 = vpack.c.bf16 %v119_v29, %v119_v29 }
 0x10b   :  { %3332 = vmatpush1.bf16.msra.mxu0 %v8686_v43  ;;  %3496 = vmatpush1.bf16.msra.mxu1 %v8688_v44  ;;  %v8753_v43 = vcombine.high %v468_v38, %v472_v39  ;;  %v475_v44 = vld [vmem:[#allocation5 + $0xac0] sm:$0xff]  ;;  %v528_v38 = vld [vmem:[#allocation5 + $0xc68] sm:$0xff]  ;;  %v122_v39 = vld [vmem:[#allocation2 + $0x38] sm:$0xff] }
 0x10c   :  { %3333 = vmatprep.subr.bf16.mxu0 %v8695_v45  ;;  %3497 = vmatprep.subr.bf16.mxu1 %v8697_v46  ;;  %v479_v45 = vld [vmem:[#allocation5 + $0xae0] sm:$0xff]  ;;  %v476_v46 = vld [vmem:[#allocation5 + $0xac8] sm:$0xff] }
 0x10d   :  { %v8759_v50 = vcombine.high %v475_v44, %v479_v45  ;;  %v8758_v56 = vcombine.low %v475_v44, %v479_v45  ;;  %v8760_v58 = vcombine.low %v476_v46, %v480_v47  ;;  %v531_v44 = vld [vmem:[#allocation5 + $0xc80] sm:$0xff] }
 0x10e   :  { %v535_v45 = vld [vmem:[#allocation5 + $0xca0] sm:$0xff] }
 0x10f   :  { %3334 = vmatpush1.bf16.msra.mxu0 %v8694_v51  ;;  %3498 = vmatpush1.bf16.msra.mxu1 %v8696_v52  ;;  %v8761_v51 = vcombine.high %v476_v46, %v480_v47  ;;  %v483_v52 = vld [vmem:[#allocation5 + $0xb00] sm:$0xff]  ;;  %v10128_v46 = vpack.c.bf16 %v122_v39, %v122_v39  ;;  %v532_v47 = vld [vmem:[#allocation5 + $0xc88] sm:$0xff] }
 0x110   :  { %3335 = vmatprep.subr.bf16.mxu0 %v8703_v53  ;;  %3499 = vmatprep.subr.bf16.mxu1 %v8705_v54  ;;  %v487_v53 = vld [vmem:[#allocation5 + $0xb20] sm:$0xff]  ;;  %v484_v54 = vld [vmem:[#allocation5 + $0xb08] sm:$0xff] }
 0x111   :  { %v8767_v59 = vcombine.high %v483_v52, %v487_v53  ;;  %v8766_v1 = vcombine.low %v483_v52, %v487_v53  ;;  %v8768_v2 = vcombine.low %v484_v54, %v488_v55  ;;  %v539_v53 = vld [vmem:[#allocation5 + $0xcc0] sm:$0xff] }
 0x113   :  { %3336 = vmatpush1.bf16.msra.mxu0 %v8702_v60  ;;  %3500 = vmatpush1.bf16.msra.mxu1 %v8704_v61  ;;  %v8769_v60 = vcombine.high %v484_v54, %v488_v55  ;;  %v491_v61 = vld [vmem:[#allocation5 + $0xb40] sm:$0xff]  ;;  %v540_v55 = vld [vmem:[#allocation5 + $0xcc8] sm:$0xff] }
 0x114   :  { %3337 = vmatprep.subr.bf16.mxu0 %v8711_v62  ;;  %3501 = vmatprep.subr.bf16.mxu1 %v8713_v63  ;;  %v495_v62 = vld [vmem:[#allocation5 + $0xb60] sm:$0xff]  ;;  %v492_v63 = vld [vmem:[#allocation5 + $0xb48] sm:$0xff] }
 0x115   :  { %v8775_v3 = vcombine.high %v491_v61, %v495_v62  ;;  %v8774_v9 = vcombine.low %v491_v61, %v495_v62  ;;  %v8776_v10 = vcombine.low %v492_v63, %v496_v0  ;;  %v543_v54 = vld [vmem:[#allocation5 + $0xce0] sm:$0xff] }
 0x116   :  { %v547_v62 = vld [vmem:[#allocation5 + $0xd00] sm:$0xff] }
 0x117   :  { %3338 = vmatpush1.bf16.msra.mxu0 %v8710_v4  ;;  %3502 = vmatpush1.bf16.msra.mxu1 %v8712_v5  ;;  %v8777_v4 = vcombine.high %v492_v63, %v496_v0  ;;  %v499_v5 = vld [vmem:[#allocation5 + $0xb80] sm:$0xff]  ;;  %v548_v0 = vld [vmem:[#allocation5 + $0xd08] sm:$0xff] }
 0x118   :  { %3339 = vmatprep.subr.bf16.mxu0 %v8719_v6  ;;  %3503 = vmatprep.subr.bf16.mxu1 %v8721_v7  ;;  %v503_v6 = vld [vmem:[#allocation5 + $0xba0] sm:$0xff]  ;;  %v500_v7 = vld [vmem:[#allocation5 + $0xb88] sm:$0xff] }
 0x119   :  { %v8783_v11 = vcombine.high %v499_v5, %v503_v6  ;;  %v8782_v18 = vcombine.low %v499_v5, %v503_v6  ;;  %v8784_v19 = vcombine.low %v500_v7, %v504_v8  ;;  %v551_v63 = vld [vmem:[#allocation5 + $0xd20] sm:$0xff] }
 0x11a   :  { %v555_v6 = vld [vmem:[#allocation5 + $0xd40] sm:$0xff] }
 0x11b   :  { %3340 = vmatpush1.bf16.msra.mxu0 %v8718_v13  ;;  %3504 = vmatpush1.bf16.msra.mxu1 %v8720_v14  ;;  %v8785_v13 = vcombine.high %v500_v7, %v504_v8  ;;  %v507_v14 = vld [vmem:[#allocation5 + $0xbc0] sm:$0xff]  ;;  %v556_v8 = vld [vmem:[#allocation5 + $0xd48] sm:$0xff] }
 0x11c   :  { %3341 = vmatprep.subr.bf16.mxu0 %v8727_v15  ;;  %3505 = vmatprep.subr.bf16.mxu1 %v8729_v16  ;;  %v511_v15 = vld [vmem:[#allocation5 + $0xbe0] sm:$0xff]  ;;  %v508_v16 = vld [vmem:[#allocation5 + $0xbc8] sm:$0xff] }
 0x11d   :  { %v8791_v20 = vcombine.high %v507_v14, %v511_v15  ;;  %v8790_v28 = vcombine.low %v507_v14, %v511_v15  ;;  %v8792_v30 = vcombine.low %v508_v16, %v512_v17  ;;  %v559_v7 = vld [vmem:[#allocation5 + $0xd60] sm:$0xff] }
 0x11e   :  { %v563_v15 = vld [vmem:[#allocation5 + $0xd80] sm:$0xff] }
 0x11f   :  { %3342 = vmatpush1.bf16.msra.mxu0 %v8726_v21  ;;  %3506 = vmatpush1.bf16.msra.mxu1 %v8728_v22  ;;  %v8793_v21 = vcombine.high %v508_v16, %v512_v17  ;;  %v515_v22 = vld [vmem:[#allocation5 + $0xc00] sm:$0xff]  ;;  %v564_v17 = vld [vmem:[#allocation5 + $0xd88] sm:$0xff] }
 0x120   :  { %3343 = vmatprep.subr.bf16.mxu0 %v8735_v24  ;;  %3507 = vmatprep.subr.bf16.mxu1 %v8737_v26  ;;  %v519_v24 = vld [vmem:[#allocation5 + $0xc20] sm:$0xff]  ;;  %v516_v26 = vld [vmem:[#allocation5 + $0xc08] sm:$0xff] }
 0x121   :  { %v567_v16 = vld [vmem:[#allocation5 + $0xda0] sm:$0xff] }
 0x122   :  { %v8846_v29 = vcombine.low %v563_v15, %v567_v16 }
 0x123   :  { %3344 = vmatpush1.bf16.msra.mxu0 %v8734_v31  ;;  %3508 = vmatpush1.bf16.msra.mxu1 %v8736_v32  ;;  %v8799_v31 = vcombine.high %v515_v22, %v519_v24  ;;  %v8801_v32 = vcombine.high %v516_v26, %v520_v27 }
 0x124   :  { %3345 = vmatprep.subr.bf16.mxu0 %v8743_v33  ;;  %3509 = vmatprep.subr.bf16.mxu1 %v8745_v35  ;;  %v523_v33 = vld [vmem:[#allocation5 + $0xc40] sm:$0xff] }
 0x125   :  { %v527_v35 = vld [vmem:[#allocation5 + $0xc60] sm:$0xff] }
 0x127   :  { %3346 = vmatpush1.bf16.msra.mxu0 %v8742_v40  ;;  %3510 = vmatpush1.bf16.msra.mxu1 %v8744_v41  ;;  %v8798_v40 = vcombine.low %v515_v22, %v519_v24  ;;  %v8800_v41 = vcombine.low %v516_v26, %v520_v27  ;;  %v571_v24 = vld [vmem:[#allocation5 + $0xdc0] sm:$0xff]  ;;  %v572_v27 = vld [vmem:[#allocation5 + $0xdc8] sm:$0xff] }
 0x128   :  { %3347 = vmatprep.subr.bf16.mxu0 %v8751_v42  ;;  %3511 = vmatprep.subr.bf16.mxu1 %v8753_v43  ;;  %v8807_v42 = vcombine.high %v523_v33, %v527_v35  ;;  %v8809_v43 = vcombine.high %v524_v37, %v528_v38  ;;  %v575_v26 = vld [vmem:[#allocation5 + $0xde0] sm:$0xff] }
 0x129   :  { %v8854_v39 = vcombine.low %v571_v24, %v575_v26 }
 0x12b   :  { %3348 = vmatpush1.bf16.msra.mxu0 %v8750_v48  ;;  %3512 = vmatpush1.bf16.msra.mxu1 %v8752_v49  ;;  %v536_v48 = vld [vmem:[#allocation5 + $0xca8] sm:$0xff]  ;;  %v8806_v49 = vcombine.low %v523_v33, %v527_v35  ;;  %v579_v33 = vld [vmem:[#allocation5 + $0xe00] sm:$0xff] }
 0x12c   :  { %3349 = vmatprep.subr.bf16.mxu0 %v8759_v50  ;;  %3513 = vmatprep.subr.bf16.mxu1 %v8761_v51  ;;  %v8808_v50 = vcombine.low %v524_v37, %v528_v38  ;;  %v8815_v51 = vcombine.high %v531_v44, %v535_v45  ;;  %v8817_v52 = vcombine.high %v532_v47, %v536_v48  ;;  %v583_v35 = vld [vmem:[#allocation5 + $0xe20] sm:$0xff]  ;;  %v580_v37 = vld [vmem:[#allocation5 + $0xe08] sm:$0xff] }
 0x12d   :  { %v584_v38 = vld [vmem:[#allocation5 + $0xe28] sm:$0xff] }
 0x12f   :  { %3350 = vmatpush1.bf16.msra.mxu0 %v8758_v56  ;;  %3514 = vmatpush1.bf16.msra.mxu1 %v8760_v58  ;;  %v544_v56 = vld [vmem:[#allocation5 + $0xce8] sm:$0xff]  ;;  %v8814_v58 = vcombine.low %v531_v44, %v535_v45  ;;  %v591_v44 = vld [vmem:[#allocation5 + $0xe60] sm:$0xff] }
 0x130   :  { %3351 = vmatprep.subr.bf16.mxu0 %v8767_v59  ;;  %3515 = vmatprep.subr.bf16.mxu1 %v8769_v60  ;;  %v8816_v59 = vcombine.low %v532_v47, %v536_v48  ;;  %v8823_v60 = vcombine.high %v539_v53, %v543_v54  ;;  %v8825_v61 = vcombine.high %v540_v55, %v544_v56  ;;  %v588_v45 = vld [vmem:[#allocation5 + $0xe48] sm:$0xff] }
 0x131   :  { %v592_v47 = vld [vmem:[#allocation5 + $0xe68] sm:$0xff]  ;;  %v8862_v48 = vcombine.low %v579_v33, %v583_v35 }
 0x133   :  { %3352 = vmatpush1.bf16.msra.mxu0 %v8766_v1  ;;  %3516 = vmatpush1.bf16.msra.mxu1 %v8768_v2  ;;  %v552_v1 = vld [vmem:[#allocation5 + $0xd28] sm:$0xff]  ;;  %v8822_v2 = vcombine.low %v539_v53, %v543_v54  ;;  %v599_v53 = vld [vmem:[#allocation5 + $0xea0] sm:$0xff] }
 0x134   :  { %3353 = vmatprep.subr.bf16.mxu0 %v8775_v3  ;;  %3517 = vmatprep.subr.bf16.mxu1 %v8777_v4  ;;  %v8824_v3 = vcombine.low %v540_v55, %v544_v56  ;;  %v8831_v4 = vcombine.high %v547_v62, %v551_v63  ;;  %v8833_v5 = vcombine.high %v548_v0, %v552_v1  ;;  %v596_v54 = vld [vmem:[#allocation5 + $0xe88] sm:$0xff] }
 0x135   :  { %v600_v55 = vld [vmem:[#allocation5 + $0xea8] sm:$0xff] }
 0x137   :  { %3354 = vmatpush1.bf16.msra.mxu0 %v8774_v9  ;;  %3518 = vmatpush1.bf16.msra.mxu1 %v8776_v10  ;;  %v560_v9 = vld [vmem:[#allocation5 + $0xd68] sm:$0xff]  ;;  %v8830_v10 = vcombine.low %v547_v62, %v551_v63  ;;  %v607_v62 = vld [vmem:[#allocation5 + $0xee0] sm:$0xff] }
 0x138   :  { %3355 = vmatprep.subr.bf16.mxu0 %v8783_v11  ;;  %3519 = vmatprep.subr.bf16.mxu1 %v8785_v13  ;;  %v8832_v11 = vcombine.low %v548_v0, %v552_v1  ;;  %v8839_v13 = vcombine.high %v555_v6, %v559_v7  ;;  %v8841_v14 = vcombine.high %v556_v8, %v560_v9  ;;  %v604_v63 = vld [vmem:[#allocation5 + $0xec8] sm:$0xff] }
 0x139   :  { %v608_v0 = vld [vmem:[#allocation5 + $0xee8] sm:$0xff] }
 0x13b   :  { %3356 = vmatpush1.bf16.msra.mxu0 %v8782_v18  ;;  %3520 = vmatpush1.bf16.msra.mxu1 %v8784_v19  ;;  %v568_v18 = vld [vmem:[#allocation5 + $0xda8] sm:$0xff]  ;;  %v8838_v19 = vcombine.low %v555_v6, %v559_v7  ;;  %v615_v6 = vld [vmem:[#allocation5 + $0xf20] sm:$0xff] }
 0x13c   :  { %3357 = vmatprep.subr.bf16.mxu0 %v8791_v20  ;;  %3521 = vmatprep.subr.bf16.mxu1 %v8793_v21  ;;  %v8840_v20 = vcombine.low %v556_v8, %v560_v9  ;;  %v8847_v21 = vcombine.high %v563_v15, %v567_v16  ;;  %v8849_v22 = vcombine.high %v564_v17, %v568_v18  ;;  %v612_v7 = vld [vmem:[#allocation5 + $0xf08] sm:$0xff]  ;;  %v623_v15 = vld [vmem:[#allocation5 + $0xf60] sm:$0xff] }
 0x13d   :  { %v616_v8 = vld [vmem:[#allocation5 + $0xf28] sm:$0xff] }
 0x13e   :  { %v620_v16 = vld [vmem:[#allocation5 + $0xf48] sm:$0xff] }
 0x13f   :  { %3358 = vmatpush1.bf16.msra.mxu0 %v8790_v28  ;;  %3522 = vmatpush1.bf16.msra.mxu1 %v8792_v30  ;;  %v576_v28 = vld [vmem:[#allocation5 + $0xde8] sm:$0xff]  ;;  %v8848_v30 = vcombine.low %v564_v17, %v568_v18 }
 0x140   :  { %3368 = vmatprep.subr.bf16.mxu0 %v8799_v31  ;;  %3532 = vmatprep.subr.bf16.mxu1 %v8801_v32  ;;  %v8855_v31 = vcombine.high %v571_v24, %v575_v26  ;;  %v8857_v32 = vcombine.high %v572_v27, %v576_v28  ;;  %v624_v17 = vld [vmem:[#allocation5 + $0xf68] sm:$0xff]  ;;  %v631_v24 = vld [vmem:[#allocation5 + $0xfa0] sm:$0xff] }
 0x141   :  { %v628_v26 = vld [vmem:[#allocation5 + $0xf88] sm:$0xff] }
 0x142   :  { %3360 = vmatmul.mubr.bf16.vlgmr.msra.gmra.mrb[0].mxu0 %v10126_v36  ;;  %3524 = vmatmul.mubr.bf16.vlgmr.msra.gmra.mrb[0].mxu1 %v10126_v36 }
 0x143   :  { %3369 = vmatpush1.bf16.msra.mxu0 %v8798_v40  ;;  %3533 = vmatpush1.bf16.msra.mxu1 %v8800_v41  ;;  %v8856_v40 = vcombine.low %v572_v27, %v576_v28  ;;  %v8863_v41 = vcombine.high %v579_v33, %v583_v35  ;;  %v632_v27 = vld [vmem:[#allocation5 + $0xfa8] sm:$0xff]  ;;  %v639_v33 = vld [vmem:[#allocation5 + $0xfe0] sm:$0xff] }
 0x144   :  { %3370 = vmatprep.subr.bf16.mxu0 %v8807_v42  ;;  %3534 = vmatprep.subr.bf16.mxu1 %v8809_v43  ;;  %v8865_v42 = vcombine.high %v580_v37, %v584_v38  ;;  %v587_v43 = vld [vmem:[#allocation5 + $0xe40] sm:$0xff]  ;;  %v636_v35 = vld [vmem:[#allocation5 + $0xfc8] sm:$0xff] }
 0x145   :  { %3400 = vmatprep.mubr.bf16.mxu0 %v10128_v46  ;;  %3564 = vmatprep.mubr.bf16.mxu1 %v10128_v46  ;;  %v8870_v56 = vcombine.low %v587_v43, %v591_v44 }
 0x147   :  { %3371 = vmatpush1.bf16.msra.mxu0 %v8806_v49  ;;  %3535 = vmatpush1.bf16.msra.mxu1 %v8808_v50  ;;  %v8864_v49 = vcombine.low %v580_v37, %v584_v38  ;;  %v8871_v50 = vcombine.high %v587_v43, %v591_v44  ;;  %v640_v37 = vld [vmem:[#allocation5 + $0xfe8] sm:$0xff]  ;;  %v137_v43 = vld [vmem:[#allocation5 + $0x30] sm:$0xff]  ;;  %v134_v44 = vld [vmem:[#allocation5 + $0x18] sm:$0xff] }
 0x148   :  { %3372 = vmatprep.subr.bf16.mxu0 %v8815_v51  ;;  %3536 = vmatprep.subr.bf16.mxu1 %v8817_v52  ;;  %v8873_v51 = vcombine.high %v588_v45, %v592_v47  ;;  %v595_v52 = vld [vmem:[#allocation5 + $0xe80] sm:$0xff] }
 0x149   :  { %v8878_v1 = vcombine.low %v595_v52, %v599_v53 }
 0x14b   :  { %3373 = vmatpush1.bf16.msra.mxu0 %v8814_v58  ;;  %3537 = vmatpush1.bf16.msra.mxu1 %v8816_v59  ;;  %v8872_v58 = vcombine.low %v588_v45, %v592_v47  ;;  %v8879_v59 = vcombine.high %v595_v52, %v599_v53  ;;  %v138_v45 = vld [vmem:[#allocation5 + $0x38] sm:$0xff]  ;;  %v141_v52 = vld [vmem:[#allocation5 + $0x50] sm:$0xff] }
 0x14c   :  { %3374 = vmatprep.subr.bf16.mxu0 %v8823_v60  ;;  %3538 = vmatprep.subr.bf16.mxu1 %v8825_v61  ;;  %v8881_v60 = vcombine.high %v596_v54, %v600_v55  ;;  %v603_v61 = vld [vmem:[#allocation5 + $0xec0] sm:$0xff]  ;;  %v145_v53 = vld [vmem:[#allocation5 + $0x70] sm:$0xff] }
 0x14d   :  { %v8886_v9 = vcombine.low %v603_v61, %v607_v62 }
 0x14f   :  { %3375 = vmatpush1.bf16.msra.mxu0 %v8822_v2  ;;  %3539 = vmatpush1.bf16.msra.mxu1 %v8824_v3  ;;  %v8880_v2 = vcombine.low %v596_v54, %v600_v55  ;;  %v8887_v3 = vcombine.high %v603_v61, %v607_v62  ;;  %v142_v55 = vld [vmem:[#allocation5 + $0x58] sm:$0xff]  ;;  %v149_v62 = vld [vmem:[#allocation5 + $0x90] sm:$0xff] }
 0x150   :  { %3376 = vmatprep.subr.bf16.mxu0 %v8831_v4  ;;  %3540 = vmatprep.subr.bf16.mxu1 %v8833_v5  ;;  %v8889_v4 = vcombine.high %v604_v63, %v608_v0  ;;  %v611_v5 = vld [vmem:[#allocation5 + $0xf00] sm:$0xff] }
 0x151   :  { %v8894_v18 = vcombine.low %v611_v5, %v615_v6 }
 0x153   :  { %3377 = vmatpush1.bf16.msra.mxu0 %v8830_v10  ;;  %3541 = vmatpush1.bf16.msra.mxu1 %v8832_v11  ;;  %v8888_v10 = vcombine.low %v604_v63, %v608_v0  ;;  %v8895_v11 = vcombine.high %v611_v5, %v615_v6  ;;  %v153_v63 = vld [vmem:[#allocation5 + $0xb0] sm:$0xff]  ;;  %v150_v0 = vld [vmem:[#allocation5 + $0x98] sm:$0xff] }
 0x154   :  { %3378 = vmatprep.subr.bf16.mxu0 %v8839_v13  ;;  %3542 = vmatprep.subr.bf16.mxu1 %v8841_v14  ;;  %v8897_v13 = vcombine.high %v612_v7, %v616_v8  ;;  %v619_v14 = vld [vmem:[#allocation5 + $0xf40] sm:$0xff]  ;;  %v157_v6 = vld [vmem:[#allocation5 + $0xd0] sm:$0xff] }
 0x155   :  { %v8902_v28 = vcombine.low %v619_v14, %v623_v15 }
 0x157   :  { %3379 = vmatpush1.bf16.msra.mxu0 %v8838_v19  ;;  %3543 = vmatpush1.bf16.msra.mxu1 %v8840_v20  ;;  %v8896_v19 = vcombine.low %v612_v7, %v616_v8  ;;  %v8903_v20 = vcombine.high %v619_v14, %v623_v15  ;;  %v161_v7 = vld [vmem:[#allocation5 + $0xf0] sm:$0xff]  ;;  %v158_v8 = vld [vmem:[#allocation5 + $0xd8] sm:$0xff] }
 0x158   :  { %3380 = vmatprep.subr.bf16.mxu0 %v8847_v21  ;;  %3544 = vmatprep.subr.bf16.mxu1 %v8849_v22  ;;  %v8905_v21 = vcombine.high %v620_v16, %v624_v17  ;;  %v627_v22 = vld [vmem:[#allocation5 + $0xf80] sm:$0xff]  ;;  %v165_v15 = vld [vmem:[#allocation5 + $0x110] sm:$0xff] }
 0x159   :  { %v8910_v38 = vcombine.low %v627_v22, %v631_v24 }
 0x15b   :  { %3381 = vmatpush1.bf16.msra.mxu0 %v8846_v29  ;;  %3545 = vmatpush1.bf16.msra.mxu1 %v8848_v30  ;;  %v8904_v29 = vcombine.low %v620_v16, %v624_v17  ;;  %v8911_v30 = vcombine.high %v627_v22, %v631_v24  ;;  %v169_v16 = vld [vmem:[#allocation5 + $0x130] sm:$0xff]  ;;  %v166_v17 = vld [vmem:[#allocation5 + $0x118] sm:$0xff] }
 0x15c   :  { %3382 = vmatprep.subr.bf16.mxu0 %v8855_v31  ;;  %3546 = vmatprep.subr.bf16.mxu1 %v8857_v32  ;;  %v8913_v31 = vcombine.high %v628_v26, %v632_v27  ;;  %v635_v32 = vld [vmem:[#allocation5 + $0xfc0] sm:$0xff]  ;;  %v173_v22 = vld [vmem:[#allocation5 + $0x150] sm:$0xff] }
 0x15d   :  { %v8918_v47 = vcombine.low %v635_v32, %v639_v33  ;;  %v177_v24 = vld [vmem:[#allocation5 + $0x170] sm:$0xff] }
 0x15f   :  { %3383 = vmatpush1.bf16.msra.mxu0 %v8854_v39  ;;  %3547 = vmatpush1.bf16.msra.mxu1 %v8856_v40  ;;  %v8912_v39 = vcombine.low %v628_v26, %v632_v27  ;;  %v8919_v40 = vcombine.high %v635_v32, %v639_v33  ;;  %v174_v26 = vld [vmem:[#allocation5 + $0x158] sm:$0xff]  ;;  %v181_v32 = vld [vmem:[#allocation5 + $0x190] sm:$0xff] }
 0x160   :  { %3384 = vmatprep.subr.bf16.mxu0 %v8863_v41  ;;  %3548 = vmatprep.subr.bf16.mxu1 %v8865_v42  ;;  %v8921_v41 = vcombine.high %v636_v35, %v640_v37  ;;  %v133_v42 = vld [vmem:[#allocation5 + $0x10] sm:$0xff]  ;;  %v178_v27 = vld [vmem:[#allocation5 + $0x178] sm:$0xff] }
 0x161   :  { %v185_v33 = vld [vmem:[#allocation5 + $0x1b0] sm:$0xff] }
 0x163   :  { %3385 = vmatpush1.bf16.msra.mxu0 %v8862_v48  ;;  %3549 = vmatpush1.bf16.msra.mxu1 %v8864_v49  ;;  %v121_v48 = vld [vmem:[#allocation2 + $0x30] sm:$0xff]  ;;  %v8920_v49 = vcombine.low %v636_v35, %v640_v37  ;;  %v182_v35 = vld [vmem:[#allocation5 + $0x198] sm:$0xff] }
 0x164   :  { %3386 = vmatprep.subr.bf16.mxu0 %v8871_v50  ;;  %3550 = vmatprep.subr.bf16.mxu1 %v8873_v51  ;;  %v8419_v50 = vcombine.high %v133_v42, %v137_v43  ;;  %v8421_v51 = vcombine.high %v134_v44, %v138_v45  ;;  %v10134_v54 = vpack.c.bf16 %v121_v48, %v121_v48  ;;  %v186_v37 = vld [vmem:[#allocation5 + $0x1b8] sm:$0xff] }
 0x165   :  { %v8468_v48 = vcombine.low %v182_v35, %v186_v37 }
 0x167   :  { %3387 = vmatpush1.bf16.msra.mxu0 %v8870_v56  ;;  %3551 = vmatpush1.bf16.msra.mxu1 %v8872_v58  ;;  %v146_v56 = vld [vmem:[#allocation5 + $0x78] sm:$0xff]  ;;  %v8418_v58 = vcombine.low %v133_v42, %v137_v43  ;;  %v189_v42 = vld [vmem:[#allocation5 + $0x1d0] sm:$0xff] }
 0x168   :  { %3388 = vmatprep.subr.bf16.mxu0 %v8879_v59  ;;  %3552 = vmatprep.subr.bf16.mxu1 %v8881_v60  ;;  %v8420_v59 = vcombine.low %v134_v44, %v138_v45  ;;  %v8427_v60 = vcombine.high %v141_v52, %v145_v53  ;;  %v8429_v61 = vcombine.high %v142_v55, %v146_v56  ;;  %v193_v43 = vld [vmem:[#allocation5 + $0x1f0] sm:$0xff]  ;;  %v190_v44 = vld [vmem:[#allocation5 + $0x1d8] sm:$0xff] }
 0x169   :  { %v194_v45 = vld [vmem:[#allocation5 + $0x1f8] sm:$0xff] }
 0x16b   :  { %3389 = vmatpush1.bf16.msra.mxu0 %v8878_v1  ;;  %3553 = vmatpush1.bf16.msra.mxu1 %v8880_v2  ;;  %v154_v1 = vld [vmem:[#allocation5 + $0xb8] sm:$0xff]  ;;  %v8426_v2 = vcombine.low %v141_v52, %v145_v53  ;;  %v201_v52 = vld [vmem:[#allocation5 + $0x230] sm:$0xff] }
 0x16c   :  { %3390 = vmatprep.subr.bf16.mxu0 %v8887_v3  ;;  %3554 = vmatprep.subr.bf16.mxu1 %v8889_v4  ;;  %v8428_v3 = vcombine.low %v142_v55, %v146_v56  ;;  %v8435_v4 = vcombine.high %v149_v62, %v153_v63  ;;  %v8437_v5 = vcombine.high %v150_v0, %v154_v1  ;;  %v198_v53 = vld [vmem:[#allocation5 + $0x218] sm:$0xff] }
 0x16d   :  { %v202_v55 = vld [vmem:[#allocation5 + $0x238] sm:$0xff]  ;;  %v8474_v56 = vcombine.low %v189_v42, %v193_v43 }
 0x16f   :  { %3391 = vmatpush1.bf16.msra.mxu0 %v8886_v9  ;;  %3555 = vmatpush1.bf16.msra.mxu1 %v8888_v10  ;;  %v162_v9 = vld [vmem:[#allocation5 + $0xf8] sm:$0xff]  ;;  %v8434_v10 = vcombine.low %v149_v62, %v153_v63  ;;  %v209_v62 = vld [vmem:[#allocation5 + $0x270] sm:$0xff] }
 0x170   :  { %3392 = vmatprep.subr.bf16.mxu0 %v8895_v11  ;;  %3556 = vmatprep.subr.bf16.mxu1 %v8897_v13  ;;  %v8436_v11 = vcombine.low %v150_v0, %v154_v1  ;;  %v8443_v13 = vcombine.high %v157_v6, %v161_v7  ;;  %v8445_v14 = vcombine.high %v158_v8, %v162_v9  ;;  %v206_v63 = vld [vmem:[#allocation5 + $0x258] sm:$0xff] }
 0x171   :  { %v210_v0 = vld [vmem:[#allocation5 + $0x278] sm:$0xff] }
 0x173   :  { %3393 = vmatpush1.bf16.msra.mxu0 %v8894_v18  ;;  %3557 = vmatpush1.bf16.msra.mxu1 %v8896_v19  ;;  %v170_v18 = vld [vmem:[#allocation5 + $0x138] sm:$0xff]  ;;  %v8442_v19 = vcombine.low %v157_v6, %v161_v7  ;;  %v217_v6 = vld [vmem:[#allocation5 + $0x2b0] sm:$0xff] }
 0x174   :  { %3394 = vmatprep.subr.bf16.mxu0 %v8903_v20  ;;  %3558 = vmatprep.subr.bf16.mxu1 %v8905_v21  ;;  %v8444_v20 = vcombine.low %v158_v8, %v162_v9  ;;  %v8451_v21 = vcombine.high %v165_v15, %v169_v16  ;;  %v214_v7 = vld [vmem:[#allocation5 + $0x298] sm:$0xff] }
 0x175   :  { %v218_v8 = vld [vmem:[#allocation5 + $0x2b8] sm:$0xff] }
 0x177   :  { %3395 = vmatpush1.bf16.msra.mxu0 %v8902_v28  ;;  %3559 = vmatpush1.bf16.msra.mxu1 %v8904_v29  ;;  %v8450_v28 = vcombine.low %v165_v15, %v169_v16  ;;  %v8452_v29 = vcombine.low %v166_v17, %v170_v18  ;;  %v225_v15 = vld [vmem:[#allocation5 + $0x2f0] sm:$0xff]  ;;  %v222_v16 = vld [vmem:[#allocation5 + $0x2d8] sm:$0xff] }
 0x178   :  { %3396 = vmatprep.subr.bf16.mxu0 %v8911_v30  ;;  %3560 = vmatprep.subr.bf16.mxu1 %v8913_v31  ;;  %v8459_v30 = vcombine.high %v173_v22, %v177_v24  ;;  %v8461_v31 = vcombine.high %v174_v26, %v178_v27 }
 0x17b   :  { %3397 = vmatpush1.bf16.msra.mxu0 %v8910_v38  ;;  %3561 = vmatpush1.bf16.msra.mxu1 %v8912_v39  ;;  %v8458_v38 = vcombine.low %v173_v22, %v177_v24  ;;  %v8460_v39 = vcombine.low %v174_v26, %v178_v27  ;;  %v233_v22 = vld [vmem:[#allocation5 + $0x330] sm:$0xff]  ;;  %v230_v24 = vld [vmem:[#allocation5 + $0x318] sm:$0xff] }
 0x17c   :  { %3398 = vmatprep.subr.bf16.mxu0 %v8919_v40  ;;  %3562 = vmatprep.subr.bf16.mxu1 %v8921_v41  ;;  %v8467_v40 = vcombine.high %v181_v32, %v185_v33  ;;  %v8469_v41 = vcombine.high %v182_v35, %v186_v37  ;;  %v234_v26 = vld [vmem:[#allocation5 + $0x338] sm:$0xff] }
 0x17d   :  { %v242_v35 = vld [vmem:[#allocation5 + $0x378] sm:$0xff] }
 0x17f   :  { %3399 = vmatpush1.bf16.msra.mxu0 %v8918_v47  ;;  %3563 = vmatpush1.bf16.msra.mxu1 %v8920_v49  ;;  %v8466_v47 = vcombine.low %v181_v32, %v185_v33  ;;  %v8475_v49 = vcombine.high %v189_v42, %v193_v43  ;;  %v241_v32 = vld [vmem:[#allocation5 + $0x370] sm:$0xff]  ;;  %v238_v33 = vld [vmem:[#allocation5 + $0x358] sm:$0xff] }
 0x180   :  { %3573 = vmatprep.subr.bf16.mxu0 %v8419_v50  ;;  %3737 = vmatprep.subr.bf16.mxu1 %v8421_v51  ;;  %v8477_v50 = vcombine.high %v190_v44, %v194_v45  ;;  %v197_v51 = vld [vmem:[#allocation5 + $0x210] sm:$0xff]  ;;  %v246_v43 = vld [vmem:[#allocation5 + $0x398] sm:$0xff] }
 0x181   :  { %v8482_v1 = vcombine.low %v197_v51, %v201_v52  ;;  %v249_v42 = vld [vmem:[#allocation5 + $0x3b0] sm:$0xff] }
 0x182   :  { %3401 = vmatmul.mubr.bf16.vlgmr.msra.gmra.mrb[0].mxu0 %v10134_v54  ;;  %3565 = vmatmul.mubr.bf16.vlgmr.msra.gmra.mrb[0].mxu1 %v10134_v54 }
 0x183   :  { %3574 = vmatpush1.bf16.msra.mxu0 %v8418_v58  ;;  %3738 = vmatpush1.bf16.msra.mxu1 %v8420_v59  ;;  %v8476_v58 = vcombine.low %v190_v44, %v194_v45  ;;  %v8483_v59 = vcombine.high %v197_v51, %v201_v52  ;;  %v250_v44 = vld [vmem:[#allocation5 + $0x3b8] sm:$0xff]  ;;  %v257_v51 = vld [vmem:[#allocation5 + $0x3f0] sm:$0xff] }
 0x184   :  { %3575 = vmatprep.subr.bf16.mxu0 %v8427_v60  ;;  %3739 = vmatprep.subr.bf16.mxu1 %v8429_v61  ;;  %v8485_v60 = vcombine.high %v198_v53, %v202_v55  ;;  %v205_v61 = vld [vmem:[#allocation5 + $0x250] sm:$0xff]  ;;  %v254_v52 = vld [vmem:[#allocation5 + $0x3d8] sm:$0xff] }
 0x185   :  { %3605 = vmatprep.mubr.bf16.mxu0 %v10106_v57  ;;  %3769 = vmatprep.mubr.bf16.mxu1 %v10106_v57  ;;  %v8453_v57 = vcombine.high %v166_v17, %v170_v18  ;;  %v8490_v9 = vcombine.low %v205_v61, %v209_v62  ;;  %v226_v17 = vld [vmem:[#allocation5 + $0x2f8] sm:$0xff] }
 0x187   :  { %3576 = vmatpush1.bf16.msra.mxu0 %v8426_v2  ;;  %3740 = vmatpush1.bf16.msra.mxu1 %v8428_v3  ;;  %v8484_v2 = vcombine.low %v198_v53, %v202_v55  ;;  %v8491_v3 = vcombine.high %v205_v61, %v209_v62  ;;  %v258_v53 = vld [vmem:[#allocation5 + $0x3f8] sm:$0xff]  ;;  %v265_v61 = vld [vmem:[#allocation5 + $0x430] sm:$0xff] }
 0x188   :  { %3577 = vmatprep.subr.bf16.mxu0 %v8435_v4  ;;  %3741 = vmatprep.subr.bf16.mxu1 %v8437_v5  ;;  %v8493_v4 = vcombine.high %v206_v63, %v210_v0  ;;  %v213_v5 = vld [vmem:[#allocation5 + $0x290] sm:$0xff]  ;;  %v262_v62 = vld [vmem:[#allocation5 + $0x418] sm:$0xff] }
 0x189   :  { %v8498_v18 = vcombine.low %v213_v5, %v217_v6 }
 0x18b   :  { %3578 = vmatpush1.bf16.msra.mxu0 %v8434_v10  ;;  %3742 = vmatpush1.bf16.msra.mxu1 %v8436_v11  ;;  %v8492_v10 = vcombine.low %v206_v63, %v210_v0  ;;  %v8499_v11 = vcombine.high %v213_v5, %v217_v6  ;;  %v266_v63 = vld [vmem:[#allocation5 + $0x438] sm:$0xff]  ;;  %v273_v5 = vld [vmem:[#allocation5 + $0x470] sm:$0xff] }
 0x18c   :  { %3579 = vmatprep.subr.bf16.mxu0 %v8443_v13  ;;  %3743 = vmatprep.subr.bf16.mxu1 %v8445_v14  ;;  %v8501_v13 = vcombine.high %v214_v7, %v218_v8  ;;  %v221_v14 = vld [vmem:[#allocation5 + $0x2d0] sm:$0xff]  ;;  %v270_v6 = vld [vmem:[#allocation5 + $0x458] sm:$0xff] }
 0x18d   :  { %v8506_v27 = vcombine.low %v221_v14, %v225_v15 }
 0x18f   :  { %3580 = vmatpush1.bf16.msra.mxu0 %v8442_v19  ;;  %3744 = vmatpush1.bf16.msra.mxu1 %v8444_v20  ;;  %v8500_v19 = vcombine.low %v214_v7, %v218_v8  ;;  %v8507_v20 = vcombine.high %v221_v14, %v225_v15  ;;  %v274_v7 = vld [vmem:[#allocation5 + $0x478] sm:$0xff]  ;;  %v281_v14 = vld [vmem:[#allocation5 + $0x4b0] sm:$0xff] }
 0x190   :  { %3581 = vmatprep.subr.bf16.mxu0 %v8451_v21  ;;  %3745 = vmatprep.subr.bf16.mxu1 %v8453_v57  ;;  %v8509_v21 = vcombine.high %v222_v16, %v226_v17  ;;  %v229_v57 = vld [vmem:[#allocation5 + $0x310] sm:$0xff]  ;;  %v278_v15 = vld [vmem:[#allocation5 + $0x498] sm:$0xff] }
 0x191   :  { %v8514_v37 = vcombine.low %v229_v57, %v233_v22 }
 0x193   :  { %3582 = vmatpush1.bf16.msra.mxu0 %v8450_v28  ;;  %3746 = vmatpush1.bf16.msra.mxu1 %v8452_v29  ;;  %v8508_v28 = vcombine.low %v222_v16, %v226_v17  ;;  %v8515_v29 = vcombine.high %v229_v57, %v233_v22  ;;  %v282_v16 = vld [vmem:[#allocation5 + $0x4b8] sm:$0xff]  ;;  %v289_v57 = vld [vmem:[#allocation5 + $0x4f0] sm:$0xff] }
 0x194   :  { %3583 = vmatprep.subr.bf16.mxu0 %v8459_v30  ;;  %3747 = vmatprep.subr.bf16.mxu1 %v8461_v31  ;;  %v8517_v30 = vcombine.high %v230_v24, %v234_v26  ;;  %v237_v31 = vld [vmem:[#allocation5 + $0x350] sm:$0xff]  ;;  %v286_v22 = vld [vmem:[#allocation5 + $0x4d8] sm:$0xff] }
 0x195   :  { %v8522_v45 = vcombine.low %v237_v31, %v241_v32 }
 0x197   :  { %3584 = vmatpush1.bf16.msra.mxu0 %v8458_v38  ;;  %3748 = vmatpush1.bf16.msra.mxu1 %v8460_v39  ;;  %v8516_v38 = vcombine.low %v230_v24, %v234_v26  ;;  %v8523_v39 = vcombine.high %v237_v31, %v241_v32  ;;  %v290_v24 = vld [vmem:[#allocation5 + $0x4f8] sm:$0xff] }
 0x198   :  { %3585 = vmatprep.subr.bf16.mxu0 %v8467_v40  ;;  %3749 = vmatprep.subr.bf16.mxu1 %v8469_v41  ;;  %v8525_v40 = vcombine.high %v238_v33, %v242_v35  ;;  %v245_v41 = vld [vmem:[#allocation5 + $0x390] sm:$0xff]  ;;  %v294_v31 = vld [vmem:[#allocation5 + $0x518] sm:$0xff] }
 0x199   :  { %v8530_v55 = vcombine.low %v245_v41, %v249_v42  ;;  %v298_v32 = vld [vmem:[#allocation5 + $0x538] sm:$0xff] }
 0x19b   :  { %3586 = vmatpush1.bf16.msra.mxu0 %v8466_v47  ;;  %3750 = vmatpush1.bf16.msra.mxu1 %v8468_v48  ;;  %v8524_v47 = vcombine.low %v238_v33, %v242_v35  ;;  %v8531_v48 = vcombine.high %v245_v41, %v249_v42  ;;  %v8572_v35 = vcombine.low %v286_v22, %v290_v24  ;;  %v306_v41 = vld [vmem:[#allocation5 + $0x578] sm:$0xff] }
 0x19c   :  { %3587 = vmatprep.subr.bf16.mxu0 %v8475_v49  ;;  %3751 = vmatprep.subr.bf16.mxu1 %v8477_v50  ;;  %v8533_v49 = vcombine.high %v246_v43, %v250_v44  ;;  %v253_v50 = vld [vmem:[#allocation5 + $0x3d0] sm:$0xff] }
 0x19d   :  { %v8538_v0 = vcombine.low %v253_v50, %v257_v51 }
 0x19f   :  { %3588 = vmatpush1.bf16.msra.mxu0 %v8474_v56  ;;  %3752 = vmatpush1.bf16.msra.mxu1 %v8476_v58  ;;  %v8532_v56 = vcombine.low %v246_v43, %v250_v44  ;;  %v8539_v58 = vcombine.high %v253_v50, %v257_v51  ;;  %v8580_v43 = vcombine.low %v294_v31, %v298_v32  ;;  %v314_v50 = vld [vmem:[#allocation5 + $0x5b8] sm:$0xff] }
 0x1a0   :  { %3589 = vmatprep.subr.bf16.mxu0 %v8483_v59  ;;  %3753 = vmatprep.subr.bf16.mxu1 %v8485_v60  ;;  %v8541_v59 = vcombine.high %v254_v52, %v258_v53  ;;  %v261_v60 = vld [vmem:[#allocation5 + $0x410] sm:$0xff] }
 0x1a1   :  { %v8546_v8 = vcombine.low %v261_v60, %v265_v61 }
 0x1a3   :  { %3590 = vmatpush1.bf16.msra.mxu0 %v8482_v1  ;;  %3754 = vmatpush1.bf16.msra.mxu1 %v8484_v2  ;;  %v8540_v1 = vcombine.low %v254_v52, %v258_v53  ;;  %v8547_v2 = vcombine.high %v261_v60, %v265_v61  ;;  %v322_v60 = vld [vmem:[#allocation5 + $0x5f8] sm:$0xff] }
 0x1a4   :  { %3591 = vmatprep.subr.bf16.mxu0 %v8491_v3  ;;  %3755 = vmatprep.subr.bf16.mxu1 %v8493_v4  ;;  %v8549_v3 = vcombine.high %v262_v62, %v266_v63  ;;  %v269_v4 = vld [vmem:[#allocation5 + $0x450] sm:$0xff] }
 0x1a5   :  { %v8554_v17 = vcombine.low %v269_v4, %v273_v5 }
 0x1a7   :  { %3592 = vmatpush1.bf16.msra.mxu0 %v8490_v9  ;;  %3756 = vmatpush1.bf16.msra.mxu1 %v8492_v10  ;;  %v8548_v9 = vcombine.low %v262_v62, %v266_v63  ;;  %v8555_v10 = vcombine.high %v269_v4, %v273_v5  ;;  %v330_v4 = vld [vmem:[#allocation5 + $0x638] sm:$0xff] }
 0x1a8   :  { %3593 = vmatprep.subr.bf16.mxu0 %v8499_v11  ;;  %3757 = vmatprep.subr.bf16.mxu1 %v8501_v13  ;;  %v8557_v11 = vcombine.high %v270_v6, %v274_v7  ;;  %v277_v13 = vld [vmem:[#allocation5 + $0x490] sm:$0xff] }
 0x1a9   :  { %v8562_v26 = vcombine.low %v277_v13, %v281_v14 }
 0x1ab   :  { %3594 = vmatpush1.bf16.msra.mxu0 %v8498_v18  ;;  %3758 = vmatpush1.bf16.msra.mxu1 %v8500_v19  ;;  %v8556_v18 = vcombine.low %v270_v6, %v274_v7  ;;  %v8563_v19 = vcombine.high %v277_v13, %v281_v14  ;;  %v338_v13 = vld [vmem:[#allocation5 + $0x678] sm:$0xff] }
 0x1ac   :  { %3595 = vmatprep.subr.bf16.mxu0 %v8507_v20  ;;  %3759 = vmatprep.subr.bf16.mxu1 %v8509_v21  ;;  %v8565_v20 = vcombine.high %v278_v15, %v282_v16  ;;  %v285_v21 = vld [vmem:[#allocation5 + $0x4d0] sm:$0xff] }
 0x1ad   :  { %v8570_v33 = vcombine.low %v285_v21, %v289_v57 }
 0x1af   :  { %3596 = vmatpush1.bf16.msra.mxu0 %v8506_v27  ;;  %3760 = vmatpush1.bf16.msra.mxu1 %v8508_v28  ;;  %v8571_v27 = vcombine.high %v285_v21, %v289_v57  ;;  %v8573_v28 = vcombine.high %v286_v22, %v290_v24  ;;  %v346_v21 = vld [vmem:[#allocation5 + $0x6b8] sm:$0xff] }
 0x1b0   :  { %3597 = vmatprep.subr.bf16.mxu0 %v8515_v29  ;;  %3761 = vmatprep.subr.bf16.mxu1 %v8517_v30  ;;  %v293_v29 = vld [vmem:[#allocation5 + $0x510] sm:$0xff] }
 0x1b1   :  { %v297_v30 = vld [vmem:[#allocation5 + $0x530] sm:$0xff] }
 0x1b2   :  { %v8578_v42 = vcombine.low %v293_v29, %v297_v30 }
 0x1b3   :  { %3598 = vmatpush1.bf16.msra.mxu0 %v8514_v37  ;;  %3762 = vmatpush1.bf16.msra.mxu1 %v8516_v38  ;;  %v8579_v37 = vcombine.high %v293_v29, %v297_v30  ;;  %v301_v38 = vld [vmem:[#allocation5 + $0x550] sm:$0xff]  ;;  %v354_v29 = vld [vmem:[#allocation5 + $0x6f8] sm:$0xff] }
 0x1b4   :  { %3599 = vmatprep.subr.bf16.mxu0 %v8523_v39  ;;  %3763 = vmatprep.subr.bf16.mxu1 %v8525_v40  ;;  %v305_v39 = vld [vmem:[#allocation5 + $0x570] sm:$0xff]  ;;  %v302_v40 = vld [vmem:[#allocation5 + $0x558] sm:$0xff] }
 0x1b5   :  { %v8587_v44 = vcombine.high %v301_v38, %v305_v39  ;;  %v8586_v51 = vcombine.low %v301_v38, %v305_v39  ;;  %v8588_v52 = vcombine.low %v302_v40, %v306_v41  ;;  %v362_v38 = vld [vmem:[#allocation5 + $0x738] sm:$0xff] }
 0x1b7   :  { %3600 = vmatpush1.bf16.msra.mxu0 %v8522_v45  ;;  %3764 = vmatpush1.bf16.msra.mxu1 %v8524_v47  ;;  %v8589_v45 = vcombine.high %v302_v40, %v306_v41  ;;  %v309_v47 = vld [vmem:[#allocation5 + $0x590] sm:$0xff] }
 0x1b8   :  { %3601 = vmatprep.subr.bf16.mxu0 %v8531_v48  ;;  %3765 = vmatprep.subr.bf16.mxu1 %v8533_v49  ;;  %v313_v48 = vld [vmem:[#allocation5 + $0x5b0] sm:$0xff]  ;;  %v310_v49 = vld [vmem:[#allocation5 + $0x598] sm:$0xff] }
 0x1b9   :  { %v8595_v53 = vcombine.high %v309_v47, %v313_v48  ;;  %v8594_v61 = vcombine.low %v309_v47, %v313_v48  ;;  %v8596_v62 = vcombine.low %v310_v49, %v314_v50  ;;  %v370_v47 = vld [vmem:[#allocation5 + $0x778] sm:$0xff] }
 0x1bb   :  { %3602 = vmatpush1.bf16.msra.mxu0 %v8530_v55  ;;  %3766 = vmatpush1.bf16.msra.mxu1 %v8532_v56  ;;  %v8597_v55 = vcombine.high %v310_v49, %v314_v50  ;;  %v317_v56 = vld [vmem:[#allocation5 + $0x5d0] sm:$0xff] }
 0x1bc   :  { %3603 = vmatprep.subr.bf16.mxu0 %v8539_v58  ;;  %3767 = vmatprep.subr.bf16.mxu1 %v8541_v59  ;;  %v321_v58 = vld [vmem:[#allocation5 + $0x5f0] sm:$0xff]  ;;  %v318_v59 = vld [vmem:[#allocation5 + $0x5d8] sm:$0xff] }
 0x1bd   :  { %v8603_v63 = vcombine.high %v317_v56, %v321_v58  ;;  %v8602_v5 = vcombine.low %v317_v56, %v321_v58  ;;  %v8604_v6 = vcombine.low %v318_v59, %v322_v60  ;;  %v378_v56 = vld [vmem:[#allocation5 + $0x7b8] sm:$0xff] }
 0x1bf   :  { %3604 = vmatpush1.bf16.msra.mxu0 %v8538_v0  ;;  %3768 = vmatpush1.bf16.msra.mxu1 %v8540_v1  ;;  %v8605_v0 = vcombine.high %v318_v59, %v322_v60  ;;  %v325_v1 = vld [vmem:[#allocation5 + $0x610] sm:$0xff] }
 0x1c0   :  { %3614 = vmatprep.subr.bf16.mxu0 %v8547_v2  ;;  %3778 = vmatprep.subr.bf16.mxu1 %v8549_v3  ;;  %v329_v2 = vld [vmem:[#allocation5 + $0x630] sm:$0xff]  ;;  %v326_v3 = vld [vmem:[#allocation5 + $0x618] sm:$0xff] }
 0x1c1   :  { %v8611_v7 = vcombine.high %v325_v1, %v329_v2  ;;  %v8610_v14 = vcombine.low %v325_v1, %v329_v2  ;;  %v386_v1 = vld [vmem:[#allocation5 + $0x7f8] sm:$0xff] }
 0x1c2   :  { %3606 = vmatmul.mubr.bf16.vlgmr.msra.gmra.mrb[4].mxu0 %v10110_v12  ;;  %3770 = vmatmul.mubr.bf16.vlgmr.msra.gmra.mrb[4].mxu1 %v10110_v12  ;;  %v8564_v12 = vcombine.low %v278_v15, %v282_v16  ;;  %v8612_v15 = vcombine.low %v326_v3, %v330_v4 }
 0x1c3   :  { %3615 = vmatpush1.bf16.msra.mxu0 %v8546_v8  ;;  %3779 = vmatpush1.bf16.msra.mxu1 %v8548_v9  ;;  %v8613_v8 = vcombine.high %v326_v3, %v330_v4  ;;  %v333_v9 = vld [vmem:[#allocation5 + $0x650] sm:$0xff] }
 0x1c4   :  { %3616 = vmatprep.subr.bf16.mxu0 %v8555_v10  ;;  %3780 = vmatprep.subr.bf16.mxu1 %v8557_v11  ;;  %v337_v10 = vld [vmem:[#allocation5 + $0x670] sm:$0xff]  ;;  %v334_v11 = vld [vmem:[#allocation5 + $0x658] sm:$0xff] }
 0x1c5   :  { %3646 = vmatprep.mubr.bf16.mxu0 %v10112_v23  ;;  %3810 = vmatprep.mubr.bf16.mxu1 %v10112_v23  ;;  %v8581_v23 = vcombine.high %v294_v31, %v298_v32  ;;  %v8619_v16 = vcombine.high %v333_v9, %v337_v10  ;;  %v8618_v57 = vcombine.low %v333_v9, %v337_v10  ;;  %v394_v9 = vld [vmem:[#allocation5 + $0x838] sm:$0xff] }
 0x1c6   :  { %v8620_v22 = vcombine.low %v334_v11, %v338_v13 }
 0x1c7   :  { %3617 = vmatpush1.bf16.msra.mxu0 %v8554_v17  ;;  %3781 = vmatpush1.bf16.msra.mxu1 %v8556_v18  ;;  %v8621_v17 = vcombine.high %v334_v11, %v338_v13  ;;  %v341_v18 = vld [vmem:[#allocation5 + $0x690] sm:$0xff] }
 0x1c8   :  { %3618 = vmatprep.subr.bf16.mxu0 %v8563_v19  ;;  %3782 = vmatprep.subr.bf16.mxu1 %v8565_v20  ;;  %v345_v19 = vld [vmem:[#allocation5 + $0x6b0] sm:$0xff]  ;;  %v342_v20 = vld [vmem:[#allocation5 + $0x698] sm:$0xff] }
 0x1c9   :  { %v8627_v24 = vcombine.high %v341_v18, %v345_v19  ;;  %v8626_v30 = vcombine.low %v341_v18, %v345_v19  ;;  %v8628_v31 = vcombine.low %v342_v20, %v346_v21  ;;  %v402_v18 = vld [vmem:[#allocation5 + $0x878] sm:$0xff] }
 0x1cb   :  { %3619 = vmatpush1.bf16.msra.mxu0 %v8562_v26  ;;  %3783 = vmatpush1.bf16.msra.mxu1 %v8564_v12  ;;  %v8629_v26 = vcombine.high %v342_v20, %v346_v21  ;;  %v349_v12 = vld [vmem:[#allocation5 + $0x6d0] sm:$0xff] }
 0x1cc   :  { %3620 = vmatprep.subr.bf16.mxu0 %v8571_v27  ;;  %3784 = vmatprep.subr.bf16.mxu1 %v8573_v28  ;;  %v353_v27 = vld [vmem:[#allocation5 + $0x6f0] sm:$0xff]  ;;  %v350_v28 = vld [vmem:[#allocation5 + $0x6d8] sm:$0xff] }
 0x1cd   :  { %v8635_v32 = vcombine.high %v349_v12, %v353_v27  ;;  %v8634_v39 = vcombine.low %v349_v12, %v353_v27  ;;  %v8636_v40 = vcombine.low %v350_v28, %v354_v29  ;;  %v410_v12 = vld [vmem:[#allocation5 + $0x8b8] sm:$0xff] }
 0x1cf   :  { %3621 = vmatpush1.bf16.msra.mxu0 %v8570_v33  ;;  %3785 = vmatpush1.bf16.msra.mxu1 %v8572_v35  ;;  %v8637_v33 = vcombine.high %v350_v28, %v354_v29  ;;  %v357_v35 = vld [vmem:[#allocation5 + $0x710] sm:$0xff] }
 0x1d0   :  { %3622 = vmatprep.subr.bf16.mxu0 %v8579_v37  ;;  %3786 = vmatprep.subr.bf16.mxu1 %v8581_v23  ;;  %v361_v37 = vld [vmem:[#allocation5 + $0x730] sm:$0xff]  ;;  %v358_v23 = vld [vmem:[#allocation5 + $0x718] sm:$0xff] }
 0x1d1   :  { %v8643_v41 = vcombine.high %v357_v35, %v361_v37  ;;  %v8642_v48 = vcombine.low %v357_v35, %v361_v37  ;;  %v8644_v49 = vcombine.low %v358_v23, %v362_v38  ;;  %v418_v35 = vld [vmem:[#allocation5 + $0x8f8] sm:$0xff] }
 0x1d3   :  { %3623 = vmatpush1.bf16.msra.mxu0 %v8578_v42  ;;  %3787 = vmatpush1.bf16.msra.mxu1 %v8580_v43  ;;  %v8645_v42 = vcombine.high %v358_v23, %v362_v38  ;;  %v365_v43 = vld [vmem:[#allocation5 + $0x750] sm:$0xff] }
 0x1d4   :  { %3624 = vmatprep.subr.bf16.mxu0 %v8587_v44  ;;  %3788 = vmatprep.subr.bf16.mxu1 %v8589_v45  ;;  %v369_v44 = vld [vmem:[#allocation5 + $0x770] sm:$0xff]  ;;  %v366_v45 = vld [vmem:[#allocation5 + $0x758] sm:$0xff] }
 0x1d5   :  { %v8651_v50 = vcombine.high %v365_v43, %v369_v44  ;;  %v8650_v58 = vcombine.low %v365_v43, %v369_v44  ;;  %v8652_v59 = vcombine.low %v366_v45, %v370_v47 }
 0x1d7   :  { %3625 = vmatpush1.bf16.msra.mxu0 %v8586_v51  ;;  %3789 = vmatpush1.bf16.msra.mxu1 %v8588_v52  ;;  %v8653_v51 = vcombine.high %v366_v45, %v370_v47  ;;  %v373_v52 = vld [vmem:[#allocation5 + $0x790] sm:$0xff] }
 0x1d8   :  { %3626 = vmatprep.subr.bf16.mxu0 %v8595_v53  ;;  %3790 = vmatprep.subr.bf16.mxu1 %v8597_v55  ;;  %v377_v53 = vld [vmem:[#allocation5 + $0x7b0] sm:$0xff]  ;;  %v374_v55 = vld [vmem:[#allocation5 + $0x798] sm:$0xff] }
 0x1d9   :  { %v8659_v60 = vcombine.high %v373_v52, %v377_v53  ;;  %v8658_v2 = vcombine.low %v373_v52, %v377_v53  ;;  %v8660_v3 = vcombine.low %v374_v55, %v378_v56  ;;  %v429_v47 = vld [vmem:[#allocation5 + $0x950] sm:$0xff] }
 0x1db   :  { %3627 = vmatpush1.bf16.msra.mxu0 %v8594_v61  ;;  %3791 = vmatpush1.bf16.msra.mxu1 %v8596_v62  ;;  %v8661_v61 = vcombine.high %v374_v55, %v378_v56  ;;  %v381_v62 = vld [vmem:[#allocation5 + $0x7d0] sm:$0xff] }
 0x1dc   :  { %3628 = vmatprep.subr.bf16.mxu0 %v8603_v63  ;;  %3792 = vmatprep.subr.bf16.mxu1 %v8605_v0  ;;  %v385_v63 = vld [vmem:[#allocation5 + $0x7f0] sm:$0xff]  ;;  %v382_v0 = vld [vmem:[#allocation5 + $0x7d8] sm:$0xff] }
 0x1dd   :  { %v8667_v4 = vcombine.high %v381_v62, %v385_v63  ;;  %v8666_v10 = vcombine.low %v381_v62, %v385_v63  ;;  %v8668_v11 = vcombine.low %v382_v0, %v386_v1  ;;  %v437_v56 = vld [vmem:[#allocation5 + $0x990] sm:$0xff] }
 0x1df   :  { %3629 = vmatpush1.bf16.msra.mxu0 %v8602_v5  ;;  %3793 = vmatpush1.bf16.msra.mxu1 %v8604_v6  ;;  %v8669_v5 = vcombine.high %v382_v0, %v386_v1  ;;  %v389_v6 = vld [vmem:[#allocation5 + $0x810] sm:$0xff] }
 0x1e0   :  { %3630 = vmatprep.subr.bf16.mxu0 %v8611_v7  ;;  %3794 = vmatprep.subr.bf16.mxu1 %v8613_v8  ;;  %v393_v7 = vld [vmem:[#allocation5 + $0x830] sm:$0xff]  ;;  %v390_v8 = vld [vmem:[#allocation5 + $0x818] sm:$0xff] }
 0x1e1   :  { %v8675_v13 = vcombine.high %v389_v6, %v393_v7  ;;  %v8674_v19 = vcombine.low %v389_v6, %v393_v7  ;;  %v8676_v20 = vcombine.low %v390_v8, %v394_v9  ;;  %v445_v1 = vld [vmem:[#allocation5 + $0x9d0] sm:$0xff] }
 0x1e3   :  { %3631 = vmatpush1.bf16.msra.mxu0 %v8610_v14  ;;  %3795 = vmatpush1.bf16.msra.mxu1 %v8612_v15  ;;  %v8677_v14 = vcombine.high %v390_v8, %v394_v9  ;;  %v397_v15 = vld [vmem:[#allocation5 + $0x850] sm:$0xff] }
 0x1e4   :  { %3632 = vmatprep.subr.bf16.mxu0 %v8619_v16  ;;  %3796 = vmatprep.subr.bf16.mxu1 %v8621_v17  ;;  %v401_v16 = vld [vmem:[#allocation5 + $0x870] sm:$0xff]  ;;  %v398_v17 = vld [vmem:[#allocation5 + $0x858] sm:$0xff] }
 0x1e5   :  { %v8683_v21 = vcombine.high %v397_v15, %v401_v16  ;;  %v8682_v27 = vcombine.low %v397_v15, %v401_v16  ;;  %v8684_v28 = vcombine.low %v398_v17, %v402_v18  ;;  %v453_v9 = vld [vmem:[#allocation5 + $0xa10] sm:$0xff] }
 0x1e7   :  { %3633 = vmatpush1.bf16.msra.mxu0 %v8618_v57  ;;  %3797 = vmatpush1.bf16.msra.mxu1 %v8620_v22  ;;  %v8685_v57 = vcombine.high %v398_v17, %v402_v18  ;;  %v405_v22 = vld [vmem:[#allocation5 + $0x890] sm:$0xff] }
 0x1e8   :  { %3634 = vmatprep.subr.bf16.mxu0 %v8627_v24  ;;  %3798 = vmatprep.subr.bf16.mxu1 %v8629_v26  ;;  %v409_v24 = vld [vmem:[#allocation5 + $0x8b0] sm:$0xff]  ;;  %v406_v26 = vld [vmem:[#allocation5 + $0x898] sm:$0xff] }
 0x1e9   :  { %v8691_v29 = vcombine.high %v405_v22, %v409_v24  ;;  %v8690_v37 = vcombine.low %v405_v22, %v409_v24  ;;  %v461_v18 = vld [vmem:[#allocation5 + $0xa50] sm:$0xff] }
 0x1eb   :  { %3635 = vmatpush1.bf16.msra.mxu0 %v8626_v30  ;;  %3799 = vmatpush1.bf16.msra.mxu1 %v8628_v31  ;;  %v8693_v30 = vcombine.high %v406_v26, %v410_v12  ;;  %v413_v31 = vld [vmem:[#allocation5 + $0x8d0] sm:$0xff] }
 0x1ec   :  { %3636 = vmatprep.subr.bf16.mxu0 %v8635_v32  ;;  %3800 = vmatprep.subr.bf16.mxu1 %v8637_v33  ;;  %v417_v32 = vld [vmem:[#allocation5 + $0x8f0] sm:$0xff]  ;;  %v414_v33 = vld [vmem:[#allocation5 + $0x8d8] sm:$0xff] }
 0x1ed   :  { %v8699_v23 = vcombine.high %v413_v31, %v417_v32  ;;  %v8701_v38 = vcombine.high %v414_v33, %v418_v35  ;;  %v8698_v43 = vcombine.low %v413_v31, %v417_v32  ;;  %v8700_v44 = vcombine.low %v414_v33, %v418_v35  ;;  %v477_v35 = vld [vmem:[#allocation5 + $0xad0] sm:$0xff] }
 0x1ef   :  { %3637 = vmatpush1.bf16.msra.mxu0 %v8634_v39  ;;  %3801 = vmatpush1.bf16.msra.mxu1 %v8636_v40  ;;  %v421_v39 = vld [vmem:[#allocation5 + $0x910] sm:$0xff] }
 0x1f0   :  { %3638 = vmatprep.subr.bf16.mxu0 %v8643_v41  ;;  %3802 = vmatprep.subr.bf16.mxu1 %v8645_v42  ;;  %v425_v40 = vld [vmem:[#allocation5 + $0x930] sm:$0xff]  ;;  %v422_v41 = vld [vmem:[#allocation5 + $0x918] sm:$0xff] }
 0x1f1   :  { %v426_v42 = vld [vmem:[#allocation5 + $0x938] sm:$0xff]  ;;  %v8707_v45 = vcombine.high %v421_v39, %v425_v40 }
 0x1f2   :  { %v8708_v52 = vcombine.low %v422_v41, %v426_v42 }
 0x1f3   :  { %3639 = vmatpush1.bf16.msra.mxu0 %v8642_v48  ;;  %3803 = vmatpush1.bf16.msra.mxu1 %v8644_v49  ;;  %v433_v48 = vld [vmem:[#allocation5 + $0x970] sm:$0xff]  ;;  %v430_v49 = vld [vmem:[#allocation5 + $0x958] sm:$0xff] }
 0x1f4   :  { %3640 = vmatprep.subr.bf16.mxu0 %v8651_v50  ;;  %3804 = vmatprep.subr.bf16.mxu1 %v8653_v51  ;;  %v434_v50 = vld [vmem:[#allocation5 + $0x978] sm:$0xff]  ;;  %v8706_v51 = vcombine.low %v421_v39, %v425_v40  ;;  %v8715_v53 = vcombine.high %v429_v47, %v433_v48 }
 0x1f5   :  { %v8717_v55 = vcombine.high %v430_v49, %v434_v50  ;;  %v8716_v62 = vcombine.low %v430_v49, %v434_v50  ;;  %v493_v50 = vld [vmem:[#allocation5 + $0xb50] sm:$0xff] }
 0x1f7   :  { %3641 = vmatpush1.bf16.msra.mxu0 %v8650_v58  ;;  %3805 = vmatpush1.bf16.msra.mxu1 %v8652_v59  ;;  %v441_v58 = vld [vmem:[#allocation5 + $0x9b0] sm:$0xff]  ;;  %v438_v59 = vld [vmem:[#allocation5 + $0x998] sm:$0xff] }
 0x1f8   :  { %3642 = vmatprep.subr.bf16.mxu0 %v8659_v60  ;;  %3806 = vmatprep.subr.bf16.mxu1 %v8661_v61  ;;  %v442_v60 = vld [vmem:[#allocation5 + $0x9b8] sm:$0xff]  ;;  %v8714_v61 = vcombine.low %v429_v47, %v433_v48  ;;  %v8723_v63 = vcombine.high %v437_v56, %v441_v58 }
 0x1f9   :  { %v8725_v0 = vcombine.high %v438_v59, %v442_v60  ;;  %v8724_v6 = vcombine.low %v438_v59, %v442_v60  ;;  %v501_v60 = vld [vmem:[#allocation5 + $0xb90] sm:$0xff] }
 0x1fb   :  { %3643 = vmatpush1.bf16.msra.mxu0 %v8658_v2  ;;  %3807 = vmatpush1.bf16.msra.mxu1 %v8660_v3  ;;  %v449_v2 = vld [vmem:[#allocation5 + $0x9f0] sm:$0xff]  ;;  %v446_v3 = vld [vmem:[#allocation5 + $0x9d8] sm:$0xff] }
 0x1fc   :  { %3644 = vmatprep.subr.bf16.mxu0 %v8667_v4  ;;  %3808 = vmatprep.subr.bf16.mxu1 %v8669_v5  ;;  %v450_v4 = vld [vmem:[#allocation5 + $0x9f8] sm:$0xff]  ;;  %v8722_v5 = vcombine.low %v437_v56, %v441_v58  ;;  %v8731_v7 = vcombine.high %v445_v1, %v449_v2 }
 0x1fd   :  { %v8733_v8 = vcombine.high %v446_v3, %v450_v4  ;;  %v8732_v15 = vcombine.low %v446_v3, %v450_v4  ;;  %v509_v4 = vld [vmem:[#allocation5 + $0xbd0] sm:$0xff] }
 0x1ff   :  { %3645 = vmatpush1.bf16.msra.mxu0 %v8666_v10  ;;  %3809 = vmatpush1.bf16.msra.mxu1 %v8668_v11  ;;  %v457_v10 = vld [vmem:[#allocation5 + $0xa30] sm:$0xff]  ;;  %v454_v11 = vld [vmem:[#allocation5 + $0xa18] sm:$0xff] }
 0x200   :  { %3655 = vmatprep.subr.bf16.mxu0 %v8675_v13  ;;  %3819 = vmatprep.subr.bf16.mxu1 %v8677_v14  ;;  %v458_v13 = vld [vmem:[#allocation5 + $0xa38] sm:$0xff]  ;;  %v8730_v14 = vcombine.low %v445_v1, %v449_v2  ;;  %v8739_v16 = vcombine.high %v453_v9, %v457_v10 }
 0x201   :  { %v8741_v17 = vcombine.high %v454_v11, %v458_v13  ;;  %v8740_v22 = vcombine.low %v454_v11, %v458_v13  ;;  %v517_v13 = vld [vmem:[#allocation5 + $0xc10] sm:$0xff] }
 0x202   :  { %3647 = vmatmul.mubr.bf16.vlgmr.msra.gmra.mrb[4].mxu0 %v10118_v25  ;;  %3811 = vmatmul.mubr.bf16.vlgmr.msra.gmra.mrb[4].mxu1 %v10118_v25  ;;  %v8692_v25 = vcombine.low %v406_v26, %v410_v12  ;;  %v469_v12 = vld [vmem:[#allocation5 + $0xa90] sm:$0xff] }
 0x203   :  { %3656 = vmatpush1.bf16.msra.mxu0 %v8674_v19  ;;  %3820 = vmatpush1.bf16.msra.mxu1 %v8676_v20  ;;  %v465_v19 = vld [vmem:[#allocation5 + $0xa70] sm:$0xff]  ;;  %v462_v20 = vld [vmem:[#allocation5 + $0xa58] sm:$0xff] }
 0x204   :  { %3657 = vmatprep.subr.bf16.mxu0 %v8683_v21  ;;  %3821 = vmatprep.subr.bf16.mxu1 %v8685_v57  ;;  %v466_v21 = vld [vmem:[#allocation5 + $0xa78] sm:$0xff]  ;;  %v8738_v57 = vcombine.low %v453_v9, %v457_v10  ;;  %v8747_v24 = vcombine.high %v461_v18, %v465_v19 }
 0x205   :  { %3687 = vmatprep.mubr.bf16.mxu0 %v10120_v34  ;;  %3851 = vmatprep.mubr.bf16.mxu1 %v10120_v34  ;;  %v8709_v34 = vcombine.high %v422_v41, %v426_v42  ;;  %v8749_v26 = vcombine.high %v462_v20, %v466_v21  ;;  %v8748_v31 = vcombine.low %v462_v20, %v466_v21  ;;  %v485_v42 = vld [vmem:[#allocation5 + $0xb10] sm:$0xff] }
 0x206   :  { %v525_v21 = vld [vmem:[#allocation5 + $0xc50] sm:$0xff] }
 0x207   :  { %3658 = vmatpush1.bf16.msra.mxu0 %v8682_v27  ;;  %3822 = vmatpush1.bf16.msra.mxu1 %v8684_v28  ;;  %v473_v27 = vld [vmem:[#allocation5 + $0xab0] sm:$0xff]  ;;  %v470_v28 = vld [vmem:[#allocation5 + $0xa98] sm:$0xff] }
 0x208   :  { %3659 = vmatprep.subr.bf16.mxu0 %v8691_v29  ;;  %3823 = vmatprep.subr.bf16.mxu1 %v8693_v30  ;;  %v474_v29 = vld [vmem:[#allocation5 + $0xab8] sm:$0xff]  ;;  %v8746_v30 = vcombine.low %v461_v18, %v465_v19  ;;  %v8755_v32 = vcombine.high %v469_v12, %v473_v27 }
 0x209   :  { %v8757_v33 = vcombine.high %v470_v28, %v474_v29  ;;  %v8756_v39 = vcombine.low %v470_v28, %v474_v29  ;;  %v533_v29 = vld [vmem:[#allocation5 + $0xc90] sm:$0xff] }
 0x20b   :  { %3660 = vmatpush1.bf16.msra.mxu0 %v8690_v37  ;;  %3824 = vmatpush1.bf16.msra.mxu1 %v8692_v25  ;;  %v481_v37 = vld [vmem:[#allocation5 + $0xaf0] sm:$0xff]  ;;  %v478_v25 = vld [vmem:[#allocation5 + $0xad8] sm:$0xff] }
 0x20c   :  { %3661 = vmatprep.subr.bf16.mxu0 %v8699_v23  ;;  %3825 = vmatprep.subr.bf16.mxu1 %v8701_v38  ;;  %v482_v23 = vld [vmem:[#allocation5 + $0xaf8] sm:$0xff]  ;;  %v8754_v38 = vcombine.low %v469_v12, %v473_v27  ;;  %v8763_v40 = vcombine.high %v477_v35, %v481_v37 }
 0x20d   :  { %v8765_v41 = vcombine.high %v478_v25, %v482_v23  ;;  %v8764_v47 = vcombine.low %v478_v25, %v482_v23  ;;  %v541_v23 = vld [vmem:[#allocation5 + $0xcd0] sm:$0xff] }
 0x20f   :  { %3662 = vmatpush1.bf16.msra.mxu0 %v8698_v43  ;;  %3826 = vmatpush1.bf16.msra.mxu1 %v8700_v44  ;;  %v489_v43 = vld [vmem:[#allocation5 + $0xb30] sm:$0xff]  ;;  %v486_v44 = vld [vmem:[#allocation5 + $0xb18] sm:$0xff] }
 0x210   :  { %3663 = vmatprep.subr.bf16.mxu0 %v8707_v45  ;;  %3827 = vmatprep.subr.bf16.mxu1 %v8709_v34  ;;  %v490_v45 = vld [vmem:[#allocation5 + $0xb38] sm:$0xff]  ;;  %v8762_v34 = vcombine.low %v477_v35, %v481_v37  ;;  %v8771_v48 = vcombine.high %v485_v42, %v489_v43 }
 0x211   :  { %v8773_v49 = vcombine.high %v486_v44, %v490_v45  ;;  %v8772_v56 = vcombine.low %v486_v44, %v490_v45  ;;  %v549_v44 = vld [vmem:[#allocation5 + $0xd10] sm:$0xff] }
 0x212   :  { %v553_v45 = vld [vmem:[#allocation5 + $0xd30] sm:$0xff] }
 0x213   :  { %3664 = vmatpush1.bf16.msra.mxu0 %v8706_v51  ;;  %3828 = vmatpush1.bf16.msra.mxu1 %v8708_v52  ;;  %v497_v51 = vld [vmem:[#allocation5 + $0xb70] sm:$0xff]  ;;  %v494_v52 = vld [vmem:[#allocation5 + $0xb58] sm:$0xff] }
 0x214   :  { %3665 = vmatprep.subr.bf16.mxu0 %v8715_v53  ;;  %3829 = vmatprep.subr.bf16.mxu1 %v8717_v55  ;;  %v498_v53 = vld [vmem:[#allocation5 + $0xb78] sm:$0xff]  ;;  %v8770_v55 = vcombine.low %v485_v42, %v489_v43  ;;  %v8779_v58 = vcombine.high %v493_v50, %v497_v51 }
 0x215   :  { %v8781_v59 = vcombine.high %v494_v52, %v498_v53  ;;  %v8780_v1 = vcombine.low %v494_v52, %v498_v53  ;;  %v561_v52 = vld [vmem:[#allocation5 + $0xd70] sm:$0xff]  ;;  %v558_v53 = vld [vmem:[#allocation5 + $0xd58] sm:$0xff] }
 0x217   :  { %3666 = vmatpush1.bf16.msra.mxu0 %v8714_v61  ;;  %3830 = vmatpush1.bf16.msra.mxu1 %v8716_v62  ;;  %v505_v61 = vld [vmem:[#allocation5 + $0xbb0] sm:$0xff]  ;;  %v502_v62 = vld [vmem:[#allocation5 + $0xb98] sm:$0xff] }
 0x218   :  { %3667 = vmatprep.subr.bf16.mxu0 %v8723_v63  ;;  %3831 = vmatprep.subr.bf16.mxu1 %v8725_v0  ;;  %v506_v63 = vld [vmem:[#allocation5 + $0xbb8] sm:$0xff]  ;;  %v8778_v0 = vcombine.low %v493_v50, %v497_v51  ;;  %v8787_v2 = vcombine.high %v501_v60, %v505_v61  ;;  %v8835_v50 = vcombine.high %v549_v44, %v553_v45  ;;  %v557_v51 = vld [vmem:[#allocation5 + $0xd50] sm:$0xff] }
 0x219   :  { %v8789_v3 = vcombine.high %v502_v62, %v506_v63  ;;  %v8788_v9 = vcombine.low %v502_v62, %v506_v63  ;;  %v569_v62 = vld [vmem:[#allocation5 + $0xdb0] sm:$0xff]  ;;  %v566_v63 = vld [vmem:[#allocation5 + $0xd98] sm:$0xff] }
 0x21b   :  { %3668 = vmatpush1.bf16.msra.mxu0 %v8722_v5  ;;  %3832 = vmatpush1.bf16.msra.mxu1 %v8724_v6  ;;  %v513_v5 = vld [vmem:[#allocation5 + $0xbf0] sm:$0xff]  ;;  %v510_v6 = vld [vmem:[#allocation5 + $0xbd8] sm:$0xff] }
 0x21c   :  { %3669 = vmatprep.subr.bf16.mxu0 %v8731_v7  ;;  %3833 = vmatprep.subr.bf16.mxu1 %v8733_v8  ;;  %v514_v7 = vld [vmem:[#allocation5 + $0xbf8] sm:$0xff]  ;;  %v8786_v8 = vcombine.low %v501_v60, %v505_v61  ;;  %v8795_v10 = vcombine.high %v509_v4, %v513_v5  ;;  %v565_v61 = vld [vmem:[#allocation5 + $0xd90] sm:$0xff] }
 0x21d   :  { %v8797_v11 = vcombine.high %v510_v6, %v514_v7  ;;  %v8796_v18 = vcombine.low %v510_v6, %v514_v7  ;;  %v573_v6 = vld [vmem:[#allocation5 + $0xdd0] sm:$0xff] }
 0x21e   :  { %v577_v7 = vld [vmem:[#allocation5 + $0xdf0] sm:$0xff] }
 0x21f   :  { %3670 = vmatpush1.bf16.msra.mxu0 %v8730_v14  ;;  %3834 = vmatpush1.bf16.msra.mxu1 %v8732_v15  ;;  %v521_v14 = vld [vmem:[#allocation5 + $0xc30] sm:$0xff]  ;;  %v518_v15 = vld [vmem:[#allocation5 + $0xc18] sm:$0xff] }
 0x220   :  { %3671 = vmatprep.subr.bf16.mxu0 %v8739_v16  ;;  %3835 = vmatprep.subr.bf16.mxu1 %v8741_v17  ;;  %v522_v16 = vld [vmem:[#allocation5 + $0xc38] sm:$0xff]  ;;  %v8794_v17 = vcombine.low %v509_v4, %v513_v5  ;;  %v8803_v19 = vcombine.high %v517_v13, %v521_v14 }
 0x221   :  { %v8805_v20 = vcombine.high %v518_v15, %v522_v16  ;;  %v8804_v12 = vcombine.low %v518_v15, %v522_v16  ;;  %v8850_v15 = vcombine.low %v565_v61, %v569_v62 }
 0x223   :  { %3672 = vmatpush1.bf16.msra.mxu0 %v8738_v57  ;;  %3836 = vmatpush1.bf16.msra.mxu1 %v8740_v22  ;;  %v529_v57 = vld [vmem:[#allocation5 + $0xc70] sm:$0xff]  ;;  %v526_v22 = vld [vmem:[#allocation5 + $0xc58] sm:$0xff] }
 0x224   :  { %3673 = vmatprep.subr.bf16.mxu0 %v8747_v24  ;;  %3837 = vmatprep.subr.bf16.mxu1 %v8749_v26  ;;  %v530_v24 = vld [vmem:[#allocation5 + $0xc78] sm:$0xff]  ;;  %v8802_v26 = vcombine.low %v517_v13, %v521_v14  ;;  %v8811_v27 = vcombine.high %v525_v21, %v529_v57 }
 0x225   :  { %v8813_v28 = vcombine.high %v526_v22, %v530_v24  ;;  %v8812_v35 = vcombine.low %v526_v22, %v530_v24  ;;  %v585_v22 = vld [vmem:[#allocation5 + $0xe30] sm:$0xff]  ;;  %v582_v24 = vld [vmem:[#allocation5 + $0xe18] sm:$0xff] }
 0x227   :  { %3674 = vmatpush1.bf16.msra.mxu0 %v8746_v30  ;;  %3838 = vmatpush1.bf16.msra.mxu1 %v8748_v31  ;;  %v537_v30 = vld [vmem:[#allocation5 + $0xcb0] sm:$0xff]  ;;  %v534_v31 = vld [vmem:[#allocation5 + $0xc98] sm:$0xff] }
 0x228   :  { %3675 = vmatprep.subr.bf16.mxu0 %v8755_v32  ;;  %3839 = vmatprep.subr.bf16.mxu1 %v8757_v33  ;;  %v538_v32 = vld [vmem:[#allocation5 + $0xcb8] sm:$0xff]  ;;  %v8810_v33 = vcombine.low %v525_v21, %v529_v57  ;;  %v8819_v37 = vcombine.high %v533_v29, %v537_v30  ;;  %v581_v57 = vld [vmem:[#allocation5 + $0xe10] sm:$0xff] }
 0x229   :  { %v8821_v25 = vcombine.high %v534_v31, %v538_v32 }
 0x22b   :  { %3676 = vmatpush1.bf16.msra.mxu0 %v8754_v38  ;;  %3840 = vmatpush1.bf16.msra.mxu1 %v8756_v39  ;;  %v545_v38 = vld [vmem:[#allocation5 + $0xcf0] sm:$0xff]  ;;  %v542_v39 = vld [vmem:[#allocation5 + $0xcd8] sm:$0xff] }
 0x22c   :  { %3677 = vmatprep.subr.bf16.mxu0 %v8763_v40  ;;  %3841 = vmatprep.subr.bf16.mxu1 %v8765_v41  ;;  %v546_v40 = vld [vmem:[#allocation5 + $0xcf8] sm:$0xff]  ;;  %v8818_v41 = vcombine.low %v533_v29, %v537_v30  ;;  %v8827_v42 = vcombine.high %v541_v23, %v545_v38  ;;  %v589_v30 = vld [vmem:[#allocation5 + $0xe50] sm:$0xff] }
 0x22d   :  { %v8829_v43 = vcombine.high %v542_v39, %v546_v40 }
 0x22f   :  { %3678 = vmatpush1.bf16.msra.mxu0 %v8762_v34  ;;  %3842 = vmatpush1.bf16.msra.mxu1 %v8764_v47  ;;  %v550_v34 = vld [vmem:[#allocation5 + $0xd18] sm:$0xff] }
 0x230   :  { %3679 = vmatprep.subr.bf16.mxu0 %v8771_v48  ;;  %3843 = vmatprep.subr.bf16.mxu1 %v8773_v49  ;;  %v554_v47 = vld [vmem:[#allocation5 + $0xd38] sm:$0xff]  ;;  %v8826_v48 = vcombine.low %v541_v23, %v545_v38  ;;  %v8828_v49 = vcombine.low %v542_v39, %v546_v40  ;;  %v597_v38 = vld [vmem:[#allocation5 + $0xe90] sm:$0xff] }
 0x231   :  { %v601_v39 = vld [vmem:[#allocation5 + $0xeb0] sm:$0xff]  ;;  %v598_v40 = vld [vmem:[#allocation5 + $0xe98] sm:$0xff] }
 0x233   :  { %3680 = vmatpush1.bf16.msra.mxu0 %v8770_v55  ;;  %3844 = vmatpush1.bf16.msra.mxu1 %v8772_v56  ;;  %v562_v55 = vld [vmem:[#allocation5 + $0xd78] sm:$0xff]  ;;  %v8834_v56 = vcombine.low %v549_v44, %v553_v45  ;;  %v605_v45 = vld [vmem:[#allocation5 + $0xed0] sm:$0xff] }
 0x234   :  { %3681 = vmatprep.subr.bf16.mxu0 %v8779_v58  ;;  %3845 = vmatprep.subr.bf16.mxu1 %v8781_v59  ;;  %v8836_v58 = vcombine.low %v550_v34, %v554_v47  ;;  %v8843_v59 = vcombine.high %v557_v51, %v561_v52  ;;  %v8845_v60 = vcombine.high %v558_v53, %v562_v55 }
 0x237   :  { %3682 = vmatpush1.bf16.msra.mxu0 %v8778_v0  ;;  %3846 = vmatpush1.bf16.msra.mxu1 %v8780_v1  ;;  %v570_v0 = vld [vmem:[#allocation5 + $0xdb8] sm:$0xff]  ;;  %v8842_v1 = vcombine.low %v557_v51, %v561_v52  ;;  %v613_v52 = vld [vmem:[#allocation5 + $0xf10] sm:$0xff] }
 0x238   :  { %3683 = vmatprep.subr.bf16.mxu0 %v8787_v2  ;;  %3847 = vmatprep.subr.bf16.mxu1 %v8789_v3  ;;  %v8844_v2 = vcombine.low %v558_v53, %v562_v55  ;;  %v8851_v3 = vcombine.high %v565_v61, %v569_v62  ;;  %v8853_v5 = vcombine.high %v566_v63, %v570_v0  ;;  %v617_v53 = vld [vmem:[#allocation5 + $0xf30] sm:$0xff]  ;;  %v645_v55 = vlaneseq }
 0x239   :  { %v8899_v61 = vcombine.high %v613_v52, %v617_v53 }
 0x23b   :  { %3684 = vmatpush1.bf16.msra.mxu0 %v8786_v8  ;;  %3848 = vmatpush1.bf16.msra.mxu1 %v8788_v9 }
 0x23c   :  { %3685 = vmatprep.subr.bf16.mxu0 %v8795_v10  ;;  %3849 = vmatprep.subr.bf16.mxu1 %v8797_v11  ;;  %v574_v10 = vld [vmem:[#allocation5 + $0xdd8] sm:$0xff] }
 0x23d   :  { %v578_v11 = vld [vmem:[#allocation5 + $0xdf8] sm:$0xff] }
 0x23e   :  { %v8861_v21 = vcombine.high %v574_v10, %v578_v11 }
 0x23f   :  { %3686 = vmatpush1.bf16.msra.mxu0 %v8794_v17  ;;  %3850 = vmatpush1.bf16.msra.mxu1 %v8796_v18  ;;  %v8852_v18 = vcombine.low %v566_v63, %v570_v0  ;;  %v621_v63 = vld [vmem:[#allocation5 + $0xf50] sm:$0xff] }
 0x240   :  { %3696 = vmatprep.subr.bf16.mxu0 %v8803_v19  ;;  %3860 = vmatprep.subr.bf16.mxu1 %v8805_v20  ;;  %v8859_v19 = vcombine.high %v573_v6, %v577_v7  ;;  %v625_v0 = vld [vmem:[#allocation5 + $0xf70] sm:$0xff] }
 0x242   :  { %3688 = vmatmul.mubr.bf16.vlgmr.msra.gmra.mrb[4].mxu0 %v10126_v36  ;;  %3852 = vmatmul.mubr.bf16.vlgmr.msra.gmra.mrb[4].mxu1 %v10126_v36  ;;  %v8820_v36 = vcombine.low %v534_v31, %v538_v32  ;;  %v593_v31 = vld [vmem:[#allocation5 + $0xe70] sm:$0xff]  ;;  %v590_v32 = vld [vmem:[#allocation5 + $0xe58] sm:$0xff] }
 0x243   :  { %3697 = vmatpush1.bf16.msra.mxu0 %v8802_v26  ;;  %3861 = vmatpush1.bf16.msra.mxu1 %v8804_v12  ;;  %v586_v26 = vld [vmem:[#allocation5 + $0xe38] sm:$0xff]  ;;  %v8858_v12 = vcombine.low %v573_v6, %v577_v7  ;;  %v8907_v7 = vcombine.high %v621_v63, %v625_v0 }
 0x244   :  { %3698 = vmatprep.subr.bf16.mxu0 %v8811_v27  ;;  %3862 = vmatprep.subr.bf16.mxu1 %v8813_v28  ;;  %v8860_v27 = vcombine.low %v574_v10, %v578_v11  ;;  %v8867_v28 = vcombine.high %v581_v57, %v585_v22  ;;  %v8869_v29 = vcombine.high %v582_v24, %v586_v26  ;;  %v629_v11 = vld [vmem:[#allocation5 + $0xf90] sm:$0xff] }
 0x245   :  { %3728 = vmatprep.mubr.bf16.mxu0 %v10128_v46  ;;  %3892 = vmatprep.mubr.bf16.mxu1 %v10128_v46  ;;  %v8837_v46 = vcombine.high %v550_v34, %v554_v47  ;;  %v609_v34 = vld [vmem:[#allocation5 + $0xef0] sm:$0xff]  ;;  %v606_v47 = vld [vmem:[#allocation5 + $0xed8] sm:$0xff] }
 0x247   :  { %3699 = vmatpush1.bf16.msra.mxu0 %v8810_v33  ;;  %3863 = vmatpush1.bf16.msra.mxu1 %v8812_v35  ;;  %v594_v33 = vld [vmem:[#allocation5 + $0xe78] sm:$0xff]  ;;  %v8866_v35 = vcombine.low %v581_v57, %v585_v22  ;;  %v637_v22 = vld [vmem:[#allocation5 + $0xfd0] sm:$0xff] }
 0x248   :  { %3700 = vmatprep.subr.bf16.mxu0 %v8819_v37  ;;  %3864 = vmatprep.subr.bf16.mxu1 %v8821_v25  ;;  %v8868_v37 = vcombine.low %v582_v24, %v586_v26  ;;  %v8875_v25 = vcombine.high %v589_v30, %v593_v31  ;;  %v8877_v23 = vcombine.high %v590_v32, %v594_v33  ;;  %v641_v24 = vld [vmem:[#allocation5 + $0xff0] sm:$0xff] }
 0x24b   :  { %3701 = vmatpush1.bf16.msra.mxu0 %v8818_v41  ;;  %3865 = vmatpush1.bf16.msra.mxu1 %v8820_v36  ;;  %v602_v41 = vld [vmem:[#allocation5 + $0xeb8] sm:$0xff]  ;;  %v8874_v36 = vcombine.low %v589_v30, %v593_v31  ;;  %v8923_v30 = vcombine.high %v637_v22, %v641_v24 }
 0x24c   :  { %3702 = vmatprep.subr.bf16.mxu0 %v8827_v42  ;;  %3866 = vmatprep.subr.bf16.mxu1 %v8829_v43  ;;  %v8876_v42 = vcombine.low %v590_v32, %v594_v33  ;;  %v8883_v43 = vcombine.high %v597_v38, %v601_v39  ;;  %v8885_v44 = vcombine.high %v598_v40, %v602_v41  ;;  %v3917_v32 = vld [vmem:[#allocation8] sm:$0xff] }
 0x24d   :  { %v3921_v33 = vld [vmem:[#allocation8 + $0x20] sm:$0xff] }
 0x24f   :  { %3703 = vmatpush1.bf16.msra.mxu0 %v8826_v48  ;;  %3867 = vmatpush1.bf16.msra.mxu1 %v8828_v49  ;;  %v610_v48 = vld [vmem:[#allocation5 + $0xef8] sm:$0xff]  ;;  %v8882_v49 = vcombine.low %v597_v38, %v601_v39  ;;  %v8927_v39 = vcombine.high %v3917_v32, %v3921_v33 }
 0x250   :  { %3704 = vmatprep.subr.bf16.mxu0 %v8835_v50  ;;  %3868 = vmatprep.subr.bf16.mxu1 %v8837_v46  ;;  %v8884_v50 = vcombine.low %v598_v40, %v602_v41  ;;  %v8891_v46 = vcombine.high %v605_v45, %v609_v34  ;;  %v8893_v51 = vcombine.high %v606_v47, %v610_v48 }
 0x253   :  { %3705 = vmatpush1.bf16.msra.mxu0 %v8834_v56  ;;  %3869 = vmatpush1.bf16.msra.mxu1 %v8836_v58  ;;  %v614_v56 = vld [vmem:[#allocation5 + $0xf18] sm:$0xff] }
 0x254   :  { %3706 = vmatprep.subr.bf16.mxu0 %v8843_v59  ;;  %3870 = vmatprep.subr.bf16.mxu1 %v8845_v60  ;;  %v618_v58 = vld [vmem:[#allocation5 + $0xf38] sm:$0xff]  ;;  %v8890_v59 = vcombine.low %v605_v45, %v609_v34  ;;  %v8892_v60 = vcombine.low %v606_v47, %v610_v48  ;;  %v3930_v45 = vld [vmem:[#allocation8 + $0x68] sm:$0xff]  ;;  %v3933_v47 = vld [vmem:[#allocation8 + $0x80] sm:$0xff] }
 0x255   :  { %v10152_v4 = vpop.f32.mrb[0].mxu0  ;;  %v10154_v8 = vpop.f32.mrb[0].mxu1  ;;  %v8901_v62 = vcombine.high %v614_v56, %v618_v58  ;;  %v8900_v6 = vcombine.low %v614_v56, %v618_v58  ;;  %v3937_v48 = vld [vmem:[#allocation8 + $0xa0] sm:$0xff] }
 0x256   :  { %v10156_v9 = vpop.f32.mrb[1].mxu0  ;;  %v10158_v13 = vpop.f32.mrb[1].mxu1  ;;  %v8943_v56 = vcombine.high %v3933_v47, %v3937_v48 }
 0x257   :  { %v3406_v14 = vpop.f32.mrb[2].mxu0  ;;  %3707 = vmatpush1.bf16.msra.mxu0 %v8842_v1  ;;  %v3570_v16 = vpop.f32.mrb[2].mxu1  ;;  %3871 = vmatpush1.bf16.msra.mxu1 %v8844_v2  ;;  %v10161_v1 = vshrl.u32 %v645_v55, 7  ;;  %v622_v2 = vld [vmem:[#allocation5 + $0xf58] sm:$0xff] }
 0x258   :  { %v3407_v17 = vpop.f32.mrb[3].mxu0  ;;  %3708 = vmatprep.subr.bf16.mxu0 %v8851_v3  ;;  %v3571_v20 = vpop.f32.mrb[3].mxu1  ;;  %3872 = vmatprep.subr.bf16.mxu1 %v8853_v5  ;;  %v626_v3 = vld [vmem:[#allocation5 + $0xf78] sm:$0xff]  ;;  %v8898_v5 = vcombine.low %v613_v52, %v617_v53  ;;  %v633_v14 = vld [vmem:[#allocation5 + $0xfb0] sm:$0xff] }
 0x259   :  { %v8909_v10 = vcombine.high %v622_v2, %v626_v3  ;;  %v630_v16 = vld [vmem:[#allocation5 + $0xf98] sm:$0xff]  ;;  %v8908_v20 = vcombine.low %v622_v2, %v626_v3  ;;  %v3949_v3 = vld [vmem:[#allocation8 + $0x100] sm:$0xff] }
 0x25a   :  { %v634_v17 = vld [vmem:[#allocation5 + $0xfb8] sm:$0xff] }
 0x25b   :  { %3709 = vmatpush1.bf16.msra.mxu0 %v8850_v15  ;;  %3873 = vmatpush1.bf16.msra.mxu1 %v8852_v18  ;;  %v651_v15 = vsub.s32 1, %v10161_v1  ;;  %v10164_v18 = vld [vmem:[#allocation7] sm:$0xff]  ;;  %v8917_v57 = vcombine.high %v630_v16, %v634_v17 }
 0x25c   :  { %3710 = vmatprep.subr.bf16.mxu0 %v8859_v19  ;;  %3874 = vmatprep.subr.bf16.mxu1 %v8861_v21  ;;  %v8906_v19 = vcombine.low %v621_v63, %v625_v0  ;;  %v8915_v21 = vcombine.high %v629_v11, %v633_v14  ;;  %v8942_v63 = vcombine.low %v3933_v47, %v3937_v48  ;;  %v3989_v48 = vld [vmem:[#allocation8 + $0x240] sm:$0xff] }
 0x25d   :  { %v652_v26 = vrot.slane %v10164_v18, %v651_v15 }
 0x25f   :  { %3711 = vmatpush1.bf16.msra.mxu0 %v8858_v12  ;;  %3875 = vmatpush1.bf16.msra.mxu1 %v8860_v27  ;;  %v638_v12 = vld [vmem:[#allocation5 + $0xfd8] sm:$0xff] }
 0x260   :  { %3712 = vmatprep.subr.bf16.mxu0 %v8867_v28  ;;  %3876 = vmatprep.subr.bf16.mxu1 %v8869_v29  ;;  %v642_v27 = vld [vmem:[#allocation5 + $0xff8] sm:$0xff]  ;;  %v8914_v28 = vcombine.low %v629_v11, %v633_v14  ;;  %v8916_v29 = vcombine.low %v630_v16, %v634_v17  ;;  %v3957_v17 = vld [vmem:[#allocation8 + $0x140] sm:$0xff] }
 0x261   :  { %v8925_v31 = vcombine.high %v638_v12, %v642_v27  ;;  %v8924_v38 = vcombine.low %v638_v12, %v642_v27  ;;  %v3965_v12 = vld [vmem:[#allocation8 + $0x180] sm:$0xff] }
 0x262   :  { %v3969_v27 = vld [vmem:[#allocation8 + $0x1a0] sm:$0xff] }
 0x263   :  { %3713 = vmatpush1.bf16.msra.mxu0 %v8866_v35  ;;  %3877 = vmatpush1.bf16.msra.mxu1 %v8868_v37  ;;  %v9592_v35 = vadd.f32 %v10156_v9, %v652_v26  ;;  %v3918_v37 = vld [vmem:[#allocation8 + $0x8] sm:$0xff] }
 0x264   :  { %3714 = vmatprep.subr.bf16.mxu0 %v8875_v25  ;;  %3878 = vmatprep.subr.bf16.mxu1 %v8877_v23  ;;  %v3922_v25 = vld [vmem:[#allocation8 + $0x28] sm:$0xff]  ;;  %v8922_v23 = vcombine.low %v637_v22, %v641_v24 }
 0x265   :  { %v8929_v40 = vcombine.high %v3918_v37, %v3922_v25  ;;  %v3902_v41 = vmax.f32 %v9592_v35, 0.0  ;;  %v8928_v9 = vcombine.low %v3918_v37, %v3922_v25  ;;  %v3973_v35 = vld [vmem:[#allocation8 + $0x1c0] sm:$0xff]  ;;  %v3974_v25 = vld [vmem:[#allocation8 + $0x1c8] sm:$0xff] }
 0x266   :  { %v3977_v37 = vld [vmem:[#allocation8 + $0x1e0] sm:$0xff] }
 0x267   :  { %3715 = vmatpush1.bf16.msra.mxu0 %v8874_v36  ;;  %3879 = vmatpush1.bf16.msra.mxu1 %v8876_v42  ;;  %v3925_v36 = vld [vmem:[#allocation8 + $0x40] sm:$0xff] }
 0x268   :  { %3716 = vmatprep.subr.bf16.mxu0 %v8883_v43  ;;  %3880 = vmatprep.subr.bf16.mxu1 %v8885_v44  ;;  %v3929_v42 = vld [vmem:[#allocation8 + $0x60] sm:$0xff]  ;;  %v8926_v43 = vcombine.low %v3917_v32, %v3921_v33  ;;  %v3926_v44 = vld [vmem:[#allocation8 + $0x48] sm:$0xff]  ;;  %v8975_v32 = vcombine.high %v3965_v12, %v3969_v27 }
 0x269   :  { %v8935_v34 = vcombine.high %v3925_v36, %v3929_v42  ;;  %v8934_v52 = vcombine.low %v3925_v36, %v3929_v42  ;;  %v8936_v53 = vcombine.low %v3926_v44, %v3930_v45  ;;  %v3981_v36 = vld [vmem:[#allocation8 + $0x200] sm:$0xff] }
 0x26a   :  { %v3985_v42 = vld [vmem:[#allocation8 + $0x220] sm:$0xff] }
 0x26b   :  { %3717 = vmatpush1.bf16.msra.mxu0 %v8882_v49  ;;  %3881 = vmatpush1.bf16.msra.mxu1 %v8884_v50  ;;  %v10170_v49 = vpack.c.bf16 %v3902_v41, %v3902_v41  ;;  %v8937_v50 = vcombine.high %v3926_v44, %v3930_v45  ;;  %v3986_v44 = vld [vmem:[#allocation8 + $0x228] sm:$0xff]  ;;  %v8982_v45 = vcombine.low %v3973_v35, %v3977_v37 }
 0x26c   :  { %3718 = vmatprep.subr.bf16.mxu0 %v8891_v46  ;;  %3882 = vmatprep.subr.bf16.mxu1 %v8893_v51  ;;  %v3934_v46 = vld [vmem:[#allocation8 + $0x88] sm:$0xff] }
 0x26d   :  { %v3938_v51 = vld [vmem:[#allocation8 + $0xa8] sm:$0xff] }
 0x26e   :  { %v8945_v58 = vcombine.high %v3934_v46, %v3938_v51 }
 0x26f   :  { %3719 = vmatpush1.bf16.msra.mxu0 %v8890_v59  ;;  %3883 = vmatpush1.bf16.msra.mxu1 %v8892_v60  ;;  %v3941_v59 = vld [vmem:[#allocation8 + $0xc0] sm:$0xff] }
 0x270   :  { %3720 = vmatprep.subr.bf16.mxu0 %v8899_v61  ;;  %3884 = vmatprep.subr.bf16.mxu1 %v8901_v62  ;;  %v3945_v60 = vld [vmem:[#allocation8 + $0xe0] sm:$0xff]  ;;  %v3942_v61 = vld [vmem:[#allocation8 + $0xc8] sm:$0xff] }
 0x271   :  { %v3946_v62 = vld [vmem:[#allocation8 + $0xe8] sm:$0xff]  ;;  %v8951_v0 = vcombine.high %v3941_v59, %v3945_v60 }
 0x272   :  { %v8953_v2 = vcombine.high %v3942_v61, %v3946_v62  ;;  %v8952_v11 = vcombine.low %v3942_v61, %v3946_v62  ;;  %v3998_v61 = vld [vmem:[#allocation8 + $0x288] sm:$0xff] }
 0x273   :  { %3721 = vmatpush1.bf16.msra.mxu0 %v8898_v5  ;;  %3885 = vmatpush1.bf16.msra.mxu1 %v8900_v6  ;;  %v3953_v5 = vld [vmem:[#allocation8 + $0x120] sm:$0xff]  ;;  %v3950_v6 = vld [vmem:[#allocation8 + $0x108] sm:$0xff] }
 0x274   :  { %3722 = vmatprep.subr.bf16.mxu0 %v8907_v7  ;;  %3886 = vmatprep.subr.bf16.mxu1 %v8909_v10  ;;  %v3954_v7 = vld [vmem:[#allocation8 + $0x128] sm:$0xff]  ;;  %v8950_v10 = vcombine.low %v3941_v59, %v3945_v60  ;;  %v8959_v14 = vcombine.high %v3949_v3, %v3953_v5  ;;  %v3997_v59 = vld [vmem:[#allocation8 + $0x280] sm:$0xff] }
 0x275   :  { %v8961_v16 = vcombine.high %v3950_v6, %v3954_v7  ;;  %v8960_v22 = vcombine.low %v3950_v6, %v3954_v7  ;;  %v4001_v60 = vld [vmem:[#allocation8 + $0x2a0] sm:$0xff]  ;;  %v4002_v62 = vld [vmem:[#allocation8 + $0x2a8] sm:$0xff] }
 0x276   :  { %v4006_v6 = vld [vmem:[#allocation8 + $0x2c8] sm:$0xff] }
 0x277   :  { %3723 = vmatpush1.bf16.msra.mxu0 %v8906_v19  ;;  %3887 = vmatpush1.bf16.msra.mxu1 %v8908_v20  ;;  %v3961_v19 = vld [vmem:[#allocation8 + $0x160] sm:$0xff]  ;;  %v3958_v20 = vld [vmem:[#allocation8 + $0x148] sm:$0xff] }
 0x278   :  { %3724 = vmatprep.subr.bf16.mxu0 %v8915_v21  ;;  %3888 = vmatprep.subr.bf16.mxu1 %v8917_v57  ;;  %v3962_v21 = vld [vmem:[#allocation8 + $0x168] sm:$0xff]  ;;  %v8958_v57 = vcombine.low %v3949_v3, %v3953_v5  ;;  %v8967_v24 = vcombine.high %v3957_v17, %v3961_v19  ;;  %v4005_v3 = vld [vmem:[#allocation8 + $0x2c0] sm:$0xff] }
 0x279   :  { %v8969_v26 = vcombine.high %v3958_v20, %v3962_v21  ;;  %v4009_v5 = vld [vmem:[#allocation8 + $0x2e0] sm:$0xff]  ;;  %v4010_v7 = vld [vmem:[#allocation8 + $0x2e8] sm:$0xff] }
 0x27b   :  { %3725 = vmatpush1.bf16.msra.mxu0 %v8914_v28  ;;  %3889 = vmatpush1.bf16.msra.mxu1 %v8916_v29  ;;  %v3966_v28 = vld [vmem:[#allocation8 + $0x188] sm:$0xff] }
 0x27c   :  { %3726 = vmatprep.subr.bf16.mxu0 %v8923_v30  ;;  %3890 = vmatprep.subr.bf16.mxu1 %v8925_v31  ;;  %v3970_v29 = vld [vmem:[#allocation8 + $0x1a8] sm:$0xff]  ;;  %v8966_v30 = vcombine.low %v3957_v17, %v3961_v19  ;;  %v8968_v31 = vcombine.low %v3958_v20, %v3962_v21  ;;  %v4013_v17 = vld [vmem:[#allocation8 + $0x300] sm:$0xff] }
 0x27d   :  { %v8977_v33 = vcombine.high %v3966_v28, %v3970_v29  ;;  %v4017_v19 = vld [vmem:[#allocation8 + $0x320] sm:$0xff]  ;;  %v4014_v20 = vld [vmem:[#allocation8 + $0x308] sm:$0xff] }
 0x27e   :  { %v4018_v21 = vld [vmem:[#allocation8 + $0x328] sm:$0xff] }
 0x27f   :  { %3727 = vmatpush1.bf16.msra.mxu0 %v8922_v23  ;;  %3891 = vmatpush1.bf16.msra.mxu1 %v8924_v38  ;;  %v3978_v23 = vld [vmem:[#allocation8 + $0x1e8] sm:$0xff]  ;;  %v8974_v38 = vcombine.low %v3965_v12, %v3969_v27  ;;  %v4021_v12 = vld [vmem:[#allocation8 + $0x340] sm:$0xff] }
 0x280   :  { %7031 = vmatprep.subr.bf16.mxu0 %v8927_v39  ;;  %7195 = vmatprep.subr.bf16.mxu1 %v8929_v40  ;;  %v8976_v39 = vcombine.low %v3966_v28, %v3970_v29  ;;  %v8983_v40 = vcombine.high %v3973_v35, %v3977_v37  ;;  %v8985_v41 = vcombine.high %v3974_v25, %v3978_v23  ;;  %v4025_v27 = vld [vmem:[#allocation8 + $0x360] sm:$0xff]  ;;  %v4022_v28 = vld [vmem:[#allocation8 + $0x348] sm:$0xff] }
 0x281   :  { %v4026_v29 = vld [vmem:[#allocation8 + $0x368] sm:$0xff]  ;;  %v4029_v37 = vld [vmem:[#allocation8 + $0x380] sm:$0xff] }
 0x282   :  { %3729 = vmatmul.mubr.bf16.vlgmr.msra.gmra.mrb[4].mxu0 %v10134_v54  ;;  %3893 = vmatmul.mubr.bf16.vlgmr.msra.gmra.mrb[4].mxu1 %v10134_v54  ;;  %v8944_v54 = vcombine.low %v3934_v46, %v3938_v51  ;;  %v3990_v46 = vld [vmem:[#allocation8 + $0x248] sm:$0xff]  ;;  %v9033_v35 = vcombine.high %v4022_v28, %v4026_v29 }
 0x283   :  { %7032 = vmatpush1.bf16.msra.mxu0 %v8926_v43  ;;  %7063 = vmatprep.mubr.bf16.mxu0 %v10170_v49  ;;  %v3982_v43 = vld [vmem:[#allocation8 + $0x208] sm:$0xff] }
 0x284   :  { %7196 = vmatpush1.bf16.msra.mxu1 %v8928_v9  ;;  %7227 = vmatprep.mubr.bf16.mxu1 %v10170_v49  ;;  %v8984_v9 = vcombine.low %v3974_v25, %v3978_v23  ;;  %v8993_v47 = vcombine.high %v3982_v43, %v3986_v44  ;;  %v3994_v51 = vld [vmem:[#allocation8 + $0x268] sm:$0xff]  ;;  %v4033_v25 = vld [vmem:[#allocation8 + $0x3a0] sm:$0xff]  ;;  %v659_v23 = vsub.s32 3, %v10161_v1 }
 0x285   :  { %7033 = vmatprep.subr.bf16.mxu0 %v8935_v34  ;;  %7197 = vmatprep.subr.bf16.mxu1 %v8937_v50  ;;  %v8991_v34 = vcombine.high %v3981_v36, %v3985_v42  ;;  %v3993_v50 = vld [vmem:[#allocation8 + $0x260] sm:$0xff] }
 0x287   :  { %7034 = vmatpush1.bf16.msra.mxu0 %v8934_v52  ;;  %v8990_v52 = vcombine.low %v3981_v36, %v3985_v42  ;;  %v9032_v36 = vcombine.low %v4022_v28, %v4026_v29  ;;  %v9039_v42 = vcombine.high %v4029_v37, %v4033_v25  ;;  %v4070_v28 = vld [vmem:[#allocation8 + $0x4c8] sm:$0xff] }
 0x288   :  { %7198 = vmatpush1.bf16.msra.mxu1 %v8936_v53  ;;  %7035 = vmatprep.subr.bf16.mxu0 %v8943_v56  ;;  %v8992_v53 = vcombine.low %v3982_v43, %v3986_v44  ;;  %v8999_v56 = vcombine.high %v3989_v48, %v3993_v50  ;;  %v4037_v44 = vld [vmem:[#allocation8 + $0x3c0] sm:$0xff]  ;;  %v4074_v29 = vld [vmem:[#allocation8 + $0x4e8] sm:$0xff] }
 0x289   :  { %7199 = vmatprep.subr.bf16.mxu1 %v8945_v58  ;;  %v9001_v58 = vcombine.high %v3990_v46, %v3994_v51 }
 0x28b   :  { %7036 = vmatpush1.bf16.msra.mxu0 %v8942_v63  ;;  %v8998_v63 = vcombine.low %v3989_v48, %v3993_v50  ;;  %v9038_v48 = vcombine.low %v4029_v37, %v4033_v25  ;;  %v4077_v37 = vld [vmem:[#allocation8 + $0x500] sm:$0xff] }
 0x28c   :  { %7200 = vmatpush1.bf16.msra.mxu1 %v8944_v54  ;;  %7037 = vmatprep.subr.bf16.mxu0 %v8951_v0  ;;  %v9000_v54 = vcombine.low %v3990_v46, %v3994_v51  ;;  %v9007_v0 = vcombine.high %v3997_v59, %v4001_v60  ;;  %v4081_v25 = vld [vmem:[#allocation8 + $0x520] sm:$0xff] }
 0x28d   :  { %7201 = vmatprep.subr.bf16.mxu1 %v8953_v2  ;;  %v9009_v2 = vcombine.high %v3998_v61, %v4002_v62 }
 0x28f   :  { %7038 = vmatpush1.bf16.msra.mxu0 %v8950_v10  ;;  %v9006_v10 = vcombine.low %v3997_v59, %v4001_v60  ;;  %v4046_v59 = vld [vmem:[#allocation8 + $0x408] sm:$0xff] }
 0x290   :  { %7202 = vmatpush1.bf16.msra.mxu1 %v8952_v11  ;;  %7039 = vmatprep.subr.bf16.mxu0 %v8959_v14  ;;  %v9008_v11 = vcombine.low %v3998_v61, %v4002_v62  ;;  %v9015_v14 = vcombine.high %v4005_v3, %v4009_v5  ;;  %v4050_v60 = vld [vmem:[#allocation8 + $0x428] sm:$0xff] }
 0x291   :  { %7203 = vmatprep.subr.bf16.mxu1 %v8961_v16  ;;  %v9017_v16 = vcombine.high %v4006_v6, %v4010_v7 }
 0x293   :  { %7040 = vmatpush1.bf16.msra.mxu0 %v8958_v57  ;;  %v9014_v57 = vcombine.low %v4005_v3, %v4009_v5  ;;  %v4057_v3 = vld [vmem:[#allocation8 + $0x460] sm:$0xff] }
 0x294   :  { %7204 = vmatpush1.bf16.msra.mxu1 %v8960_v22  ;;  %7041 = vmatprep.subr.bf16.mxu0 %v8967_v24  ;;  %v9016_v22 = vcombine.low %v4006_v6, %v4010_v7  ;;  %v9023_v24 = vcombine.high %v4013_v17, %v4017_v19  ;;  %v4054_v6 = vld [vmem:[#allocation8 + $0x448] sm:$0xff] }
 0x295   :  { %7205 = vmatprep.subr.bf16.mxu1 %v8969_v26  ;;  %v9025_v26 = vcombine.high %v4014_v20, %v4018_v21  ;;  %v4058_v7 = vld [vmem:[#allocation8 + $0x468] sm:$0xff] }
 0x297   :  { %7042 = vmatpush1.bf16.msra.mxu0 %v8966_v30  ;;  %v9022_v30 = vcombine.low %v4013_v17, %v4017_v19  ;;  %v9065_v19 = vcombine.high %v4054_v6, %v4058_v7 }
 0x298   :  { %7206 = vmatpush1.bf16.msra.mxu1 %v8968_v31  ;;  %7043 = vmatprep.subr.bf16.mxu0 %v8975_v32  ;;  %v647_v31 = vsub.s32 0, %v10161_v1  ;;  %v9024_v32 = vcombine.low %v4014_v20, %v4018_v21  ;;  %v4062_v20 = vld [vmem:[#allocation8 + $0x488] sm:$0xff] }
 0x299   :  { %7207 = vmatprep.subr.bf16.mxu1 %v8977_v33  ;;  %v9031_v33 = vcombine.high %v4021_v12, %v4025_v27  ;;  %v4066_v21 = vld [vmem:[#allocation8 + $0x4a8] sm:$0xff] }
 0x29b   :  { %7044 = vmatpush1.bf16.msra.mxu0 %v8974_v38  ;;  %v4030_v38 = vld [vmem:[#allocation8 + $0x388] sm:$0xff] }
 0x29c   :  { %7208 = vmatpush1.bf16.msra.mxu1 %v8976_v39  ;;  %7045 = vmatprep.subr.bf16.mxu0 %v8983_v40  ;;  %v4034_v39 = vld [vmem:[#allocation8 + $0x3a8] sm:$0xff]  ;;  %v9030_v40 = vcombine.low %v4021_v12, %v4025_v27  ;;  %v4069_v12 = vld [vmem:[#allocation8 + $0x4c0] sm:$0xff] }
 0x29d   :  { %7209 = vmatprep.subr.bf16.mxu1 %v8985_v41  ;;  %v648_v41 = vrot.slane %v10164_v18, %v647_v31  ;;  %v9041_v43 = vcombine.high %v4030_v38, %v4034_v39  ;;  %v9040_v46 = vcombine.low %v4030_v38, %v4034_v39  ;;  %v4073_v27 = vld [vmem:[#allocation8 + $0x4e0] sm:$0xff]  ;;  %v4078_v38 = vld [vmem:[#allocation8 + $0x508] sm:$0xff] }
 0x29e   :  { %v4082_v39 = vld [vmem:[#allocation8 + $0x528] sm:$0xff] }
 0x29f   :  { %7046 = vmatpush1.bf16.msra.mxu0 %v8982_v45  ;;  %v4041_v45 = vld [vmem:[#allocation8 + $0x3e0] sm:$0xff]  ;;  %v9591_v50 = vadd.f32 %v10152_v4, %v648_v41  ;;  %v9057_v4 = vcombine.high %v4046_v59, %v4050_v60  ;;  %v9080_v41 = vcombine.low %v4070_v28, %v4074_v29 }
 0x2a0   :  { %7210 = vmatpush1.bf16.msra.mxu1 %v8984_v9  ;;  %7047 = vmatprep.subr.bf16.mxu0 %v8991_v34  ;;  %v660_v9 = vrot.slane %v10164_v18, %v659_v23  ;;  %v4038_v34 = vld [vmem:[#allocation8 + $0x3c8] sm:$0xff]  ;;  %v9047_v51 = vcombine.high %v4037_v44, %v4041_v45  ;;  %v9046_v61 = vcombine.low %v4037_v44, %v4041_v45  ;;  %v4089_v44 = vld [vmem:[#allocation8 + $0x560] sm:$0xff] }
 0x2a1   :  { %7211 = vmatprep.subr.bf16.mxu1 %v8993_v47  ;;  %v4042_v47 = vld [vmem:[#allocation8 + $0x3e8] sm:$0xff]  ;;  %v3901_v62 = vmax.f32 %v9591_v50, 0.0 }
 0x2a2   :  { %v4086_v45 = vld [vmem:[#allocation8 + $0x548] sm:$0xff] }
 0x2a3   :  { %7048 = vmatpush1.bf16.msra.mxu0 %v8990_v52  ;;  %v9049_v52 = vcombine.high %v4038_v34, %v4042_v47 }
 0x2a4   :  { %7212 = vmatpush1.bf16.msra.mxu1 %v8992_v53  ;;  %7049 = vmatprep.subr.bf16.mxu0 %v8999_v56  ;;  %v4045_v53 = vld [vmem:[#allocation8 + $0x400] sm:$0xff] }
 0x2a5   :  { %7213 = vmatprep.subr.bf16.mxu1 %v9001_v58  ;;  %v4049_v56 = vld [vmem:[#allocation8 + $0x420] sm:$0xff]  ;;  %v9594_v58 = vadd.f32 %v10158_v13, %v660_v9  ;;  %v9056_v13 = vcombine.low %v4046_v59, %v4050_v60  ;;  %v4090_v9 = vld [vmem:[#allocation8 + $0x568] sm:$0xff] }
 0x2a6   :  { %v9054_v5 = vcombine.low %v4045_v53, %v4049_v56  ;;  %v9097_v50 = vcombine.high %v4086_v45, %v4090_v9 }
 0x2a7   :  { %7050 = vmatpush1.bf16.msra.mxu0 %v8998_v63  ;;  %v9048_v63 = vcombine.low %v4038_v34, %v4042_v47  ;;  %v9086_v34 = vcombine.low %v4077_v37, %v4081_v25  ;;  %v9088_v47 = vcombine.low %v4078_v38, %v4082_v39 }
 0x2a8   :  { %7214 = vmatpush1.bf16.msra.mxu1 %v9000_v54  ;;  %7051 = vmatprep.subr.bf16.mxu0 %v9007_v0  ;;  %v9055_v54 = vcombine.high %v4045_v53, %v4049_v56  ;;  %v3904_v0 = vmax.f32 %v9594_v58, 0.0  ;;  %v4098_v53 = vld [vmem:[#allocation8 + $0x5a8] sm:$0xff]  ;;  %v9096_v58 = vcombine.low %v4086_v45, %v4090_v9  ;;  %v4141_v45 = vld [vmem:[#allocation8 + $0x700] sm:$0xff] }
 0x2a9   :  { %7215 = vmatprep.subr.bf16.mxu1 %v9009_v2  ;;  %v4053_v2 = vld [vmem:[#allocation8 + $0x440] sm:$0xff] }
 0x2aa   :  { %v10188_v17 = vpack.c.bf16 %v3904_v0, %v3904_v0  ;;  %v4145_v9 = vld [vmem:[#allocation8 + $0x720] sm:$0xff] }
 0x2ab   :  { %7052 = vmatpush1.bf16.msra.mxu0 %v9006_v10  ;;  %v10186_v10 = vpack.c.bf16 %v3901_v62, %v3901_v62  ;;  %v4105_v62 = vld [vmem:[#allocation8 + $0x5e0] sm:$0xff] }
 0x2ac   :  { %7216 = vmatpush1.bf16.msra.mxu1 %v9008_v11  ;;  %7053 = vmatprep.subr.bf16.mxu0 %v9015_v14  ;;  %v9063_v11 = vcombine.high %v4053_v2, %v4057_v3  ;;  %v4061_v14 = vld [vmem:[#allocation8 + $0x480] sm:$0xff] }
 0x2ad   :  { %7217 = vmatprep.subr.bf16.mxu1 %v9017_v16  ;;  %v4065_v16 = vld [vmem:[#allocation8 + $0x4a0] sm:$0xff] }
 0x2af   :  { %7054 = vmatpush1.bf16.msra.mxu0 %v9014_v57  ;;  %v9062_v57 = vcombine.low %v4053_v2, %v4057_v3 }
 0x2b0   :  { %7218 = vmatpush1.bf16.msra.mxu1 %v9016_v22  ;;  %7055 = vmatprep.subr.bf16.mxu0 %v9023_v24  ;;  %v9064_v22 = vcombine.low %v4054_v6, %v4058_v7  ;;  %v9071_v24 = vcombine.high %v4061_v14, %v4065_v16  ;;  %v4113_v6 = vld [vmem:[#allocation8 + $0x620] sm:$0xff]  ;;  %v4110_v7 = vld [vmem:[#allocation8 + $0x608] sm:$0xff] }
 0x2b1   :  { %7219 = vmatprep.subr.bf16.mxu1 %v9025_v26  ;;  %v9073_v26 = vcombine.high %v4062_v20, %v4066_v21 }
 0x2b3   :  { %7056 = vmatpush1.bf16.msra.mxu0 %v9022_v30  ;;  %v9070_v30 = vcombine.low %v4061_v14, %v4065_v16 }
 0x2b4   :  { %7220 = vmatpush1.bf16.msra.mxu1 %v9024_v32  ;;  %7057 = vmatprep.subr.bf16.mxu0 %v9031_v33  ;;  %v9072_v32 = vcombine.low %v4062_v20, %v4066_v21  ;;  %v9079_v33 = vcombine.high %v4069_v12, %v4073_v27  ;;  %v4117_v20 = vld [vmem:[#allocation8 + $0x640] sm:$0xff] }
 0x2b5   :  { %7221 = vmatprep.subr.bf16.mxu1 %v9033_v35  ;;  %v9081_v35 = vcombine.high %v4070_v28, %v4074_v29  ;;  %v4121_v21 = vld [vmem:[#allocation8 + $0x660] sm:$0xff] }
 0x2b6   :  { %v4125_v28 = vld [vmem:[#allocation8 + $0x680] sm:$0xff] }
 0x2b7   :  { %7058 = vmatpush1.bf16.msra.mxu0 %v9030_v40  ;;  %v9078_v40 = vcombine.low %v4069_v12, %v4073_v27  ;;  %v9127_v12 = vcombine.high %v4117_v20, %v4121_v21  ;;  %v4129_v29 = vld [vmem:[#allocation8 + $0x6a0] sm:$0xff] }
 0x2b8   :  { %7222 = vmatpush1.bf16.msra.mxu1 %v9032_v36  ;;  %7059 = vmatprep.subr.bf16.mxu0 %v9039_v42  ;;  %v9087_v36 = vcombine.high %v4077_v37, %v4081_v25  ;;  %v9089_v42 = vcombine.high %v4078_v38, %v4082_v39  ;;  %v9135_v37 = vcombine.high %v4125_v28, %v4129_v29  ;;  %v4133_v38 = vld [vmem:[#allocation8 + $0x6c0] sm:$0xff] }
 0x2b9   :  { %7223 = vmatprep.subr.bf16.mxu1 %v9041_v43  ;;  %v4085_v43 = vld [vmem:[#allocation8 + $0x540] sm:$0xff] }
 0x2ba   :  { %v9094_v56 = vcombine.low %v4085_v43, %v4089_v44  ;;  %v4137_v39 = vld [vmem:[#allocation8 + $0x6e0] sm:$0xff] }
 0x2bb   :  { %7060 = vmatpush1.bf16.msra.mxu0 %v9038_v48  ;;  %v9095_v48 = vcombine.high %v4085_v43, %v4089_v44  ;;  %v9143_v43 = vcombine.high %v4133_v38, %v4137_v39 }
 0x2bc   :  { %7224 = vmatpush1.bf16.msra.mxu1 %v9040_v46  ;;  %7061 = vmatprep.subr.bf16.mxu0 %v9047_v51  ;;  %v4093_v46 = vld [vmem:[#allocation8 + $0x580] sm:$0xff] }
 0x2bd   :  { %7225 = vmatprep.subr.bf16.mxu1 %v9049_v52  ;;  %v4097_v51 = vld [vmem:[#allocation8 + $0x5a0] sm:$0xff]  ;;  %v4094_v52 = vld [vmem:[#allocation8 + $0x588] sm:$0xff] }
 0x2be   :  { %v9103_v59 = vcombine.high %v4093_v46, %v4097_v51  ;;  %v9105_v60 = vcombine.high %v4094_v52, %v4098_v53  ;;  %v9104_v0 = vcombine.low %v4094_v52, %v4098_v53  ;;  %v4149_v52 = vld [vmem:[#allocation8 + $0x740] sm:$0xff] }
 0x2bf   :  { %7062 = vmatpush1.bf16.msra.mxu0 %v9046_v61  ;;  %v4101_v61 = vld [vmem:[#allocation8 + $0x5c0] sm:$0xff] }
 0x2c0   :  { %7226 = vmatpush1.bf16.msra.mxu1 %v9048_v63  ;;  %7072 = vmatprep.subr.bf16.mxu0 %v9055_v54  ;;  %v4102_v63 = vld [vmem:[#allocation8 + $0x5c8] sm:$0xff]  ;;  %v9111_v2 = vcombine.high %v4101_v61, %v4105_v62  ;;  %v4153_v53 = vld [vmem:[#allocation8 + $0x760] sm:$0xff] }
 0x2c1   :  { %7236 = vmatprep.subr.bf16.mxu1 %v9057_v4  ;;  %v4106_v54 = vld [vmem:[#allocation8 + $0x5e8] sm:$0xff]  ;;  %v9102_v4 = vcombine.low %v4093_v46, %v4097_v51  ;;  %v9151_v46 = vcombine.high %v4141_v45, %v4145_v9 }
 0x2c2   :  { %7064 = vmatmul.mubr.bf16.vlgmr.msra.gmra.mrb[8].mxu0 %v10186_v10  ;;  %v9113_v3 = vcombine.high %v4102_v63, %v4106_v54  ;;  %v9112_v14 = vcombine.low %v4102_v63, %v4106_v54  ;;  %v4157_v54 = vld [vmem:[#allocation8 + $0x780] sm:$0xff] }
 0x2c3   :  { %7228 = vmatmul.mubr.bf16.vlgmr.msra.gmra.mrb[8].mxu1 %v10186_v10  ;;  %7073 = vmatpush1.bf16.msra.mxu0 %v9054_v5  ;;  %v4109_v5 = vld [vmem:[#allocation8 + $0x600] sm:$0xff] }
 0x2c4   :  { %7104 = vmatprep.mubr.bf16.mxu0 %v10188_v17  ;;  %7237 = vmatpush1.bf16.msra.mxu1 %v9056_v13  ;;  %v4114_v13 = vld [vmem:[#allocation8 + $0x628] sm:$0xff]  ;;  %v9119_v16 = vcombine.high %v4109_v5, %v4113_v6 }
 0x2c5   :  { %7268 = vmatprep.mubr.bf16.mxu1 %v10188_v17  ;;  %7074 = vmatprep.subr.bf16.mxu0 %v9063_v11  ;;  %v9110_v11 = vcombine.low %v4101_v61, %v4105_v62  ;;  %v9159_v62 = vcombine.high %v4149_v52, %v4153_v53 }
 0x2c6   :  { %7238 = vmatprep.subr.bf16.mxu1 %v9065_v19  ;;  %v9121_v19 = vcombine.high %v4110_v7, %v4114_v13 }
 0x2c7   :  { %7075 = vmatpush1.bf16.msra.mxu0 %v9062_v57  ;;  %v4118_v57 = vld [vmem:[#allocation8 + $0x648] sm:$0xff] }
 0x2c8   :  { %7239 = vmatpush1.bf16.msra.mxu1 %v9064_v22  ;;  %7076 = vmatprep.subr.bf16.mxu0 %v9071_v24  ;;  %v4122_v22 = vld [vmem:[#allocation8 + $0x668] sm:$0xff]  ;;  %v9118_v24 = vcombine.low %v4109_v5, %v4113_v6 }
 0x2c9   :  { %7240 = vmatprep.subr.bf16.mxu1 %v9073_v26  ;;  %v9120_v26 = vcombine.low %v4110_v7, %v4114_v13  ;;  %v9129_v27 = vcombine.high %v4118_v57, %v4122_v22 }
 0x2cb   :  { %7077 = vmatpush1.bf16.msra.mxu0 %v9070_v30  ;;  %v4126_v30 = vld [vmem:[#allocation8 + $0x688] sm:$0xff] }
 0x2cc   :  { %7241 = vmatpush1.bf16.msra.mxu1 %v9072_v32  ;;  %7078 = vmatprep.subr.bf16.mxu0 %v9079_v33  ;;  %v4130_v32 = vld [vmem:[#allocation8 + $0x6a8] sm:$0xff]  ;;  %v9126_v33 = vcombine.low %v4117_v20, %v4121_v21 }
 0x2cd   :  { %7242 = vmatprep.subr.bf16.mxu1 %v9081_v35  ;;  %v9128_v35 = vcombine.low %v4118_v57, %v4122_v22  ;;  %v9137_v25 = vcombine.high %v4126_v30, %v4130_v32 }
 0x2cf   :  { %7079 = vmatpush1.bf16.msra.mxu0 %v9078_v40  ;;  %v4134_v40 = vld [vmem:[#allocation8 + $0x6c8] sm:$0xff] }
 0x2d0   :  { %7243 = vmatpush1.bf16.msra.mxu1 %v9080_v41  ;;  %7080 = vmatprep.subr.bf16.mxu0 %v9087_v36  ;;  %v4138_v41 = vld [vmem:[#allocation8 + $0x6e8] sm:$0xff]  ;;  %v9134_v36 = vcombine.low %v4125_v28, %v4129_v29 }
 0x2d1   :  { %7244 = vmatprep.subr.bf16.mxu1 %v9089_v42  ;;  %v9136_v42 = vcombine.low %v4126_v30, %v4130_v32  ;;  %v9145_v44 = vcombine.high %v4134_v40, %v4138_v41 }
 0x2d3   :  { %7081 = vmatpush1.bf16.msra.mxu0 %v9086_v34  ;;  %v4142_v34 = vld [vmem:[#allocation8 + $0x708] sm:$0xff] }
 0x2d4   :  { %7245 = vmatpush1.bf16.msra.mxu1 %v9088_v47  ;;  %7082 = vmatprep.subr.bf16.mxu0 %v9095_v48  ;;  %v4146_v47 = vld [vmem:[#allocation8 + $0x728] sm:$0xff]  ;;  %v9142_v48 = vcombine.low %v4133_v38, %v4137_v39 }
 0x2d5   :  { %7246 = vmatprep.subr.bf16.mxu1 %v9097_v50  ;;  %v9144_v50 = vcombine.low %v4134_v40, %v4138_v41  ;;  %v9153_v51 = vcombine.high %v4142_v34, %v4146_v47  ;;  %v9152_v61 = vcombine.low %v4142_v34, %v4146_v47 }
 0x2d7   :  { %7083 = vmatpush1.bf16.msra.mxu0 %v9094_v56  ;;  %v4150_v56 = vld [vmem:[#allocation8 + $0x748] sm:$0xff] }
 0x2d8   :  { %7247 = vmatpush1.bf16.msra.mxu1 %v9096_v58  ;;  %7084 = vmatprep.subr.bf16.mxu0 %v9103_v59  ;;  %v4154_v58 = vld [vmem:[#allocation8 + $0x768] sm:$0xff]  ;;  %v9150_v59 = vcombine.low %v4141_v45, %v4145_v9 }
 0x2d9   :  { %7248 = vmatprep.subr.bf16.mxu1 %v9105_v60  ;;  %v655_v60 = vsub.s32 2, %v10161_v1  ;;  %v9161_v63 = vcombine.high %v4150_v56, %v4154_v58  ;;  %v9160_v6 = vcombine.low %v4150_v56, %v4154_v58  ;;  %v4194_v45 = vld [vmem:[#allocation8 + $0x8a8] sm:$0xff] }
 0x2db   :  { %7085 = vmatpush1.bf16.msra.mxu0 %v9102_v4  ;;  %v4161_v4 = vld [vmem:[#allocation8 + $0x7a0] sm:$0xff]  ;;  %v656_v5 = vrot.slane %v10164_v18, %v655_v60 }
 0x2dc   :  { %7249 = vmatpush1.bf16.msra.mxu1 %v9104_v0  ;;  %7086 = vmatprep.subr.bf16.mxu0 %v9111_v2  ;;  %v4158_v0 = vld [vmem:[#allocation8 + $0x788] sm:$0xff]  ;;  %v9167_v7 = vcombine.high %v4157_v54, %v4161_v4  ;;  %v9166_v20 = vcombine.low %v4157_v54, %v4161_v4 }
 0x2dd   :  { %7250 = vmatprep.subr.bf16.mxu1 %v9113_v3  ;;  %v4162_v2 = vld [vmem:[#allocation8 + $0x7a8] sm:$0xff]  ;;  %v9158_v3 = vcombine.low %v4149_v52, %v4153_v53  ;;  %v9593_v21 = vadd.f32 %v10154_v8, %v656_v5  ;;  %v4181_v8 = vld [vmem:[#allocation8 + $0x840] sm:$0xff] }
 0x2de   :  { %v9169_v13 = vcombine.high %v4158_v0, %v4162_v2  ;;  %v9168_v57 = vcombine.low %v4158_v0, %v4162_v2  ;;  %v4202_v52 = vld [vmem:[#allocation8 + $0x8e8] sm:$0xff]  ;;  %v4213_v5 = vld [vmem:[#allocation8 + $0x940] sm:$0xff] }
 0x2df   :  { %7087 = vmatpush1.bf16.msra.mxu0 %v9110_v11  ;;  %v4165_v11 = vld [vmem:[#allocation8 + $0x7c0] sm:$0xff]  ;;  %v3903_v29 = vmax.f32 %v9593_v21, 0.0  ;;  %v4210_v54 = vld [vmem:[#allocation8 + $0x928] sm:$0xff] }
 0x2e0   :  { %7251 = vmatpush1.bf16.msra.mxu1 %v9112_v14  ;;  %7088 = vmatprep.subr.bf16.mxu0 %v9119_v16  ;;  %v4169_v14 = vld [vmem:[#allocation8 + $0x7e0] sm:$0xff]  ;;  %v4166_v16 = vld [vmem:[#allocation8 + $0x7c8] sm:$0xff] }
 0x2e1   :  { %7252 = vmatprep.subr.bf16.mxu1 %v9121_v19  ;;  %v4170_v19 = vld [vmem:[#allocation8 + $0x7e8] sm:$0xff]  ;;  %v9175_v22 = vcombine.high %v4165_v11, %v4169_v14  ;;  %v9174_v28 = vcombine.low %v4165_v11, %v4169_v14  ;;  %v10199_v39 = vpack.c.bf16 %v3903_v29, %v3903_v29  ;;  %v4225_v21 = vld [vmem:[#allocation8 + $0x9a0] sm:$0xff] }
 0x2e2   :  { %v9177_v18 = vcombine.high %v4166_v16, %v4170_v19  ;;  %v9176_v30 = vcombine.low %v4166_v16, %v4170_v19  ;;  %v4230_v29 = vld [vmem:[#allocation8 + $0x9c8] sm:$0xff] }
 0x2e3   :  { %7089 = vmatpush1.bf16.msra.mxu0 %v9118_v24  ;;  %v4173_v24 = vld [vmem:[#allocation8 + $0x800] sm:$0xff] }
 0x2e4   :  { %7253 = vmatpush1.bf16.msra.mxu1 %v9120_v26  ;;  %7090 = vmatprep.subr.bf16.mxu0 %v9127_v12  ;;  %v4177_v26 = vld [vmem:[#allocation8 + $0x820] sm:$0xff]  ;;  %v4174_v12 = vld [vmem:[#allocation8 + $0x808] sm:$0xff] }
 0x2e5   :  { %7254 = vmatprep.subr.bf16.mxu1 %v9129_v27  ;;  %v4178_v27 = vld [vmem:[#allocation8 + $0x828] sm:$0xff]  ;;  %v9183_v32 = vcombine.high %v4173_v24, %v4177_v26  ;;  %v9182_v38 = vcombine.low %v4173_v24, %v4177_v26 }
 0x2e6   :  { %v9184_v40 = vcombine.low %v4174_v12, %v4178_v27 }
 0x2e7   :  { %7091 = vmatpush1.bf16.msra.mxu0 %v9126_v33  ;;  %v9185_v33 = vcombine.high %v4174_v12, %v4178_v27  ;;  %v4229_v27 = vld [vmem:[#allocation8 + $0x9c0] sm:$0xff] }
 0x2e8   :  { %7255 = vmatpush1.bf16.msra.mxu1 %v9128_v35  ;;  %7092 = vmatprep.subr.bf16.mxu0 %v9135_v37  ;;  %v4185_v35 = vld [vmem:[#allocation8 + $0x860] sm:$0xff]  ;;  %v4182_v37 = vld [vmem:[#allocation8 + $0x848] sm:$0xff] }
 0x2e9   :  { %7256 = vmatprep.subr.bf16.mxu1 %v9137_v25  ;;  %v4186_v25 = vld [vmem:[#allocation8 + $0x868] sm:$0xff]  ;;  %v9191_v41 = vcombine.high %v4181_v8, %v4185_v35  ;;  %v9190_v9 = vcombine.low %v4181_v8, %v4185_v35 }
 0x2ea   :  { %v9192_v34 = vcombine.low %v4182_v37, %v4186_v25 }
 0x2eb   :  { %7093 = vmatpush1.bf16.msra.mxu0 %v9134_v36  ;;  %v9193_v36 = vcombine.high %v4182_v37, %v4186_v25  ;;  %v4237_v37 = vld [vmem:[#allocation8 + $0xa00] sm:$0xff] }
 0x2ec   :  { %7257 = vmatpush1.bf16.msra.mxu1 %v9136_v42  ;;  %7094 = vmatprep.subr.bf16.mxu0 %v9143_v43  ;;  %v4189_v42 = vld [vmem:[#allocation8 + $0x880] sm:$0xff] }
 0x2ed   :  { %7258 = vmatprep.subr.bf16.mxu1 %v9145_v44  ;;  %v4193_v43 = vld [vmem:[#allocation8 + $0x8a0] sm:$0xff]  ;;  %v4190_v44 = vld [vmem:[#allocation8 + $0x888] sm:$0xff] }
 0x2ee   :  { %v9199_v47 = vcombine.high %v4189_v42, %v4193_v43  ;;  %v9198_v53 = vcombine.low %v4189_v42, %v4193_v43  ;;  %v9200_v56 = vcombine.low %v4190_v44, %v4194_v45  ;;  %v4241_v25 = vld [vmem:[#allocation8 + $0xa20] sm:$0xff] }
 0x2ef   :  { %7095 = vmatpush1.bf16.msra.mxu0 %v9142_v48  ;;  %v9201_v48 = vcombine.high %v4190_v44, %v4194_v45  ;;  %v9247_v42 = vcombine.high %v4237_v37, %v4241_v25  ;;  %v4245_v44 = vld [vmem:[#allocation8 + $0xa40] sm:$0xff] }
 0x2f0   :  { %7259 = vmatpush1.bf16.msra.mxu1 %v9144_v50  ;;  %7096 = vmatprep.subr.bf16.mxu0 %v9151_v46  ;;  %v4197_v50 = vld [vmem:[#allocation8 + $0x8c0] sm:$0xff] }
 0x2f1   :  { %7260 = vmatprep.subr.bf16.mxu1 %v9153_v51  ;;  %v4201_v46 = vld [vmem:[#allocation8 + $0x8e0] sm:$0xff]  ;;  %v4198_v51 = vld [vmem:[#allocation8 + $0x8c8] sm:$0xff] }
 0x2f2   :  { %v9207_v58 = vcombine.high %v4197_v50, %v4201_v46  ;;  %v9206_v4 = vcombine.low %v4197_v50, %v4201_v46  ;;  %v9208_v0 = vcombine.low %v4198_v51, %v4202_v52  ;;  %v4249_v45 = vld [vmem:[#allocation8 + $0xa60] sm:$0xff] }
 0x2f3   :  { %7097 = vmatpush1.bf16.msra.mxu0 %v9150_v59  ;;  %v9209_v59 = vcombine.high %v4198_v51, %v4202_v52  ;;  %v9255_v50 = vcombine.high %v4245_v44, %v4249_v45  ;;  %v4253_v51 = vld [vmem:[#allocation8 + $0xa80] sm:$0xff] }
 0x2f4   :  { %7261 = vmatpush1.bf16.msra.mxu1 %v9152_v61  ;;  %7098 = vmatprep.subr.bf16.mxu0 %v9159_v62  ;;  %v4205_v61 = vld [vmem:[#allocation8 + $0x900] sm:$0xff] }
 0x2f5   :  { %7262 = vmatprep.subr.bf16.mxu1 %v9161_v63  ;;  %v4209_v62 = vld [vmem:[#allocation8 + $0x920] sm:$0xff]  ;;  %v4206_v63 = vld [vmem:[#allocation8 + $0x908] sm:$0xff] }
 0x2f6   :  { %v9215_v2 = vcombine.high %v4205_v61, %v4209_v62  ;;  %v9214_v11 = vcombine.low %v4205_v61, %v4209_v62  ;;  %v9216_v14 = vcombine.low %v4206_v63, %v4210_v54  ;;  %v4257_v52 = vld [vmem:[#allocation8 + $0xaa0] sm:$0xff] }
 0x2f7   :  { %7099 = vmatpush1.bf16.msra.mxu0 %v9158_v3  ;;  %v9217_v3 = vcombine.high %v4206_v63, %v4210_v54  ;;  %v9263_v61 = vcombine.high %v4253_v51, %v4257_v52  ;;  %v4261_v63 = vld [vmem:[#allocation8 + $0xac0] sm:$0xff] }
 0x2f8   :  { %7263 = vmatpush1.bf16.msra.mxu1 %v9160_v6  ;;  %7100 = vmatprep.subr.bf16.mxu0 %v9167_v7  ;;  %v4217_v6 = vld [vmem:[#allocation8 + $0x960] sm:$0xff]  ;;  %v4214_v7 = vld [vmem:[#allocation8 + $0x948] sm:$0xff] }
 0x2f9   :  { %7264 = vmatprep.subr.bf16.mxu1 %v9169_v13  ;;  %v4218_v13 = vld [vmem:[#allocation8 + $0x968] sm:$0xff]  ;;  %v9223_v16 = vcombine.high %v4213_v5, %v4217_v6  ;;  %v4265_v54 = vld [vmem:[#allocation8 + $0xae0] sm:$0xff] }
 0x2fa   :  { %v9225_v19 = vcombine.high %v4214_v7, %v4218_v13  ;;  %v9224_v24 = vcombine.low %v4214_v7, %v4218_v13  ;;  %v4269_v7 = vld [vmem:[#allocation8 + $0xb00] sm:$0xff] }
 0x2fb   :  { %7101 = vmatpush1.bf16.msra.mxu0 %v9166_v20  ;;  %v4221_v20 = vld [vmem:[#allocation8 + $0x980] sm:$0xff] }
 0x2fc   :  { %7265 = vmatpush1.bf16.msra.mxu1 %v9168_v57  ;;  %7102 = vmatprep.subr.bf16.mxu0 %v9175_v22  ;;  %v4222_v57 = vld [vmem:[#allocation8 + $0x988] sm:$0xff]  ;;  %v9231_v26 = vcombine.high %v4221_v20, %v4225_v21  ;;  %v4273_v13 = vld [vmem:[#allocation8 + $0xb20] sm:$0xff] }
 0x2fd   :  { %7266 = vmatprep.subr.bf16.mxu1 %v9177_v18  ;;  %v4226_v22 = vld [vmem:[#allocation8 + $0x9a8] sm:$0xff]  ;;  %v9222_v18 = vcombine.low %v4213_v5, %v4217_v6  ;;  %v9271_v5 = vcombine.high %v4261_v63, %v4265_v54 }
 0x2fe   :  { %v9233_v12 = vcombine.high %v4222_v57, %v4226_v22 }
 0x2ff   :  { %7103 = vmatpush1.bf16.msra.mxu0 %v9174_v28  ;;  %v4233_v28 = vld [vmem:[#allocation8 + $0x9e0] sm:$0xff] }
 0x300   :  { %7267 = vmatpush1.bf16.msra.mxu1 %v9176_v30  ;;  %7113 = vmatprep.subr.bf16.mxu0 %v9183_v32  ;;  %v4234_v30 = vld [vmem:[#allocation8 + $0x9e8] sm:$0xff]  ;;  %v9230_v32 = vcombine.low %v4221_v20, %v4225_v21  ;;  %v9239_v8 = vcombine.high %v4229_v27, %v4233_v28  ;;  %v9279_v20 = vcombine.high %v4269_v7, %v4273_v13 }
 0x301   :  { %7277 = vmatprep.subr.bf16.mxu1 %v9185_v33  ;;  %v9232_v33 = vcombine.low %v4222_v57, %v4226_v22  ;;  %v9241_v35 = vcombine.high %v4230_v29, %v4234_v30  ;;  %v4277_v57 = vld [vmem:[#allocation8 + $0xb40] sm:$0xff] }
 0x302   :  { %7105 = vmatmul.mubr.bf16.vlgmr.msra.gmra.mrb[8].mxu0 %v10199_v39  ;;  %v4281_v22 = vld [vmem:[#allocation8 + $0xb60] sm:$0xff] }
 0x303   :  { %7269 = vmatmul.mubr.bf16.vlgmr.msra.gmra.mrb[8].mxu1 %v10199_v39  ;;  %7114 = vmatpush1.bf16.msra.mxu0 %v9182_v38  ;;  %v4238_v38 = vld [vmem:[#allocation8 + $0xa08] sm:$0xff] }
 0x304   :  { %7278 = vmatpush1.bf16.msra.mxu1 %v9184_v40  ;;  %7115 = vmatprep.subr.bf16.mxu0 %v9191_v41  ;;  %v4242_v40 = vld [vmem:[#allocation8 + $0xa28] sm:$0xff]  ;;  %v9238_v41 = vcombine.low %v4229_v27, %v4233_v28  ;;  %v9287_v27 = vcombine.high %v4277_v57, %v4281_v22 }
 0x305   :  { %7279 = vmatprep.subr.bf16.mxu1 %v9193_v36  ;;  %v9240_v36 = vcombine.low %v4230_v29, %v4234_v30  ;;  %v9249_v43 = vcombine.high %v4238_v38, %v4242_v40  ;;  %v4285_v29 = vld [vmem:[#allocation8 + $0xb80] sm:$0xff] }
 0x306   :  { %v4289_v30 = vld [vmem:[#allocation8 + $0xba0] sm:$0xff] }
 0x307   :  { %7116 = vmatpush1.bf16.msra.mxu0 %v9190_v9  ;;  %v4246_v9 = vld [vmem:[#allocation8 + $0xa48] sm:$0xff] }
 0x308   :  { %7280 = vmatpush1.bf16.msra.mxu1 %v9192_v34  ;;  %7117 = vmatprep.subr.bf16.mxu0 %v9199_v47  ;;  %v4250_v34 = vld [vmem:[#allocation8 + $0xa68] sm:$0xff]  ;;  %v9246_v47 = vcombine.low %v4237_v37, %v4241_v25  ;;  %v9295_v37 = vcombine.high %v4285_v29, %v4289_v30 }
 0x309   :  { %7281 = vmatprep.subr.bf16.mxu1 %v9201_v48  ;;  %v9248_v48 = vcombine.low %v4238_v38, %v4242_v40  ;;  %v9257_v46 = vcombine.high %v4246_v9, %v4250_v34  ;;  %v4293_v38 = vld [vmem:[#allocation8 + $0xbc0] sm:$0xff] }
 0x30a   :  { %v4297_v40 = vld [vmem:[#allocation8 + $0xbe0] sm:$0xff] }
 0x30b   :  { %7118 = vmatpush1.bf16.msra.mxu0 %v9198_v53  ;;  %v4254_v53 = vld [vmem:[#allocation8 + $0xa88] sm:$0xff] }
 0x30c   :  { %7282 = vmatpush1.bf16.msra.mxu1 %v9200_v56  ;;  %7119 = vmatprep.subr.bf16.mxu0 %v9207_v58  ;;  %v4258_v56 = vld [vmem:[#allocation8 + $0xaa8] sm:$0xff]  ;;  %v9254_v58 = vcombine.low %v4245_v44, %v4249_v45  ;;  %v9303_v44 = vcombine.high %v4293_v38, %v4297_v40 }
 0x30d   :  { %7283 = vmatprep.subr.bf16.mxu1 %v9209_v59  ;;  %v9256_v59 = vcombine.low %v4246_v9, %v4250_v34  ;;  %v9265_v62 = vcombine.high %v4254_v53, %v4258_v56  ;;  %v4301_v9 = vld [vmem:[#allocation8 + $0xc00] sm:$0xff] }
 0x30e   :  { %v4305_v34 = vld [vmem:[#allocation8 + $0xc20] sm:$0xff] }
 0x30f   :  { %7120 = vmatpush1.bf16.msra.mxu0 %v9206_v4  ;;  %v4262_v4 = vld [vmem:[#allocation8 + $0xac8] sm:$0xff] }
 0x310   :  { %7284 = vmatpush1.bf16.msra.mxu1 %v9208_v0  ;;  %7121 = vmatprep.subr.bf16.mxu0 %v9215_v2  ;;  %v4266_v0 = vld [vmem:[#allocation8 + $0xae8] sm:$0xff]  ;;  %v9262_v2 = vcombine.low %v4253_v51, %v4257_v52  ;;  %v9311_v51 = vcombine.high %v4301_v9, %v4305_v34 }
 0x311   :  { %7285 = vmatprep.subr.bf16.mxu1 %v9217_v3  ;;  %v9264_v3 = vcombine.low %v4254_v53, %v4258_v56  ;;  %v9273_v6 = vcombine.high %v4262_v4, %v4266_v0  ;;  %v663_v53 = vsub.s32 4, %v10161_v1  ;;  %v667_v56 = vsub.s32 5, %v10161_v1 }
 0x313   :  { %7122 = vmatpush1.bf16.msra.mxu0 %v9214_v11  ;;  %v4270_v11 = vld [vmem:[#allocation8 + $0xb08] sm:$0xff] }
 0x314   :  { %7286 = vmatpush1.bf16.msra.mxu1 %v9216_v14  ;;  %7123 = vmatprep.subr.bf16.mxu0 %v9223_v16  ;;  %v4274_v14 = vld [vmem:[#allocation8 + $0xb28] sm:$0xff]  ;;  %v9270_v16 = vcombine.low %v4261_v63, %v4265_v54 }
 0x315   :  { %7287 = vmatprep.subr.bf16.mxu1 %v9225_v19  ;;  %v9272_v19 = vcombine.low %v4262_v4, %v4266_v0  ;;  %v9281_v21 = vcombine.high %v4270_v11, %v4274_v14 }
 0x317   :  { %7124 = vmatpush1.bf16.msra.mxu0 %v9222_v18  ;;  %v4278_v18 = vld [vmem:[#allocation8 + $0xb48] sm:$0xff] }
 0x318   :  { %7288 = vmatpush1.bf16.msra.mxu1 %v9224_v24  ;;  %7125 = vmatprep.subr.bf16.mxu0 %v9231_v26  ;;  %v4282_v24 = vld [vmem:[#allocation8 + $0xb68] sm:$0xff]  ;;  %v9278_v26 = vcombine.low %v4269_v7, %v4273_v13 }
 0x319   :  { %7289 = vmatprep.subr.bf16.mxu1 %v9233_v12  ;;  %v9280_v12 = vcombine.low %v4270_v11, %v4274_v14  ;;  %v9289_v28 = vcombine.high %v4278_v18, %v4282_v24 }
 0x31b   :  { %7126 = vmatpush1.bf16.msra.mxu0 %v9230_v32  ;;  %v4286_v32 = vld [vmem:[#allocation8 + $0xb88] sm:$0xff] }
 0x31c   :  { %7290 = vmatpush1.bf16.msra.mxu1 %v9232_v33  ;;  %7127 = vmatprep.subr.bf16.mxu0 %v9239_v8  ;;  %v4290_v33 = vld [vmem:[#allocation8 + $0xba8] sm:$0xff]  ;;  %v9286_v8 = vcombine.low %v4277_v57, %v4281_v22  ;;  %v4313_v57 = vld [vmem:[#allocation8 + $0xc60] sm:$0xff] }
 0x31d   :  { %7291 = vmatprep.subr.bf16.mxu1 %v9241_v35  ;;  %v9288_v35 = vcombine.low %v4278_v18, %v4282_v24  ;;  %v9297_v25 = vcombine.high %v4286_v32, %v4290_v33  ;;  %v4310_v22 = vld [vmem:[#allocation8 + $0xc48] sm:$0xff] }
 0x31e   :  { %v4314_v18 = vld [vmem:[#allocation8 + $0xc68] sm:$0xff] }
 0x31f   :  { %7128 = vmatpush1.bf16.msra.mxu0 %v9238_v41  ;;  %v4294_v41 = vld [vmem:[#allocation8 + $0xbc8] sm:$0xff] }
 0x320   :  { %7292 = vmatpush1.bf16.msra.mxu1 %v9240_v36  ;;  %7129 = vmatprep.subr.bf16.mxu0 %v9247_v42  ;;  %v4298_v36 = vld [vmem:[#allocation8 + $0xbe8] sm:$0xff]  ;;  %v9294_v42 = vcombine.low %v4285_v29, %v4289_v30  ;;  %v9321_v30 = vcombine.high %v4310_v22, %v4314_v18 }
 0x321   :  { %7293 = vmatprep.subr.bf16.mxu1 %v9249_v43  ;;  %v9296_v43 = vcombine.low %v4286_v32, %v4290_v33  ;;  %v9305_v45 = vcombine.high %v4294_v41, %v4298_v36  ;;  %v4321_v32 = vld [vmem:[#allocation8 + $0xca0] sm:$0xff]  ;;  %v4318_v33 = vld [vmem:[#allocation8 + $0xc88] sm:$0xff] }
 0x323   :  { %7130 = vmatpush1.bf16.msra.mxu0 %v9246_v47  ;;  %v4302_v47 = vld [vmem:[#allocation8 + $0xc08] sm:$0xff] }
 0x324   :  { %7294 = vmatpush1.bf16.msra.mxu1 %v9248_v48  ;;  %7131 = vmatprep.subr.bf16.mxu0 %v9255_v50  ;;  %v4306_v48 = vld [vmem:[#allocation8 + $0xc28] sm:$0xff]  ;;  %v9302_v50 = vcombine.low %v4293_v38, %v4297_v40 }
 0x325   :  { %7295 = vmatprep.subr.bf16.mxu1 %v9257_v46  ;;  %v9304_v46 = vcombine.low %v4294_v41, %v4298_v36  ;;  %v9313_v52 = vcombine.high %v4302_v47, %v4306_v48  ;;  %v4325_v41 = vld [vmem:[#allocation8 + $0xcc0] sm:$0xff] }
 0x326   :  { %v4329_v36 = vld [vmem:[#allocation8 + $0xce0] sm:$0xff] }
 0x327   :  { %7132 = vmatpush1.bf16.msra.mxu0 %v9254_v58  ;;  %v675_v58 = vsub.s32 7, %v10161_v1 }
 0x328   :  { %7296 = vmatpush1.bf16.msra.mxu1 %v9256_v59  ;;  %7133 = vmatprep.subr.bf16.mxu0 %v9263_v61  ;;  %v10206_v59 = vld [vmem:[#allocation7] sm:$0xff] }
 0x329   :  { %7297 = vmatprep.subr.bf16.mxu1 %v9265_v62  ;;  %v664_v61 = vrot.slane %v10206_v59, %v663_v53  ;;  %v668_v62 = vrot.slane %v10206_v59, %v667_v56  ;;  %v676_v63 = vrot.slane %v10206_v59, %v675_v58 }
 0x32b   :  { %7134 = vmatpush1.bf16.msra.mxu0 %v9262_v2 }
 0x32c   :  { %7298 = vmatpush1.bf16.msra.mxu1 %v9264_v3  ;;  %7135 = vmatprep.subr.bf16.mxu0 %v9271_v5 }
 0x32d   :  { %7299 = vmatprep.subr.bf16.mxu1 %v9273_v6 }
 0x32f   :  { %7136 = vmatpush1.bf16.msra.mxu0 %v9270_v16 }
 0x330   :  { %7300 = vmatpush1.bf16.msra.mxu1 %v9272_v19  ;;  %7137 = vmatprep.subr.bf16.mxu0 %v9279_v20  ;;  %v4309_v20 = vld [vmem:[#allocation8 + $0xc40] sm:$0xff] }
 0x331   :  { %7301 = vmatprep.subr.bf16.mxu1 %v9281_v21  ;;  %v9319_v29 = vcombine.high %v4309_v20, %v4313_v57 }
 0x333   :  { %7138 = vmatpush1.bf16.msra.mxu0 %v9278_v26  ;;  %v9310_v26 = vcombine.low %v4301_v9, %v4305_v34  ;;  %v9335_v9 = vcombine.high %v4325_v41, %v4329_v36 }
 0x334   :  { %7302 = vmatpush1.bf16.msra.mxu1 %v9280_v12  ;;  %7139 = vmatprep.subr.bf16.mxu0 %v9287_v27  ;;  %v9312_v12 = vcombine.low %v4302_v47, %v4306_v48  ;;  %v4333_v47 = vld [vmem:[#allocation8 + $0xd00] sm:$0xff] }
 0x335   :  { %7303 = vmatprep.subr.bf16.mxu1 %v9289_v28  ;;  %v4317_v28 = vld [vmem:[#allocation8 + $0xc80] sm:$0xff] }
 0x336   :  { %v9327_v38 = vcombine.high %v4317_v28, %v4321_v32  ;;  %v4337_v48 = vld [vmem:[#allocation8 + $0xd20] sm:$0xff] }
 0x337   :  { %7140 = vmatpush1.bf16.msra.mxu0 %v9286_v8  ;;  %v4322_v8 = vld [vmem:[#allocation8 + $0xca8] sm:$0xff] }
 0x338   :  { %7304 = vmatpush1.bf16.msra.mxu1 %v9288_v35  ;;  %7141 = vmatprep.subr.bf16.mxu0 %v9295_v37  ;;  %v9318_v37 = vcombine.low %v4309_v20, %v4313_v57  ;;  %v9329_v40 = vcombine.high %v4318_v33, %v4322_v8 }
 0x339   :  { %7305 = vmatprep.subr.bf16.mxu1 %v9297_v25  ;;  %v9320_v25 = vcombine.low %v4310_v22, %v4314_v18  ;;  %v4357_v22 = vld [vmem:[#allocation8 + $0xdc0] sm:$0xff] }
 0x33a   :  { %v4361_v18 = vld [vmem:[#allocation8 + $0xde0] sm:$0xff] }
 0x33b   :  { %7142 = vmatpush1.bf16.msra.mxu0 %v9294_v42  ;;  %v4326_v42 = vld [vmem:[#allocation8 + $0xcc8] sm:$0xff] }
 0x33c   :  { %7306 = vmatpush1.bf16.msra.mxu1 %v9296_v43  ;;  %7143 = vmatprep.subr.bf16.mxu0 %v9303_v44  ;;  %v4330_v43 = vld [vmem:[#allocation8 + $0xce8] sm:$0xff]  ;;  %v9326_v44 = vcombine.low %v4317_v28, %v4321_v32 }
 0x33d   :  { %7307 = vmatprep.subr.bf16.mxu1 %v9305_v45  ;;  %v9328_v45 = vcombine.low %v4318_v33, %v4322_v8  ;;  %v9337_v34 = vcombine.high %v4326_v42, %v4330_v43  ;;  %v4365_v33 = vld [vmem:[#allocation8 + $0xe00] sm:$0xff] }
 0x33e   :  { %v4369_v8 = vld [vmem:[#allocation8 + $0xe20] sm:$0xff] }
 0x33f   :  { %7144 = vmatpush1.bf16.msra.mxu0 %v9302_v50  ;;  %v4334_v50 = vld [vmem:[#allocation8 + $0xd08] sm:$0xff] }
 0x340   :  { %7308 = vmatpush1.bf16.msra.mxu1 %v9304_v46  ;;  %7154 = vmatprep.subr.bf16.mxu0 %v9311_v51  ;;  %v4338_v46 = vld [vmem:[#allocation8 + $0xd28] sm:$0xff]  ;;  %v9334_v51 = vcombine.low %v4325_v41, %v4329_v36  ;;  %v9375_v41 = vcombine.high %v4365_v33, %v4369_v8 }
 0x341   :  { %7318 = vmatprep.subr.bf16.mxu1 %v9313_v52  ;;  %v9336_v52 = vcombine.low %v4326_v42, %v4330_v43  ;;  %v4373_v42 = vld [vmem:[#allocation8 + $0xe40] sm:$0xff] }
 0x342   :  { %v4377_v43 = vld [vmem:[#allocation8 + $0xe60] sm:$0xff] }
 0x355   :  { %v3730_v54 = vpop.f32.mrb[4].mxu0  ;;  %v10217_v0 = vpop.f32.mrb[4].mxu1 }
 0x356   :  { %v9595_v4 = vadd.f32 %v3730_v54, %v664_v61  ;;  %v3732_v2 = vpop.f32.mrb[5].mxu0  ;;  %v3896_v5 = vpop.f32.mrb[5].mxu1  ;;  %v9343_v61 = vcombine.high %v4333_v47, %v4337_v48  ;;  %v4345_v54 = vld [vmem:[#allocation8 + $0xd60] sm:$0xff] }
 0x357   :  { %v9596_v3 = vadd.f32 %v3732_v2, %v668_v62  ;;  %v3734_v6 = vpop.f32.mrb[6].mxu0  ;;  %v9598_v13 = vadd.f32 %v3896_v5, %v676_v63  ;;  %v3898_v11 = vpop.f32.mrb[6].mxu1  ;;  %v9345_v62 = vcombine.high %v4334_v50, %v4338_v46  ;;  %v4341_v63 = vld [vmem:[#allocation8 + $0xd40] sm:$0xff]  ;;  %v4346_v2 = vld [vmem:[#allocation8 + $0xd68] sm:$0xff]  ;;  %v9344_v5 = vcombine.low %v4334_v50, %v4338_v46 }
 0x358   :  { %v3905_v7 = vmax.f32 %v9595_v4, 0.0  ;;  %v3735_v14 = vpop.f32.mrb[7].mxu0  ;;  %v3899_v19 = vpop.f32.mrb[7].mxu1  ;;  %v4342_v4 = vld [vmem:[#allocation8 + $0xd48] sm:$0xff]  ;;  %v9351_v6 = vcombine.high %v4341_v63, %v4345_v54  ;;  %v4353_v11 = vld [vmem:[#allocation8 + $0xda0] sm:$0xff] }
 0x359   :  { %v3906_v16 = vmax.f32 %v9596_v3, 0.0  ;;  %v3908_v21 = vmax.f32 %v9598_v13, 0.0  ;;  %v9342_v3 = vcombine.low %v4333_v47, %v4337_v48  ;;  %v4349_v13 = vld [vmem:[#allocation8 + $0xd80] sm:$0xff]  ;;  %v4350_v14 = vld [vmem:[#allocation8 + $0xd88] sm:$0xff]  ;;  %v9350_v19 = vcombine.low %v4341_v63, %v4345_v54 }
 0x35a   :  { %v10221_v27 = vpack.c.bf16 %v3905_v7, %v3905_v7  ;;  %v9353_v7 = vcombine.high %v4342_v4, %v4346_v2  ;;  %v9352_v20 = vcombine.low %v4342_v4, %v4346_v2  ;;  %v9358_v28 = vcombine.low %v4349_v13, %v4353_v11  ;;  %v4381_v50 = vld [vmem:[#allocation8 + $0xe80] sm:$0xff] }
 0x35b   :  { %v10219_v24 = vpack.c.bf16 %v3906_v16, %v3906_v16  ;;  %v10225_v35 = vpack.c.bf16 %v3908_v21, %v3908_v21  ;;  %v4354_v16 = vld [vmem:[#allocation8 + $0xda8] sm:$0xff]  ;;  %v9359_v21 = vcombine.high %v4349_v13, %v4353_v11  ;;  %v9383_v47 = vcombine.high %v4373_v42, %v4377_v43  ;;  %v4385_v46 = vld [vmem:[#allocation8 + $0xea0] sm:$0xff] }
 0x35c   :  { %v9361_v57 = vcombine.high %v4350_v14, %v4354_v16  ;;  %v9391_v63 = vcombine.high %v4381_v50, %v4385_v46  ;;  %v4389_v4 = vld [vmem:[#allocation8 + $0xec0] sm:$0xff] }
 0x35d   :  { %7145 = vmatprep.mubr.bf16.mxu0 %v10219_v24  ;;  %7309 = vmatprep.mubr.bf16.mxu1 %v10219_v24  ;;  %v4393_v2 = vld [vmem:[#allocation8 + $0xee0] sm:$0xff] }
 0x35e   :  { %7146 = vmatmul.mubr.bf16.vlgmr.msra.gmra.mrb[8].mxu0 %v10221_v27  ;;  %7310 = vmatmul.mubr.bf16.vlgmr.msra.gmra.mrb[8].mxu1 %v10221_v27  ;;  %v9399_v13 = vcombine.high %v4389_v4, %v4393_v2 }
 0x35f   :  { %7155 = vmatpush1.bf16.msra.mxu0 %v9310_v26  ;;  %7319 = vmatpush1.bf16.msra.mxu1 %v9312_v12  ;;  %v4358_v26 = vld [vmem:[#allocation8 + $0xdc8] sm:$0xff] }
 0x360   :  { %7186 = vmatprep.mubr.bf16.mxu0 %v10225_v35  ;;  %7350 = vmatprep.mubr.bf16.mxu1 %v10225_v35  ;;  %v4362_v12 = vld [vmem:[#allocation8 + $0xde8] sm:$0xff] }
 0x361   :  { %7156 = vmatprep.subr.bf16.mxu0 %v9319_v29  ;;  %7320 = vmatprep.subr.bf16.mxu1 %v9321_v30  ;;  %v9360_v29 = vcombine.low %v4350_v14, %v4354_v16  ;;  %v9367_v30 = vcombine.high %v4357_v22, %v4361_v18  ;;  %v9369_v32 = vcombine.high %v4358_v26, %v4362_v12  ;;  %v4397_v14 = vld [vmem:[#allocation8 + $0xf00] sm:$0xff] }
 0x362   :  { %v4401_v16 = vld [vmem:[#allocation8 + $0xf20] sm:$0xff] }
 0x363   :  { %7157 = vmatpush1.bf16.msra.mxu0 %v9318_v37  ;;  %7321 = vmatpush1.bf16.msra.mxu1 %v9320_v25  ;;  %v4366_v37 = vld [vmem:[#allocation8 + $0xe08] sm:$0xff] }
 0x364   :  { %7158 = vmatprep.subr.bf16.mxu0 %v9327_v38  ;;  %7322 = vmatprep.subr.bf16.mxu1 %v9329_v40  ;;  %v4370_v25 = vld [vmem:[#allocation8 + $0xe28] sm:$0xff]  ;;  %v9366_v38 = vcombine.low %v4357_v22, %v4361_v18  ;;  %v9368_v40 = vcombine.low %v4358_v26, %v4362_v12  ;;  %v9407_v22 = vcombine.high %v4397_v14, %v4401_v16  ;;  %v4405_v26 = vld [vmem:[#allocation8 + $0xf40] sm:$0xff] }
 0x365   :  { %v9377_v36 = vcombine.high %v4366_v37, %v4370_v25  ;;  %v4409_v12 = vld [vmem:[#allocation8 + $0xf60] sm:$0xff] }
 0x367   :  { %7159 = vmatpush1.bf16.msra.mxu0 %v9326_v44  ;;  %7323 = vmatpush1.bf16.msra.mxu1 %v9328_v45  ;;  %v4374_v44 = vld [vmem:[#allocation8 + $0xe48] sm:$0xff] }
 0x368   :  { %7160 = vmatprep.subr.bf16.mxu0 %v9335_v9  ;;  %7324 = vmatprep.subr.bf16.mxu1 %v9337_v34  ;;  %v4378_v45 = vld [vmem:[#allocation8 + $0xe68] sm:$0xff]  ;;  %v9374_v9 = vcombine.low %v4365_v33, %v4369_v8  ;;  %v9376_v34 = vcombine.low %v4366_v37, %v4370_v25  ;;  %v671_v33 = vsub.s32 6, %v10161_v1  ;;  %v9415_v8 = vcombine.high %v4405_v26, %v4409_v12  ;;  %v4413_v25 = vld [vmem:[#allocation8 + $0xf80] sm:$0xff] }
 0x369   :  { %v9385_v48 = vcombine.high %v4374_v44, %v4378_v45 }
 0x36b   :  { %7161 = vmatpush1.bf16.msra.mxu0 %v9334_v51  ;;  %7325 = vmatpush1.bf16.msra.mxu1 %v9336_v52  ;;  %v4382_v51 = vld [vmem:[#allocation8 + $0xe88] sm:$0xff] }
 0x36c   :  { %7162 = vmatprep.subr.bf16.mxu0 %v9343_v61  ;;  %7326 = vmatprep.subr.bf16.mxu1 %v9345_v62  ;;  %v4386_v52 = vld [vmem:[#allocation8 + $0xea8] sm:$0xff]  ;;  %v9382_v61 = vcombine.low %v4373_v42, %v4377_v43  ;;  %v9384_v62 = vcombine.low %v4374_v44, %v4378_v45  ;;  %v672_v43 = vrot.slane %v10206_v59, %v671_v33  ;;  %v3923_v59 = vld [vmem:[#allocation8 + $0x30] sm:$0xff] }
 0x36d   :  { %v9393_v54 = vcombine.high %v4382_v51, %v4386_v52 }
 0x36f   :  { %7163 = vmatpush1.bf16.msra.mxu0 %v9342_v3  ;;  %7327 = vmatpush1.bf16.msra.mxu1 %v9344_v5  ;;  %v4390_v3 = vld [vmem:[#allocation8 + $0xec8] sm:$0xff] }
 0x370   :  { %7164 = vmatprep.subr.bf16.mxu0 %v9351_v6  ;;  %7328 = vmatprep.subr.bf16.mxu1 %v9353_v7  ;;  %v4394_v5 = vld [vmem:[#allocation8 + $0xee8] sm:$0xff]  ;;  %v9390_v6 = vcombine.low %v4381_v50, %v4385_v46  ;;  %v9392_v7 = vcombine.low %v4382_v51, %v4386_v52  ;;  %v9597_v51 = vadd.f32 %v10217_v0, %v672_v43  ;;  %v3928_v0 = vld [vmem:[#allocation8 + $0x58] sm:$0xff]  ;;  %v3955_v43 = vld [vmem:[#allocation8 + $0x130] sm:$0xff] }
 0x371   :  { %v9401_v11 = vcombine.high %v4390_v3, %v4394_v5 }
 0x373   :  { %7165 = vmatpush1.bf16.msra.mxu0 %v9350_v19  ;;  %7329 = vmatpush1.bf16.msra.mxu1 %v9352_v20  ;;  %v4398_v19 = vld [vmem:[#allocation8 + $0xf08] sm:$0xff] }
 0x374   :  { %7166 = vmatprep.subr.bf16.mxu0 %v9359_v21  ;;  %7330 = vmatprep.subr.bf16.mxu1 %v9361_v57  ;;  %v4402_v20 = vld [vmem:[#allocation8 + $0xf28] sm:$0xff]  ;;  %v9398_v21 = vcombine.low %v4389_v4, %v4393_v2  ;;  %v9400_v57 = vcombine.low %v4390_v3, %v4394_v5  ;;  %v3907_v3 = vmax.f32 %v9597_v51, 0.0  ;;  %v3964_v51 = vld [vmem:[#allocation8 + $0x178] sm:$0xff] }
 0x375   :  { %v9409_v18 = vcombine.high %v4398_v19, %v4402_v20 }
 0x377   :  { %7167 = vmatpush1.bf16.msra.mxu0 %v9358_v28  ;;  %7331 = vmatpush1.bf16.msra.mxu1 %v9360_v29  ;;  %v4406_v28 = vld [vmem:[#allocation8 + $0xf48] sm:$0xff] }
 0x378   :  { %7168 = vmatprep.subr.bf16.mxu0 %v9367_v30  ;;  %7332 = vmatprep.subr.bf16.mxu1 %v9369_v32  ;;  %v4410_v29 = vld [vmem:[#allocation8 + $0xf68] sm:$0xff]  ;;  %v9406_v30 = vcombine.low %v4397_v14, %v4401_v16  ;;  %v9408_v32 = vcombine.low %v4398_v19, %v4402_v20  ;;  %v10236_v16 = vpack.c.bf16 %v3907_v3, %v3907_v3 }
 0x379   :  { %v9417_v37 = vcombine.high %v4406_v28, %v4410_v29  ;;  %v9416_v42 = vcombine.low %v4406_v28, %v4410_v29 }
 0x37b   :  { %7169 = vmatpush1.bf16.msra.mxu0 %v9366_v38  ;;  %7333 = vmatpush1.bf16.msra.mxu1 %v9368_v40  ;;  %v4417_v38 = vld [vmem:[#allocation8 + $0xfa0] sm:$0xff]  ;;  %v4414_v40 = vld [vmem:[#allocation8 + $0xf88] sm:$0xff] }
 0x37c   :  { %7170 = vmatprep.subr.bf16.mxu0 %v9375_v41  ;;  %7334 = vmatprep.subr.bf16.mxu1 %v9377_v36  ;;  %v4418_v41 = vld [vmem:[#allocation8 + $0xfa8] sm:$0xff]  ;;  %v9414_v36 = vcombine.low %v4405_v26, %v4409_v12  ;;  %v9423_v44 = vcombine.high %v4413_v25, %v4417_v38  ;;  %v9422_v50 = vcombine.low %v4413_v25, %v4417_v38  ;;  %v3940_v26 = vld [vmem:[#allocation8 + $0xb8] sm:$0xff] }
 0x37d   :  { %v9425_v45 = vcombine.high %v4414_v40, %v4418_v41  ;;  %v9424_v46 = vcombine.low %v4414_v40, %v4418_v41  ;;  %v3948_v25 = vld [vmem:[#allocation8 + $0xf8] sm:$0xff] }
 0x37f   :  { %7171 = vmatpush1.bf16.msra.mxu0 %v9374_v9  ;;  %7335 = vmatpush1.bf16.msra.mxu1 %v9376_v34  ;;  %v4421_v9 = vld [vmem:[#allocation8 + $0xfc0] sm:$0xff] }
 0x380   :  { %7172 = vmatprep.subr.bf16.mxu0 %v9383_v47  ;;  %7336 = vmatprep.subr.bf16.mxu1 %v9385_v48  ;;  %v4425_v34 = vld [vmem:[#allocation8 + $0xfe0] sm:$0xff]  ;;  %v4422_v47 = vld [vmem:[#allocation8 + $0xfc8] sm:$0xff] }
 0x381   :  { %v4426_v48 = vld [vmem:[#allocation8 + $0xfe8] sm:$0xff]  ;;  %v9431_v52 = vcombine.high %v4421_v9, %v4425_v34  ;;  %v9430_v4 = vcombine.low %v4421_v9, %v4425_v34 }
 0x382   :  { %v9432_v2 = vcombine.low %v4422_v47, %v4426_v48 }
 0x383   :  { %7173 = vmatpush1.bf16.msra.mxu0 %v9382_v61  ;;  %7337 = vmatpush1.bf16.msra.mxu1 %v9384_v62  ;;  %v9433_v61 = vcombine.high %v4422_v47, %v4426_v48  ;;  %v3919_v62 = vld [vmem:[#allocation8 + $0x10] sm:$0xff] }
 0x384   :  { %7174 = vmatprep.subr.bf16.mxu0 %v9391_v63  ;;  %7338 = vmatprep.subr.bf16.mxu1 %v9393_v54  ;;  %v3920_v63 = vld [vmem:[#allocation8 + $0x18] sm:$0xff]  ;;  %v8931_v5 = vcombine.high %v3919_v62, %v3923_v59  ;;  %v8930_v14 = vcombine.low %v3919_v62, %v3923_v59  ;;  %v3959_v48 = vld [vmem:[#allocation8 + $0x150] sm:$0xff] }
 0x385   :  { %v3924_v54 = vld [vmem:[#allocation8 + $0x38] sm:$0xff] }
 0x386   :  { %v8932_v19 = vcombine.low %v3920_v63, %v3924_v54 }
 0x387   :  { %7175 = vmatpush1.bf16.msra.mxu0 %v9390_v6  ;;  %7339 = vmatpush1.bf16.msra.mxu1 %v9392_v7  ;;  %v8933_v6 = vcombine.high %v3920_v63, %v3924_v54  ;;  %v3927_v7 = vld [vmem:[#allocation8 + $0x50] sm:$0xff] }
 0x388   :  { %7176 = vmatprep.subr.bf16.mxu0 %v9399_v13  ;;  %7340 = vmatprep.subr.bf16.mxu1 %v9401_v11  ;;  %v3931_v13 = vld [vmem:[#allocation8 + $0x70] sm:$0xff]  ;;  %v3932_v11 = vld [vmem:[#allocation8 + $0x78] sm:$0xff] }
 0x389   :  { %v8939_v20 = vcombine.high %v3927_v7, %v3931_v13  ;;  %v8938_v12 = vcombine.low %v3927_v7, %v3931_v13  ;;  %v8940_v28 = vcombine.low %v3928_v0, %v3932_v11  ;;  %v3967_v63 = vld [vmem:[#allocation8 + $0x190] sm:$0xff] }
 0x38a   :  { %v3971_v54 = vld [vmem:[#allocation8 + $0x1b0] sm:$0xff] }
 0x38b   :  { %7177 = vmatpush1.bf16.msra.mxu0 %v9398_v21  ;;  %7341 = vmatpush1.bf16.msra.mxu1 %v9400_v57  ;;  %v8941_v21 = vcombine.high %v3928_v0, %v3932_v11  ;;  %v3935_v57 = vld [vmem:[#allocation8 + $0x90] sm:$0xff]  ;;  %v3976_v11 = vld [vmem:[#allocation8 + $0x1d8] sm:$0xff] }
 0x38c   :  { %7178 = vmatprep.subr.bf16.mxu0 %v9407_v22  ;;  %7342 = vmatprep.subr.bf16.mxu1 %v9409_v18  ;;  %v3939_v22 = vld [vmem:[#allocation8 + $0xb0] sm:$0xff]  ;;  %v3936_v18 = vld [vmem:[#allocation8 + $0x98] sm:$0xff] }
 0x38d   :  { %v8947_v29 = vcombine.high %v3935_v57, %v3939_v22  ;;  %v8946_v38 = vcombine.low %v3935_v57, %v3939_v22  ;;  %v8948_v40 = vcombine.low %v3936_v18, %v3940_v26  ;;  %v3975_v13 = vld [vmem:[#allocation8 + $0x1d0] sm:$0xff] }
 0x38e   :  { %v3979_v0 = vld [vmem:[#allocation8 + $0x1f0] sm:$0xff] }
 0x38f   :  { %7179 = vmatpush1.bf16.msra.mxu0 %v9406_v30  ;;  %7343 = vmatpush1.bf16.msra.mxu1 %v9408_v32  ;;  %v8949_v30 = vcombine.high %v3936_v18, %v3940_v26  ;;  %v3943_v32 = vld [vmem:[#allocation8 + $0xd0] sm:$0xff]  ;;  %v3984_v26 = vld [vmem:[#allocation8 + $0x218] sm:$0xff] }
 0x390   :  { %7180 = vmatprep.subr.bf16.mxu0 %v9415_v8  ;;  %7344 = vmatprep.subr.bf16.mxu1 %v9417_v37  ;;  %v3947_v8 = vld [vmem:[#allocation8 + $0xf0] sm:$0xff]  ;;  %v3944_v37 = vld [vmem:[#allocation8 + $0xd8] sm:$0xff] }
 0x391   :  { %v8955_v41 = vcombine.high %v3943_v32, %v3947_v8  ;;  %v8956_v9 = vcombine.low %v3944_v37, %v3948_v25  ;;  %v3983_v22 = vld [vmem:[#allocation8 + $0x210] sm:$0xff] }
 0x392   :  { %v3987_v18 = vld [vmem:[#allocation8 + $0x230] sm:$0xff] }
 0x393   :  { %7181 = vmatpush1.bf16.msra.mxu0 %v9414_v36  ;;  %7345 = vmatpush1.bf16.msra.mxu1 %v9416_v42  ;;  %v8957_v36 = vcombine.high %v3944_v37, %v3948_v25  ;;  %v3951_v42 = vld [vmem:[#allocation8 + $0x110] sm:$0xff]  ;;  %v3992_v25 = vld [vmem:[#allocation8 + $0x258] sm:$0xff] }
 0x394   :  { %7182 = vmatprep.subr.bf16.mxu0 %v9423_v44  ;;  %7346 = vmatprep.subr.bf16.mxu1 %v9425_v45  ;;  %v3956_v44 = vld [vmem:[#allocation8 + $0x138] sm:$0xff]  ;;  %v8954_v45 = vcombine.low %v3943_v32, %v3947_v8  ;;  %v8963_v34 = vcombine.high %v3951_v42, %v3955_v43  ;;  %v3991_v8 = vld [vmem:[#allocation8 + $0x250] sm:$0xff] }
 0x395   :  { %v3995_v37 = vld [vmem:[#allocation8 + $0x270] sm:$0xff] }
 0x397   :  { %7183 = vmatpush1.bf16.msra.mxu0 %v9422_v50  ;;  %7347 = vmatpush1.bf16.msra.mxu1 %v9424_v46  ;;  %v3963_v50 = vld [vmem:[#allocation8 + $0x170] sm:$0xff]  ;;  %v3960_v46 = vld [vmem:[#allocation8 + $0x158] sm:$0xff] }
 0x398   :  { %7184 = vmatprep.subr.bf16.mxu0 %v9431_v52  ;;  %7348 = vmatprep.subr.bf16.mxu1 %v9433_v61  ;;  %v8962_v52 = vcombine.low %v3951_v42, %v3955_v43  ;;  %v8971_v62 = vcombine.high %v3959_v48, %v3963_v50  ;;  %v8973_v59 = vcombine.high %v3960_v46, %v3964_v51  ;;  %v3999_v43 = vld [vmem:[#allocation8 + $0x290] sm:$0xff] }
 0x399   :  { %v8970_v3 = vcombine.low %v3959_v48, %v3963_v50  ;;  %v4007_v50 = vld [vmem:[#allocation8 + $0x2d0] sm:$0xff] }
 0x39b   :  { %7185 = vmatpush1.bf16.msra.mxu0 %v9430_v4  ;;  %7349 = vmatpush1.bf16.msra.mxu1 %v9432_v2  ;;  %v3968_v4 = vld [vmem:[#allocation8 + $0x198] sm:$0xff] }
 0x39c   :  { %7359 = vmatprep.subr.bf16.mxu0 %v8931_v5  ;;  %7523 = vmatprep.subr.bf16.mxu1 %v8933_v6  ;;  %v3972_v2 = vld [vmem:[#allocation8 + $0x1b8] sm:$0xff]  ;;  %v8972_v5 = vcombine.low %v3960_v46, %v3964_v51  ;;  %v8979_v6 = vcombine.high %v3967_v63, %v3971_v54  ;;  %v4011_v46 = vld [vmem:[#allocation8 + $0x2f0] sm:$0xff] }
 0x39d   :  { %v8981_v7 = vcombine.high %v3968_v4, %v3972_v2  ;;  %v4008_v51 = vld [vmem:[#allocation8 + $0x2d8] sm:$0xff] }
 0x39e   :  { %7187 = vmatmul.mubr.bf16.vlgmr.msra.gmra.mrb[8].mxu0 %v10236_v16  ;;  %7351 = vmatmul.mubr.bf16.vlgmr.msra.gmra.mrb[8].mxu1 %v10236_v16 }
 0x39f   :  { %7360 = vmatpush1.bf16.msra.mxu0 %v8930_v14  ;;  %7391 = vmatprep.mubr.bf16.mxu0 %v10170_v49  ;;  %v3980_v14 = vld [vmem:[#allocation8 + $0x1f8] sm:$0xff] }
 0x3a0   :  { %7524 = vmatpush1.bf16.msra.mxu1 %v8932_v19  ;;  %7555 = vmatprep.mubr.bf16.mxu1 %v10170_v49  ;;  %v3952_v49 = vld [vmem:[#allocation8 + $0x118] sm:$0xff]  ;;  %v8978_v19 = vcombine.low %v3967_v63, %v3971_v54  ;;  %v8989_v57 = vcombine.high %v3976_v11, %v3980_v14  ;;  %v4015_v54 = vld [vmem:[#allocation8 + $0x310] sm:$0xff] }
 0x3a1   :  { %7361 = vmatprep.subr.bf16.mxu0 %v8939_v20  ;;  %7525 = vmatprep.subr.bf16.mxu1 %v8941_v21  ;;  %v8965_v47 = vcombine.high %v3952_v49, %v3956_v44  ;;  %v8964_v61 = vcombine.low %v3952_v49, %v3956_v44  ;;  %v8980_v20 = vcombine.low %v3968_v4, %v3972_v2  ;;  %v4003_v49 = vld [vmem:[#allocation8 + $0x2b0] sm:$0xff]  ;;  %v4000_v44 = vld [vmem:[#allocation8 + $0x298] sm:$0xff] }
 0x3a2   :  { %v8987_v21 = vcombine.high %v3975_v13, %v3979_v0  ;;  %v4019_v4 = vld [vmem:[#allocation8 + $0x330] sm:$0xff]  ;;  %v4016_v2 = vld [vmem:[#allocation8 + $0x318] sm:$0xff] }
 0x3a3   :  { %7362 = vmatpush1.bf16.msra.mxu0 %v8938_v12  ;;  %v3988_v12 = vld [vmem:[#allocation8 + $0x238] sm:$0xff] }
 0x3a4   :  { %7526 = vmatpush1.bf16.msra.mxu1 %v8940_v28  ;;  %7363 = vmatprep.subr.bf16.mxu0 %v8947_v29  ;;  %v8986_v28 = vcombine.low %v3975_v13, %v3979_v0  ;;  %v8988_v29 = vcombine.low %v3976_v11, %v3980_v14  ;;  %v8997_v32 = vcombine.high %v3984_v26, %v3988_v12  ;;  %v4023_v0 = vld [vmem:[#allocation8 + $0x350] sm:$0xff]  ;;  %v4024_v14 = vld [vmem:[#allocation8 + $0x358] sm:$0xff] }
 0x3a5   :  { %7527 = vmatprep.subr.bf16.mxu1 %v8949_v30  ;;  %v8995_v30 = vcombine.high %v3983_v22, %v3987_v18  ;;  %v4027_v11 = vld [vmem:[#allocation8 + $0x370] sm:$0xff] }
 0x3a7   :  { %7364 = vmatpush1.bf16.msra.mxu0 %v8946_v38  ;;  %v3996_v38 = vld [vmem:[#allocation8 + $0x278] sm:$0xff] }
 0x3a8   :  { %7528 = vmatpush1.bf16.msra.mxu1 %v8948_v40  ;;  %7365 = vmatprep.subr.bf16.mxu0 %v8955_v41  ;;  %v8994_v40 = vcombine.low %v3983_v22, %v3987_v18  ;;  %v8996_v41 = vcombine.low %v3984_v26, %v3988_v12  ;;  %v9005_v42 = vcombine.high %v3992_v25, %v3996_v38  ;;  %v4031_v18 = vld [vmem:[#allocation8 + $0x390] sm:$0xff]  ;;  %v4032_v12 = vld [vmem:[#allocation8 + $0x398] sm:$0xff] }
 0x3a9   :  { %7529 = vmatprep.subr.bf16.mxu1 %v8957_v36  ;;  %v9003_v36 = vcombine.high %v3991_v8, %v3995_v37  ;;  %v4035_v26 = vld [vmem:[#allocation8 + $0x3b0] sm:$0xff] }
 0x3ab   :  { %7366 = vmatpush1.bf16.msra.mxu0 %v8954_v45  ;;  %v4004_v45 = vld [vmem:[#allocation8 + $0x2b8] sm:$0xff] }
 0x3ac   :  { %7530 = vmatpush1.bf16.msra.mxu1 %v8956_v9  ;;  %7367 = vmatprep.subr.bf16.mxu0 %v8963_v34  ;;  %v9002_v9 = vcombine.low %v3991_v8, %v3995_v37  ;;  %v9004_v34 = vcombine.low %v3992_v25, %v3996_v38  ;;  %v9013_v48 = vcombine.high %v4000_v44, %v4004_v45  ;;  %v4039_v37 = vld [vmem:[#allocation8 + $0x3d0] sm:$0xff]  ;;  %v4040_v38 = vld [vmem:[#allocation8 + $0x3d8] sm:$0xff] }
 0x3ad   :  { %7531 = vmatprep.subr.bf16.mxu1 %v8965_v47  ;;  %v9011_v47 = vcombine.high %v3999_v43, %v4003_v49  ;;  %v4043_v25 = vld [vmem:[#allocation8 + $0x3f0] sm:$0xff] }
 0x3af   :  { %7368 = vmatpush1.bf16.msra.mxu0 %v8962_v52  ;;  %v4012_v52 = vld [vmem:[#allocation8 + $0x2f8] sm:$0xff] }
 0x3b0   :  { %7532 = vmatpush1.bf16.msra.mxu1 %v8964_v61  ;;  %7369 = vmatprep.subr.bf16.mxu0 %v8971_v62  ;;  %v9010_v61 = vcombine.low %v3999_v43, %v4003_v49  ;;  %v9012_v62 = vcombine.low %v4000_v44, %v4004_v45  ;;  %v9021_v63 = vcombine.high %v4008_v51, %v4012_v52  ;;  %v4047_v49 = vld [vmem:[#allocation8 + $0x410] sm:$0xff]  ;;  %v4048_v45 = vld [vmem:[#allocation8 + $0x418] sm:$0xff] }
 0x3b1   :  { %7533 = vmatprep.subr.bf16.mxu1 %v8973_v59  ;;  %v9019_v59 = vcombine.high %v4007_v50, %v4011_v46  ;;  %v4051_v44 = vld [vmem:[#allocation8 + $0x430] sm:$0xff] }
 0x3b3   :  { %7370 = vmatpush1.bf16.msra.mxu0 %v8970_v3  ;;  %v4020_v3 = vld [vmem:[#allocation8 + $0x338] sm:$0xff] }
 0x3b4   :  { %7534 = vmatpush1.bf16.msra.mxu1 %v8972_v5  ;;  %7371 = vmatprep.subr.bf16.mxu0 %v8979_v6  ;;  %v9018_v5 = vcombine.low %v4007_v50, %v4011_v46  ;;  %v9020_v6 = vcombine.low %v4008_v51, %v4012_v52  ;;  %v9029_v13 = vcombine.high %v4016_v2, %v4020_v3  ;;  %v4055_v46 = vld [vmem:[#allocation8 + $0x450] sm:$0xff] }
 0x3b5   :  { %7535 = vmatprep.subr.bf16.mxu1 %v8981_v7  ;;  %v9027_v7 = vcombine.high %v4015_v54, %v4019_v4  ;;  %v4059_v51 = vld [vmem:[#allocation8 + $0x470] sm:$0xff]  ;;  %v9058_v52 = vcombine.low %v4047_v49, %v4051_v44 }
 0x3b7   :  { %7372 = vmatpush1.bf16.msra.mxu0 %v8978_v19  ;;  %v4028_v19 = vld [vmem:[#allocation8 + $0x378] sm:$0xff] }
 0x3b8   :  { %7536 = vmatpush1.bf16.msra.mxu1 %v8980_v20  ;;  %7373 = vmatprep.subr.bf16.mxu0 %v8987_v21  ;;  %v9026_v20 = vcombine.low %v4015_v54, %v4019_v4  ;;  %v9028_v21 = vcombine.low %v4016_v2, %v4020_v3  ;;  %v9037_v22 = vcombine.high %v4024_v14, %v4028_v19  ;;  %v4063_v54 = vld [vmem:[#allocation8 + $0x490] sm:$0xff]  ;;  %v4064_v3 = vld [vmem:[#allocation8 + $0x498] sm:$0xff] }
 0x3b9   :  { %7537 = vmatprep.subr.bf16.mxu1 %v8989_v57  ;;  %v9035_v57 = vcombine.high %v4023_v0, %v4027_v11  ;;  %v4067_v4 = vld [vmem:[#allocation8 + $0x4b0] sm:$0xff] }
 0x3bb   :  { %7374 = vmatpush1.bf16.msra.mxu0 %v8986_v28  ;;  %v4036_v28 = vld [vmem:[#allocation8 + $0x3b8] sm:$0xff] }
 0x3bc   :  { %7538 = vmatpush1.bf16.msra.mxu1 %v8988_v29  ;;  %7375 = vmatprep.subr.bf16.mxu0 %v8995_v30  ;;  %v9034_v29 = vcombine.low %v4023_v0, %v4027_v11  ;;  %v9036_v30 = vcombine.low %v4024_v14, %v4028_v19  ;;  %v9045_v8 = vcombine.high %v4032_v12, %v4036_v28  ;;  %v4071_v11 = vld [vmem:[#allocation8 + $0x4d0] sm:$0xff]  ;;  %v4072_v19 = vld [vmem:[#allocation8 + $0x4d8] sm:$0xff] }
 0x3bd   :  { %7539 = vmatprep.subr.bf16.mxu1 %v8997_v32  ;;  %v9043_v32 = vcombine.high %v4031_v18, %v4035_v26  ;;  %v4075_v14 = vld [vmem:[#allocation8 + $0x4f0] sm:$0xff] }
 0x3bf   :  { %7376 = vmatpush1.bf16.msra.mxu0 %v8994_v40  ;;  %v4044_v40 = vld [vmem:[#allocation8 + $0x3f8] sm:$0xff] }
 0x3c0   :  { %7540 = vmatpush1.bf16.msra.mxu1 %v8996_v41  ;;  %7377 = vmatprep.subr.bf16.mxu0 %v9003_v36  ;;  %v9042_v41 = vcombine.low %v4031_v18, %v4035_v26  ;;  %v9044_v36 = vcombine.low %v4032_v12, %v4036_v28  ;;  %v9053_v43 = vcombine.high %v4040_v38, %v4044_v40  ;;  %v4079_v18 = vld [vmem:[#allocation8 + $0x510] sm:$0xff]  ;;  %v4080_v12 = vld [vmem:[#allocation8 + $0x518] sm:$0xff] }
 0x3c1   :  { %7541 = vmatprep.subr.bf16.mxu1 %v9005_v42  ;;  %v9051_v42 = vcombine.high %v4039_v37, %v4043_v25  ;;  %v4083_v26 = vld [vmem:[#allocation8 + $0x530] sm:$0xff]  ;;  %v4084_v28 = vld [vmem:[#allocation8 + $0x538] sm:$0xff] }
 0x3c3   :  { %7378 = vmatpush1.bf16.msra.mxu0 %v9002_v9  ;;  %v4052_v9 = vld [vmem:[#allocation8 + $0x438] sm:$0xff] }
 0x3c4   :  { %7542 = vmatpush1.bf16.msra.mxu1 %v9004_v34  ;;  %7379 = vmatprep.subr.bf16.mxu0 %v9011_v47  ;;  %v9050_v34 = vcombine.low %v4039_v37, %v4043_v25  ;;  %v9052_v47 = vcombine.low %v4040_v38, %v4044_v40  ;;  %v9061_v50 = vcombine.high %v4048_v45, %v4052_v9  ;;  %v4091_v37 = vld [vmem:[#allocation8 + $0x570] sm:$0xff]  ;;  %v4088_v25 = vld [vmem:[#allocation8 + $0x558] sm:$0xff] }
 0x3c5   :  { %7543 = vmatprep.subr.bf16.mxu1 %v9013_v48  ;;  %v9059_v48 = vcombine.high %v4047_v49, %v4051_v44  ;;  %v4092_v38 = vld [vmem:[#allocation8 + $0x578] sm:$0xff]  ;;  %v9090_v40 = vcombine.low %v4079_v18, %v4083_v26  ;;  %v4099_v49 = vld [vmem:[#allocation8 + $0x5b0] sm:$0xff] }
 0x3c6   :  { %v4096_v44 = vld [vmem:[#allocation8 + $0x598] sm:$0xff] }
 0x3c7   :  { %7380 = vmatpush1.bf16.msra.mxu0 %v9010_v61  ;;  %v4056_v61 = vld [vmem:[#allocation8 + $0x458] sm:$0xff] }
 0x3c8   :  { %7544 = vmatpush1.bf16.msra.mxu1 %v9012_v62  ;;  %7381 = vmatprep.subr.bf16.mxu0 %v9019_v59  ;;  %v4060_v62 = vld [vmem:[#allocation8 + $0x478] sm:$0xff]  ;;  %v9060_v59 = vcombine.low %v4048_v45, %v4052_v9 }
 0x3c9   :  { %7545 = vmatprep.subr.bf16.mxu1 %v9021_v63  ;;  %v9067_v63 = vcombine.high %v4055_v46, %v4059_v51  ;;  %v9069_v2 = vcombine.high %v4056_v61, %v4060_v62  ;;  %v4100_v45 = vld [vmem:[#allocation8 + $0x5b8] sm:$0xff] }
 0x3cb   :  { %7382 = vmatpush1.bf16.msra.mxu0 %v9018_v5  ;;  %v4068_v5 = vld [vmem:[#allocation8 + $0x4b8] sm:$0xff] }
 0x3cc   :  { %7546 = vmatpush1.bf16.msra.mxu1 %v9020_v6  ;;  %7383 = vmatprep.subr.bf16.mxu0 %v9027_v7  ;;  %v9066_v6 = vcombine.low %v4055_v46, %v4059_v51  ;;  %v9068_v7 = vcombine.low %v4056_v61, %v4060_v62  ;;  %v9077_v0 = vcombine.high %v4064_v3, %v4068_v5  ;;  %v4107_v46 = vld [vmem:[#allocation8 + $0x5f0] sm:$0xff]  ;;  %v4104_v51 = vld [vmem:[#allocation8 + $0x5d8] sm:$0xff] }
 0x3cd   :  { %7547 = vmatprep.subr.bf16.mxu1 %v9029_v13  ;;  %v9075_v13 = vcombine.high %v4063_v54, %v4067_v4  ;;  %v9108_v62 = vcombine.low %v4096_v44, %v4100_v45 }
 0x3cf   :  { %7384 = vmatpush1.bf16.msra.mxu0 %v9026_v20  ;;  %v4076_v20 = vld [vmem:[#allocation8 + $0x4f8] sm:$0xff] }
 0x3d0   :  { %7548 = vmatpush1.bf16.msra.mxu1 %v9028_v21  ;;  %7385 = vmatprep.subr.bf16.mxu0 %v9035_v57  ;;  %v9074_v21 = vcombine.low %v4063_v54, %v4067_v4  ;;  %v9083_v57 = vcombine.high %v4071_v11, %v4075_v14  ;;  %v4111_v54 = vld [vmem:[#allocation8 + $0x610] sm:$0xff] }
 0x3d1   :  { %7549 = vmatprep.subr.bf16.mxu1 %v9037_v22  ;;  %v9085_v22 = vcombine.high %v4072_v19, %v4076_v20  ;;  %v4115_v4 = vld [vmem:[#allocation8 + $0x630] sm:$0xff] }
 0x3d3   :  { %7386 = vmatpush1.bf16.msra.mxu0 %v9034_v29  ;;  %v9084_v29 = vcombine.low %v4072_v19, %v4076_v20  ;;  %v4124_v19 = vld [vmem:[#allocation8 + $0x678] sm:$0xff]  ;;  %v9122_v20 = vcombine.low %v4111_v54, %v4115_v4 }
 0x3d4   :  { %7550 = vmatpush1.bf16.msra.mxu1 %v9036_v30  ;;  %7387 = vmatprep.subr.bf16.mxu0 %v9043_v32  ;;  %v9091_v30 = vcombine.high %v4079_v18, %v4083_v26  ;;  %v9093_v32 = vcombine.high %v4080_v12, %v4084_v28  ;;  %v4131_v18 = vld [vmem:[#allocation8 + $0x6b0] sm:$0xff]  ;;  %v4128_v26 = vld [vmem:[#allocation8 + $0x698] sm:$0xff] }
 0x3d5   :  { %7551 = vmatprep.subr.bf16.mxu1 %v9045_v8  ;;  %v4087_v8 = vld [vmem:[#allocation8 + $0x550] sm:$0xff] }
 0x3d6   :  { %v9098_v9 = vcombine.low %v4087_v8, %v4091_v37 }
 0x3d7   :  { %7388 = vmatpush1.bf16.msra.mxu0 %v9042_v41  ;;  %v9092_v41 = vcombine.low %v4080_v12, %v4084_v28  ;;  %v4132_v12 = vld [vmem:[#allocation8 + $0x6b8] sm:$0xff] }
 0x3d8   :  { %7552 = vmatpush1.bf16.msra.mxu1 %v9044_v36  ;;  %7389 = vmatprep.subr.bf16.mxu0 %v9051_v42  ;;  %v9099_v36 = vcombine.high %v4087_v8, %v4091_v37  ;;  %v9101_v42 = vcombine.high %v4088_v25, %v4092_v38  ;;  %v4139_v8 = vld [vmem:[#allocation8 + $0x6f0] sm:$0xff]  ;;  %v4136_v37 = vld [vmem:[#allocation8 + $0x6d8] sm:$0xff] }
 0x3d9   :  { %7553 = vmatprep.subr.bf16.mxu1 %v9053_v43  ;;  %v4095_v43 = vld [vmem:[#allocation8 + $0x590] sm:$0xff] }
 0x3da   :  { %v9106_v61 = vcombine.low %v4095_v43, %v4099_v49 }
 0x3db   :  { %7390 = vmatpush1.bf16.msra.mxu0 %v9050_v34  ;;  %v9100_v34 = vcombine.low %v4088_v25, %v4092_v38  ;;  %v4140_v25 = vld [vmem:[#allocation8 + $0x6f8] sm:$0xff] }
 0x3dc   :  { %7554 = vmatpush1.bf16.msra.mxu1 %v9052_v47  ;;  %7400 = vmatprep.subr.bf16.mxu0 %v9059_v48  ;;  %v9107_v47 = vcombine.high %v4095_v43, %v4099_v49  ;;  %v9109_v48 = vcombine.high %v4096_v44, %v4100_v45  ;;  %v4147_v43 = vld [vmem:[#allocation8 + $0x730] sm:$0xff]  ;;  %v4144_v49 = vld [vmem:[#allocation8 + $0x718] sm:$0xff] }
 0x3dd   :  { %7564 = vmatprep.subr.bf16.mxu1 %v9061_v50  ;;  %v4103_v50 = vld [vmem:[#allocation8 + $0x5d0] sm:$0xff]  ;;  %v4148_v44 = vld [vmem:[#allocation8 + $0x738] sm:$0xff] }
 0x3de   :  { %7392 = vmatmul.mubr.bf16.vlgmr.msra.gmra.mrb[12].mxu0 %v10186_v10 }
 0x3df   :  { %7556 = vmatmul.mubr.bf16.vlgmr.msra.gmra.mrb[12].mxu1 %v10186_v10  ;;  %7401 = vmatpush1.bf16.msra.mxu0 %v9058_v52  ;;  %v9076_v10 = vcombine.low %v4064_v3, %v4068_v5  ;;  %v4108_v52 = vld [vmem:[#allocation8 + $0x5f8] sm:$0xff]  ;;  %v9114_v5 = vcombine.low %v4103_v50, %v4107_v46 }
 0x3e0   :  { %7432 = vmatprep.mubr.bf16.mxu0 %v10188_v17  ;;  %7565 = vmatpush1.bf16.msra.mxu1 %v9060_v59  ;;  %v9115_v59 = vcombine.high %v4103_v50, %v4107_v46  ;;  %v4116_v3 = vld [vmem:[#allocation8 + $0x638] sm:$0xff]  ;;  %v4155_v50 = vld [vmem:[#allocation8 + $0x770] sm:$0xff] }
 0x3e1   :  { %7596 = vmatprep.mubr.bf16.mxu1 %v10188_v17  ;;  %7402 = vmatprep.subr.bf16.mxu0 %v9067_v63  ;;  %v9082_v17 = vcombine.low %v4071_v11, %v4075_v14  ;;  %v9117_v63 = vcombine.high %v4104_v51, %v4108_v52  ;;  %v4123_v11 = vld [vmem:[#allocation8 + $0x670] sm:$0xff]  ;;  %v4120_v14 = vld [vmem:[#allocation8 + $0x658] sm:$0xff] }
 0x3e2   :  { %7566 = vmatprep.subr.bf16.mxu1 %v9069_v2  ;;  %v4112_v2 = vld [vmem:[#allocation8 + $0x618] sm:$0xff] }
 0x3e3   :  { %7403 = vmatpush1.bf16.msra.mxu0 %v9066_v6  ;;  %v9116_v6 = vcombine.low %v4104_v51, %v4108_v52  ;;  %v4152_v46 = vld [vmem:[#allocation8 + $0x758] sm:$0xff] }
 0x3e4   :  { %7567 = vmatpush1.bf16.msra.mxu1 %v9068_v7  ;;  %7404 = vmatprep.subr.bf16.mxu0 %v9075_v13  ;;  %v9123_v7 = vcombine.high %v4111_v54, %v4115_v4  ;;  %v9125_v13 = vcombine.high %v4112_v2, %v4116_v3  ;;  %v4156_v51 = vld [vmem:[#allocation8 + $0x778] sm:$0xff]  ;;  %v4163_v54 = vld [vmem:[#allocation8 + $0x7b0] sm:$0xff] }
 0x3e5   :  { %7568 = vmatprep.subr.bf16.mxu1 %v9077_v0  ;;  %v4119_v0 = vld [vmem:[#allocation8 + $0x650] sm:$0xff]  ;;  %v4160_v4 = vld [vmem:[#allocation8 + $0x798] sm:$0xff] }
 0x3e6   :  { %v9130_v28 = vcombine.low %v4119_v0, %v4123_v11 }
 0x3e7   :  { %7405 = vmatpush1.bf16.msra.mxu0 %v9074_v21  ;;  %v9124_v21 = vcombine.low %v4112_v2, %v4116_v3  ;;  %v4164_v2 = vld [vmem:[#allocation8 + $0x7b8] sm:$0xff] }
 0x3e8   :  { %7569 = vmatpush1.bf16.msra.mxu1 %v9076_v10  ;;  %7406 = vmatprep.subr.bf16.mxu0 %v9083_v57  ;;  %v9131_v10 = vcombine.high %v4119_v0, %v4123_v11  ;;  %v9133_v57 = vcombine.high %v4120_v14, %v4124_v19  ;;  %v4171_v0 = vld [vmem:[#allocation8 + $0x7f0] sm:$0xff]  ;;  %v4168_v11 = vld [vmem:[#allocation8 + $0x7d8] sm:$0xff] }
 0x3e9   :  { %7570 = vmatprep.subr.bf16.mxu1 %v9085_v22  ;;  %v4127_v22 = vld [vmem:[#allocation8 + $0x690] sm:$0xff] }
 0x3ea   :  { %v9138_v38 = vcombine.low %v4127_v22, %v4131_v18 }
 0x3eb   :  { %7407 = vmatpush1.bf16.msra.mxu0 %v9082_v17  ;;  %v9132_v17 = vcombine.low %v4120_v14, %v4124_v19  ;;  %v4172_v14 = vld [vmem:[#allocation8 + $0x7f8] sm:$0xff] }
 0x3ec   :  { %7571 = vmatpush1.bf16.msra.mxu1 %v9084_v29  ;;  %7408 = vmatprep.subr.bf16.mxu0 %v9091_v30  ;;  %v9139_v29 = vcombine.high %v4127_v22, %v4131_v18  ;;  %v9141_v30 = vcombine.high %v4128_v26, %v4132_v12  ;;  %v4179_v22 = vld [vmem:[#allocation8 + $0x830] sm:$0xff]  ;;  %v4176_v18 = vld [vmem:[#allocation8 + $0x818] sm:$0xff] }
 0x3ed   :  { %7572 = vmatprep.subr.bf16.mxu1 %v9093_v32  ;;  %v4135_v32 = vld [vmem:[#allocation8 + $0x6d0] sm:$0xff] }
 0x3ee   :  { %v9146_v45 = vcombine.low %v4135_v32, %v4139_v8 }
 0x3ef   :  { %7409 = vmatpush1.bf16.msra.mxu0 %v9090_v40  ;;  %v9140_v40 = vcombine.low %v4128_v26, %v4132_v12  ;;  %v4180_v26 = vld [vmem:[#allocation8 + $0x838] sm:$0xff] }
 0x3f0   :  { %7573 = vmatpush1.bf16.msra.mxu1 %v9092_v41  ;;  %7410 = vmatprep.subr.bf16.mxu0 %v9099_v36  ;;  %v9147_v41 = vcombine.high %v4135_v32, %v4139_v8  ;;  %v9149_v36 = vcombine.high %v4136_v37, %v4140_v25  ;;  %v4187_v32 = vld [vmem:[#allocation8 + $0x870] sm:$0xff] }
 0x3f1   :  { %7574 = vmatprep.subr.bf16.mxu1 %v9101_v42  ;;  %v4143_v42 = vld [vmem:[#allocation8 + $0x710] sm:$0xff] }
 0x3f2   :  { %v9154_v52 = vcombine.low %v4143_v42, %v4147_v43 }
 0x3f3   :  { %7411 = vmatpush1.bf16.msra.mxu0 %v9098_v9  ;;  %v9148_v9 = vcombine.low %v4136_v37, %v4140_v25  ;;  %v4184_v37 = vld [vmem:[#allocation8 + $0x858] sm:$0xff] }
 0x3f4   :  { %7575 = vmatpush1.bf16.msra.mxu1 %v9100_v34  ;;  %7412 = vmatprep.subr.bf16.mxu0 %v9107_v47  ;;  %v9155_v34 = vcombine.high %v4143_v42, %v4147_v43  ;;  %v9157_v47 = vcombine.high %v4144_v49, %v4148_v44  ;;  %v4188_v25 = vld [vmem:[#allocation8 + $0x878] sm:$0xff] }
 0x3f5   :  { %7576 = vmatprep.subr.bf16.mxu1 %v9109_v48  ;;  %v4151_v48 = vld [vmem:[#allocation8 + $0x750] sm:$0xff]  ;;  %v9197_v42 = vcombine.high %v4184_v37, %v4188_v25  ;;  %v4192_v43 = vld [vmem:[#allocation8 + $0x898] sm:$0xff] }
 0x3f6   :  { %v9162_v3 = vcombine.low %v4151_v48, %v4155_v50 }
 0x3f7   :  { %7413 = vmatpush1.bf16.msra.mxu0 %v9106_v61  ;;  %v9156_v61 = vcombine.low %v4144_v49, %v4148_v44  ;;  %v4196_v49 = vld [vmem:[#allocation8 + $0x8b8] sm:$0xff] }
 0x3f8   :  { %7577 = vmatpush1.bf16.msra.mxu1 %v9108_v62  ;;  %7414 = vmatprep.subr.bf16.mxu0 %v9115_v59  ;;  %v9163_v62 = vcombine.high %v4151_v48, %v4155_v50  ;;  %v9165_v59 = vcombine.high %v4152_v46, %v4156_v51  ;;  %v4203_v48 = vld [vmem:[#allocation8 + $0x8f0] sm:$0xff]  ;;  %v4200_v50 = vld [vmem:[#allocation8 + $0x8d8] sm:$0xff] }
 0x3f9   :  { %7578 = vmatprep.subr.bf16.mxu1 %v9117_v63  ;;  %v4159_v63 = vld [vmem:[#allocation8 + $0x790] sm:$0xff] }
 0x3fa   :  { %v9170_v19 = vcombine.low %v4159_v63, %v4163_v54 }
 0x3fb   :  { %7415 = vmatpush1.bf16.msra.mxu0 %v9114_v5  ;;  %v9164_v5 = vcombine.low %v4152_v46, %v4156_v51  ;;  %v4204_v46 = vld [vmem:[#allocation8 + $0x8f8] sm:$0xff] }
 0x3fc   :  { %7579 = vmatpush1.bf16.msra.mxu1 %v9116_v6  ;;  %7416 = vmatprep.subr.bf16.mxu0 %v9123_v7  ;;  %v9171_v6 = vcombine.high %v4159_v63, %v4163_v54  ;;  %v9173_v7 = vcombine.high %v4160_v4, %v4164_v2  ;;  %v4208_v63 = vld [vmem:[#allocation8 + $0x918] sm:$0xff] }
 0x3fd   :  { %7580 = vmatprep.subr.bf16.mxu1 %v9125_v13  ;;  %v4167_v13 = vld [vmem:[#allocation8 + $0x7d0] sm:$0xff]  ;;  %v4212_v54 = vld [vmem:[#allocation8 + $0x938] sm:$0xff] }
 0x3fe   :  { %v9178_v12 = vcombine.low %v4167_v13, %v4171_v0 }
 0x3ff   :  { %7417 = vmatpush1.bf16.msra.mxu0 %v9122_v20  ;;  %v9172_v20 = vcombine.low %v4160_v4, %v4164_v2  ;;  %v9212_v4 = vcombine.low %v4200_v50, %v4204_v46 }
 0x400   :  { %7581 = vmatpush1.bf16.msra.mxu1 %v9124_v21  ;;  %7418 = vmatprep.subr.bf16.mxu0 %v9131_v10  ;;  %v9179_v21 = vcombine.high %v4167_v13, %v4171_v0  ;;  %v9181_v10 = vcombine.high %v4168_v11, %v4172_v14  ;;  %v4220_v13 = vld [vmem:[#allocation8 + $0x978] sm:$0xff] }
 0x401   :  { %7582 = vmatprep.subr.bf16.mxu1 %v9133_v57  ;;  %v4175_v57 = vld [vmem:[#allocation8 + $0x810] sm:$0xff] }
 0x402   :  { %v9186_v8 = vcombine.low %v4175_v57, %v4179_v22 }
 0x403   :  { %7419 = vmatpush1.bf16.msra.mxu0 %v9130_v28  ;;  %v9180_v28 = vcombine.low %v4168_v11, %v4172_v14  ;;  %v9220_v11 = vcombine.low %v4208_v63, %v4212_v54 }
 0x404   :  { %7583 = vmatpush1.bf16.msra.mxu1 %v9132_v17  ;;  %7420 = vmatprep.subr.bf16.mxu0 %v9139_v29  ;;  %v9187_v17 = vcombine.high %v4175_v57, %v4179_v22  ;;  %v9189_v29 = vcombine.high %v4176_v18, %v4180_v26  ;;  %v4228_v57 = vld [vmem:[#allocation8 + $0x9b8] sm:$0xff] }
 0x405   :  { %7584 = vmatprep.subr.bf16.mxu1 %v9141_v30  ;;  %v4183_v30 = vld [vmem:[#allocation8 + $0x850] sm:$0xff] }
 0x406   :  { %v9194_v44 = vcombine.low %v4183_v30, %v4187_v32 }
 0x407   :  { %7421 = vmatpush1.bf16.msra.mxu0 %v9138_v38  ;;  %v9188_v38 = vcombine.low %v4176_v18, %v4180_v26 }
 0x408   :  { %7585 = vmatpush1.bf16.msra.mxu1 %v9140_v40  ;;  %7422 = vmatprep.subr.bf16.mxu0 %v9147_v41  ;;  %v9195_v40 = vcombine.high %v4183_v30, %v4187_v32  ;;  %v4191_v41 = vld [vmem:[#allocation8 + $0x890] sm:$0xff]  ;;  %v4236_v30 = vld [vmem:[#allocation8 + $0x9f8] sm:$0xff] }
 0x409   :  { %7586 = vmatprep.subr.bf16.mxu1 %v9149_v36  ;;  %v4195_v36 = vld [vmem:[#allocation8 + $0x8b0] sm:$0xff] }
 0x40a   :  { %v9202_v51 = vcombine.low %v4191_v41, %v4195_v36 }
 0x40b   :  { %7423 = vmatpush1.bf16.msra.mxu0 %v9146_v45  ;;  %v9196_v45 = vcombine.low %v4184_v37, %v4188_v25 }
 0x40c   :  { %7587 = vmatpush1.bf16.msra.mxu1 %v9148_v9  ;;  %7424 = vmatprep.subr.bf16.mxu0 %v9155_v34  ;;  %v9203_v9 = vcombine.high %v4191_v41, %v4195_v36  ;;  %v9205_v34 = vcombine.high %v4192_v43, %v4196_v49  ;;  %v4240_v41 = vld [vmem:[#allocation8 + $0xa18] sm:$0xff] }
 0x40d   :  { %7588 = vmatprep.subr.bf16.mxu1 %v9157_v47  ;;  %v4199_v47 = vld [vmem:[#allocation8 + $0x8d0] sm:$0xff]  ;;  %v4244_v36 = vld [vmem:[#allocation8 + $0xa38] sm:$0xff] }
 0x40f   :  { %7425 = vmatpush1.bf16.msra.mxu0 %v9154_v52  ;;  %v9211_v52 = vcombine.high %v4199_v47, %v4203_v48 }
 0x410   :  { %7589 = vmatpush1.bf16.msra.mxu1 %v9156_v61  ;;  %7426 = vmatprep.subr.bf16.mxu0 %v9163_v62  ;;  %v9213_v61 = vcombine.high %v4200_v50, %v4204_v46  ;;  %v4207_v62 = vld [vmem:[#allocation8 + $0x910] sm:$0xff]  ;;  %v9252_v50 = vcombine.low %v4240_v41, %v4244_v36 }
 0x411   :  { %7590 = vmatprep.subr.bf16.mxu1 %v9165_v59  ;;  %v4211_v59 = vld [vmem:[#allocation8 + $0x930] sm:$0xff] }
 0x412   :  { %v9219_v2 = vcombine.high %v4207_v62, %v4211_v59  ;;  %v9218_v0 = vcombine.low %v4207_v62, %v4211_v59  ;;  %v4260_v62 = vld [vmem:[#allocation8 + $0xab8] sm:$0xff] }
 0x413   :  { %7427 = vmatpush1.bf16.msra.mxu0 %v9162_v3  ;;  %v9221_v3 = vcombine.high %v4208_v63, %v4212_v54 }
 0x414   :  { %7591 = vmatpush1.bf16.msra.mxu1 %v9164_v5  ;;  %7428 = vmatprep.subr.bf16.mxu0 %v9171_v6  ;;  %v4215_v5 = vld [vmem:[#allocation8 + $0x950] sm:$0xff] }
 0x415   :  { %7592 = vmatprep.subr.bf16.mxu1 %v9173_v7  ;;  %v4219_v6 = vld [vmem:[#allocation8 + $0x970] sm:$0xff]  ;;  %v4216_v7 = vld [vmem:[#allocation8 + $0x958] sm:$0xff] }
 0x416   :  { %v9227_v14 = vcombine.high %v4215_v5, %v4219_v6  ;;  %v9226_v22 = vcombine.low %v4215_v5, %v4219_v6  ;;  %v9228_v18 = vcombine.low %v4216_v7, %v4220_v13  ;;  %v4268_v5 = vld [vmem:[#allocation8 + $0xaf8] sm:$0xff] }
 0x417   :  { %7429 = vmatpush1.bf16.msra.mxu0 %v9170_v19  ;;  %v9229_v19 = vcombine.high %v4216_v7, %v4220_v13 }
 0x418   :  { %7593 = vmatpush1.bf16.msra.mxu1 %v9172_v20  ;;  %7430 = vmatprep.subr.bf16.mxu0 %v9179_v21  ;;  %v4223_v20 = vld [vmem:[#allocation8 + $0x990] sm:$0xff] }
 0x419   :  { %7594 = vmatprep.subr.bf16.mxu1 %v9181_v10  ;;  %v4227_v21 = vld [vmem:[#allocation8 + $0x9b0] sm:$0xff]  ;;  %v4224_v10 = vld [vmem:[#allocation8 + $0x998] sm:$0xff] }
 0x41a   :  { %v9235_v26 = vcombine.high %v4223_v20, %v4227_v21  ;;  %v9234_v32 = vcombine.low %v4223_v20, %v4227_v21  ;;  %v4276_v20 = vld [vmem:[#allocation8 + $0xb38] sm:$0xff] }
 0x41b   :  { %7431 = vmatpush1.bf16.msra.mxu0 %v9178_v12  ;;  %v9237_v12 = vcombine.high %v4224_v10, %v4228_v57 }
 0x41c   :  { %7595 = vmatpush1.bf16.msra.mxu1 %v9180_v28  ;;  %7441 = vmatprep.subr.bf16.mxu0 %v9187_v17  ;;  %v4231_v28 = vld [vmem:[#allocation8 + $0x9d0] sm:$0xff] }
 0x41d   :  { %7605 = vmatprep.subr.bf16.mxu1 %v9189_v29  ;;  %v4235_v17 = vld [vmem:[#allocation8 + $0x9f0] sm:$0xff]  ;;  %v4232_v29 = vld [vmem:[#allocation8 + $0x9d8] sm:$0xff] }
 0x41e   :  { %7433 = vmatmul.mubr.bf16.vlgmr.msra.gmra.mrb[12].mxu0 %v10199_v39  ;;  %v9243_v37 = vcombine.high %v4231_v28, %v4235_v17  ;;  %v9245_v25 = vcombine.high %v4232_v29, %v4236_v30 }
 0x41f   :  { %7597 = vmatmul.mubr.bf16.vlgmr.msra.gmra.mrb[12].mxu1 %v10199_v39  ;;  %7442 = vmatpush1.bf16.msra.mxu0 %v9186_v8  ;;  %v9204_v39 = vcombine.low %v4192_v43, %v4196_v49  ;;  %v9236_v8 = vcombine.low %v4224_v10, %v4228_v57  ;;  %v9244_v43 = vcombine.low %v4232_v29, %v4236_v30 }
 0x420   :  { %7473 = vmatprep.mubr.bf16.mxu0 %v10219_v24  ;;  %7606 = vmatpush1.bf16.msra.mxu1 %v9188_v38  ;;  %v4239_v38 = vld [vmem:[#allocation8 + $0xa10] sm:$0xff] }
 0x421   :  { %7637 = vmatprep.mubr.bf16.mxu1 %v10219_v24  ;;  %7443 = vmatprep.subr.bf16.mxu0 %v9195_v40  ;;  %v9210_v24 = vcombine.low %v4199_v47, %v4203_v48  ;;  %v4243_v40 = vld [vmem:[#allocation8 + $0xa30] sm:$0xff]  ;;  %v4252_v47 = vld [vmem:[#allocation8 + $0xa78] sm:$0xff] }
 0x422   :  { %7607 = vmatprep.subr.bf16.mxu1 %v9197_v42  ;;  %v9242_v42 = vcombine.low %v4231_v28, %v4235_v17  ;;  %v9251_v49 = vcombine.high %v4239_v38, %v4243_v40  ;;  %v9250_v48 = vcombine.low %v4239_v38, %v4243_v40  ;;  %v4284_v28 = vld [vmem:[#allocation8 + $0xb78] sm:$0xff] }
 0x423   :  { %7444 = vmatpush1.bf16.msra.mxu0 %v9194_v44  ;;  %v9253_v44 = vcombine.high %v4240_v41, %v4244_v36  ;;  %v4292_v38 = vld [vmem:[#allocation8 + $0xbb8] sm:$0xff] }
 0x424   :  { %7608 = vmatpush1.bf16.msra.mxu1 %v9196_v45  ;;  %7445 = vmatprep.subr.bf16.mxu0 %v9203_v9  ;;  %v4247_v45 = vld [vmem:[#allocation8 + $0xa50] sm:$0xff] }
 0x425   :  { %7609 = vmatprep.subr.bf16.mxu1 %v9205_v34  ;;  %v4251_v9 = vld [vmem:[#allocation8 + $0xa70] sm:$0xff]  ;;  %v4248_v34 = vld [vmem:[#allocation8 + $0xa58] sm:$0xff] }
 0x426   :  { %v9259_v46 = vcombine.high %v4247_v45, %v4251_v9  ;;  %v9258_v59 = vcombine.low %v4247_v45, %v4251_v9  ;;  %v9260_v63 = vcombine.low %v4248_v34, %v4252_v47  ;;  %v4300_v45 = vld [vmem:[#allocation8 + $0xbf8] sm:$0xff] }
 0x427   :  { %7446 = vmatpush1.bf16.msra.mxu0 %v9202_v51  ;;  %v9261_v51 = vcombine.high %v4248_v34, %v4252_v47 }
 0x428   :  { %7610 = vmatpush1.bf16.msra.mxu1 %v9204_v39  ;;  %7447 = vmatprep.subr.bf16.mxu0 %v9211_v52  ;;  %v4255_v39 = vld [vmem:[#allocation8 + $0xa90] sm:$0xff] }
 0x429   :  { %7611 = vmatprep.subr.bf16.mxu1 %v9213_v61  ;;  %v4259_v52 = vld [vmem:[#allocation8 + $0xab0] sm:$0xff]  ;;  %v4256_v61 = vld [vmem:[#allocation8 + $0xa98] sm:$0xff] }
 0x42a   :  { %v9267_v54 = vcombine.high %v4255_v39, %v4259_v52  ;;  %v9266_v6 = vcombine.low %v4255_v39, %v4259_v52  ;;  %v9268_v7 = vcombine.low %v4256_v61, %v4260_v62  ;;  %v4308_v39 = vld [vmem:[#allocation8 + $0xc38] sm:$0xff] }
 0x42b   :  { %7448 = vmatpush1.bf16.msra.mxu0 %v9210_v24  ;;  %v9269_v24 = vcombine.high %v4256_v61, %v4260_v62 }
 0x42c   :  { %7612 = vmatpush1.bf16.msra.mxu1 %v9212_v4  ;;  %7449 = vmatprep.subr.bf16.mxu0 %v9219_v2  ;;  %v4263_v4 = vld [vmem:[#allocation8 + $0xad0] sm:$0xff] }
 0x42d   :  { %7613 = vmatprep.subr.bf16.mxu1 %v9221_v3  ;;  %v4267_v2 = vld [vmem:[#allocation8 + $0xaf0] sm:$0xff]  ;;  %v4264_v3 = vld [vmem:[#allocation8 + $0xad8] sm:$0xff] }
 0x42e   :  { %v9275_v13 = vcombine.high %v4263_v4, %v4267_v2  ;;  %v9274_v21 = vcombine.low %v4263_v4, %v4267_v2  ;;  %v9276_v10 = vcombine.low %v4264_v3, %v4268_v5  ;;  %v4312_v4 = vld [vmem:[#allocation8 + $0xc58] sm:$0xff] }
 0x42f   :  { %7450 = vmatpush1.bf16.msra.mxu0 %v9218_v0  ;;  %v9277_v0 = vcombine.high %v4264_v3, %v4268_v5  ;;  %v4316_v2 = vld [vmem:[#allocation8 + $0xc78] sm:$0xff] }
 0x430   :  { %7614 = vmatpush1.bf16.msra.mxu1 %v9220_v11  ;;  %7451 = vmatprep.subr.bf16.mxu0 %v9227_v14  ;;  %v4271_v11 = vld [vmem:[#allocation8 + $0xb10] sm:$0xff] }
 0x431   :  { %7615 = vmatprep.subr.bf16.mxu1 %v9229_v19  ;;  %v4275_v14 = vld [vmem:[#allocation8 + $0xb30] sm:$0xff]  ;;  %v4272_v19 = vld [vmem:[#allocation8 + $0xb18] sm:$0xff] }
 0x432   :  { %v9283_v57 = vcombine.high %v4271_v11, %v4275_v14  ;;  %v9282_v17 = vcombine.low %v4271_v11, %v4275_v14  ;;  %v9284_v29 = vcombine.low %v4272_v19, %v4276_v20  ;;  %v4324_v11 = vld [vmem:[#allocation8 + $0xcb8] sm:$0xff] }
 0x433   :  { %7452 = vmatpush1.bf16.msra.mxu0 %v9226_v22  ;;  %v9285_v22 = vcombine.high %v4272_v19, %v4276_v20  ;;  %v9324_v19 = vcombine.low %v4312_v4, %v4316_v2 }
 0x434   :  { %7616 = vmatpush1.bf16.msra.mxu1 %v9228_v18  ;;  %7453 = vmatprep.subr.bf16.mxu0 %v9235_v26  ;;  %v4279_v18 = vld [vmem:[#allocation8 + $0xb50] sm:$0xff] }
 0x435   :  { %7617 = vmatprep.subr.bf16.mxu1 %v9237_v12  ;;  %v4283_v26 = vld [vmem:[#allocation8 + $0xb70] sm:$0xff]  ;;  %v4280_v12 = vld [vmem:[#allocation8 + $0xb58] sm:$0xff] }
 0x436   :  { %v9291_v30 = vcombine.high %v4279_v18, %v4283_v26  ;;  %v9290_v40 = vcombine.low %v4279_v18, %v4283_v26  ;;  %v9292_v41 = vcombine.low %v4280_v12, %v4284_v28  ;;  %v4332_v18 = vld [vmem:[#allocation8 + $0xcf8] sm:$0xff] }
 0x437   :  { %7454 = vmatpush1.bf16.msra.mxu0 %v9234_v32  ;;  %v9293_v32 = vcombine.high %v4280_v12, %v4284_v28 }
 0x438   :  { %7618 = vmatpush1.bf16.msra.mxu1 %v9236_v8  ;;  %7455 = vmatprep.subr.bf16.mxu0 %v9243_v37  ;;  %v4287_v8 = vld [vmem:[#allocation8 + $0xb90] sm:$0xff] }
 0x439   :  { %7619 = vmatprep.subr.bf16.mxu1 %v9245_v25  ;;  %v4291_v37 = vld [vmem:[#allocation8 + $0xbb0] sm:$0xff]  ;;  %v4288_v25 = vld [vmem:[#allocation8 + $0xb98] sm:$0xff] }
 0x43a   :  { %v9299_v36 = vcombine.high %v4287_v8, %v4291_v37  ;;  %v9298_v9 = vcombine.low %v4287_v8, %v4291_v37  ;;  %v9300_v34 = vcombine.low %v4288_v25, %v4292_v38 }
 0x43b   :  { %7456 = vmatpush1.bf16.msra.mxu0 %v9242_v42  ;;  %v9301_v42 = vcombine.high %v4288_v25, %v4292_v38  ;;  %v4343_v38 = vld [vmem:[#allocation8 + $0xd50] sm:$0xff] }
 0x43c   :  { %7620 = vmatpush1.bf16.msra.mxu1 %v9244_v43  ;;  %7457 = vmatprep.subr.bf16.mxu0 %v9251_v49  ;;  %v4295_v43 = vld [vmem:[#allocation8 + $0xbd0] sm:$0xff] }
 0x43d   :  { %7621 = vmatprep.subr.bf16.mxu1 %v9253_v44  ;;  %v4299_v49 = vld [vmem:[#allocation8 + $0xbf0] sm:$0xff]  ;;  %v4296_v44 = vld [vmem:[#allocation8 + $0xbd8] sm:$0xff] }
 0x43e   :  { %v9307_v47 = vcombine.high %v4295_v43, %v4299_v49  ;;  %v9306_v52 = vcombine.low %v4295_v43, %v4299_v49  ;;  %v9308_v61 = vcombine.low %v4296_v44, %v4300_v45 }
 0x43f   :  { %7458 = vmatpush1.bf16.msra.mxu0 %v9250_v48  ;;  %v9309_v48 = vcombine.high %v4296_v44, %v4300_v45  ;;  %v4351_v45 = vld [vmem:[#allocation8 + $0xd90] sm:$0xff] }
 0x440   :  { %7622 = vmatpush1.bf16.msra.mxu1 %v9252_v50  ;;  %7459 = vmatprep.subr.bf16.mxu0 %v9259_v46  ;;  %v4303_v50 = vld [vmem:[#allocation8 + $0xc10] sm:$0xff] }
 0x441   :  { %7623 = vmatprep.subr.bf16.mxu1 %v9261_v51  ;;  %v4307_v46 = vld [vmem:[#allocation8 + $0xc30] sm:$0xff]  ;;  %v4304_v51 = vld [vmem:[#allocation8 + $0xc18] sm:$0xff] }
 0x442   :  { %v9315_v62 = vcombine.high %v4303_v50, %v4307_v46  ;;  %v9316_v3 = vcombine.low %v4304_v51, %v4308_v39 }
 0x443   :  { %7460 = vmatpush1.bf16.msra.mxu0 %v9258_v59  ;;  %v9317_v59 = vcombine.high %v4304_v51, %v4308_v39 }
 0x444   :  { %7624 = vmatpush1.bf16.msra.mxu1 %v9260_v63  ;;  %7461 = vmatprep.subr.bf16.mxu0 %v9267_v54  ;;  %v4311_v63 = vld [vmem:[#allocation8 + $0xc50] sm:$0xff] }
 0x445   :  { %7625 = vmatprep.subr.bf16.mxu1 %v9269_v24  ;;  %v4315_v54 = vld [vmem:[#allocation8 + $0xc70] sm:$0xff]  ;;  %v9314_v24 = vcombine.low %v4303_v50, %v4307_v46 }
 0x446   :  { %v9323_v5 = vcombine.high %v4311_v63, %v4315_v54  ;;  %v9322_v14 = vcombine.low %v4311_v63, %v4315_v54  ;;  %v4360_v54 = vld [vmem:[#allocation8 + $0xdd8] sm:$0xff] }
 0x447   :  { %7462 = vmatpush1.bf16.msra.mxu0 %v9266_v6  ;;  %v4319_v6 = vld [vmem:[#allocation8 + $0xc90] sm:$0xff] }
 0x448   :  { %7626 = vmatpush1.bf16.msra.mxu1 %v9268_v7  ;;  %7463 = vmatprep.subr.bf16.mxu0 %v9275_v13  ;;  %v4323_v7 = vld [vmem:[#allocation8 + $0xcb0] sm:$0xff]  ;;  %v9325_v13 = vcombine.high %v4312_v4, %v4316_v2 }
 0x449   :  { %7627 = vmatprep.subr.bf16.mxu1 %v9277_v0  ;;  %v4320_v0 = vld [vmem:[#allocation8 + $0xc98] sm:$0xff]  ;;  %v9331_v20 = vcombine.high %v4319_v6, %v4323_v7  ;;  %v9330_v26 = vcombine.low %v4319_v6, %v4323_v7 }
 0x44b   :  { %7464 = vmatpush1.bf16.msra.mxu0 %v9274_v21  ;;  %v9333_v21 = vcombine.high %v4320_v0, %v4324_v11 }
 0x44c   :  { %7628 = vmatpush1.bf16.msra.mxu1 %v9276_v10  ;;  %7465 = vmatprep.subr.bf16.mxu0 %v9283_v57  ;;  %v4327_v10 = vld [vmem:[#allocation8 + $0xcd0] sm:$0xff] }
 0x44d   :  { %7629 = vmatprep.subr.bf16.mxu1 %v9285_v22  ;;  %v4331_v57 = vld [vmem:[#allocation8 + $0xcf0] sm:$0xff]  ;;  %v4328_v22 = vld [vmem:[#allocation8 + $0xcd8] sm:$0xff] }
 0x44e   :  { %v9339_v12 = vcombine.high %v4327_v10, %v4331_v57  ;;  %v9341_v28 = vcombine.high %v4328_v22, %v4332_v18  ;;  %v9340_v8 = vcombine.low %v4328_v22, %v4332_v18  ;;  %v4375_v18 = vld [vmem:[#allocation8 + $0xe50] sm:$0xff] }
 0x44f   :  { %7466 = vmatpush1.bf16.msra.mxu0 %v9282_v17  ;;  %v4335_v17 = vld [vmem:[#allocation8 + $0xd10] sm:$0xff] }
 0x450   :  { %7630 = vmatpush1.bf16.msra.mxu1 %v9284_v29  ;;  %7467 = vmatprep.subr.bf16.mxu0 %v9291_v30  ;;  %v4339_v29 = vld [vmem:[#allocation8 + $0xd30] sm:$0xff]  ;;  %v4336_v30 = vld [vmem:[#allocation8 + $0xd18] sm:$0xff] }
 0x451   :  { %7631 = vmatprep.subr.bf16.mxu1 %v9293_v32  ;;  %v4340_v32 = vld [vmem:[#allocation8 + $0xd38] sm:$0xff]  ;;  %v9347_v37 = vcombine.high %v4335_v17, %v4339_v29 }
 0x452   :  { %v9349_v25 = vcombine.high %v4336_v30, %v4340_v32  ;;  %v9348_v43 = vcombine.low %v4336_v30, %v4340_v32  ;;  %v4383_v32 = vld [vmem:[#allocation8 + $0xe90] sm:$0xff] }
 0x453   :  { %7468 = vmatpush1.bf16.msra.mxu0 %v9290_v40  ;;  %v4347_v40 = vld [vmem:[#allocation8 + $0xd70] sm:$0xff] }
 0x454   :  { %7632 = vmatpush1.bf16.msra.mxu1 %v9292_v41  ;;  %7469 = vmatprep.subr.bf16.mxu0 %v9299_v36  ;;  %v4344_v41 = vld [vmem:[#allocation8 + $0xd58] sm:$0xff]  ;;  %v9355_v49 = vcombine.high %v4343_v38, %v4347_v40 }
 0x455   :  { %7633 = vmatprep.subr.bf16.mxu1 %v9301_v42  ;;  %v4348_v36 = vld [vmem:[#allocation8 + $0xd78] sm:$0xff]  ;;  %v9346_v42 = vcombine.low %v4335_v17, %v4339_v29 }
 0x456   :  { %v9357_v44 = vcombine.high %v4344_v41, %v4348_v36  ;;  %v9356_v50 = vcombine.low %v4344_v41, %v4348_v36  ;;  %v4391_v36 = vld [vmem:[#allocation8 + $0xed0] sm:$0xff] }
 0x457   :  { %7470 = vmatpush1.bf16.msra.mxu0 %v9298_v9  ;;  %v4355_v9 = vld [vmem:[#allocation8 + $0xdb0] sm:$0xff] }
 0x458   :  { %7634 = vmatpush1.bf16.msra.mxu1 %v9300_v34  ;;  %7471 = vmatprep.subr.bf16.mxu0 %v9307_v47  ;;  %v4352_v34 = vld [vmem:[#allocation8 + $0xd98] sm:$0xff]  ;;  %v9363_v46 = vcombine.high %v4351_v45, %v4355_v9 }
 0x459   :  { %7635 = vmatprep.subr.bf16.mxu1 %v9309_v48  ;;  %v4356_v47 = vld [vmem:[#allocation8 + $0xdb8] sm:$0xff]  ;;  %v9354_v48 = vcombine.low %v4343_v38, %v4347_v40 }
 0x45a   :  { %v9364_v7 = vcombine.low %v4352_v34, %v4356_v47 }
 0x45b   :  { %7472 = vmatpush1.bf16.msra.mxu0 %v9306_v52  ;;  %v9365_v52 = vcombine.high %v4352_v34, %v4356_v47  ;;  %v4399_v47 = vld [vmem:[#allocation8 + $0xf10] sm:$0xff] }
 0x45c   :  { %7636 = vmatpush1.bf16.msra.mxu1 %v9308_v61  ;;  %7482 = vmatprep.subr.bf16.mxu0 %v9315_v62  ;;  %v4359_v61 = vld [vmem:[#allocation8 + $0xdd0] sm:$0xff] }
 0x45d   :  { %7646 = vmatprep.subr.bf16.mxu1 %v9317_v59  ;;  %v4363_v62 = vld [vmem:[#allocation8 + $0xdf0] sm:$0xff] }
 0x45e   :  { %7474 = vmatmul.mubr.bf16.vlgmr.msra.gmra.mrb[12].mxu0 %v10221_v27 }
 0x45f   :  { %7638 = vmatmul.mubr.bf16.vlgmr.msra.gmra.mrb[12].mxu1 %v10221_v27  ;;  %7483 = vmatpush1.bf16.msra.mxu0 %v9314_v24  ;;  %v9332_v27 = vcombine.low %v4320_v0, %v4324_v11  ;;  %v4364_v24 = vld [vmem:[#allocation8 + $0xdf8] sm:$0xff]  ;;  %v4367_v11 = vld [vmem:[#allocation8 + $0xe10] sm:$0xff] }
 0x460   :  { %7514 = vmatprep.mubr.bf16.mxu0 %v10225_v35  ;;  %7647 = vmatpush1.bf16.msra.mxu1 %v9316_v3  ;;  %v9362_v3 = vcombine.low %v4351_v45, %v4355_v9  ;;  %v9373_v0 = vcombine.high %v4360_v54, %v4364_v24 }
 0x461   :  { %7678 = vmatprep.mubr.bf16.mxu1 %v10225_v35  ;;  %7484 = vmatprep.subr.bf16.mxu0 %v9323_v5  ;;  %v9338_v35 = vcombine.low %v4327_v10, %v4331_v57  ;;  %v9372_v10 = vcombine.low %v4360_v54, %v4364_v24  ;;  %v4407_v24 = vld [vmem:[#allocation8 + $0xf50] sm:$0xff] }
 0x462   :  { %7648 = vmatprep.subr.bf16.mxu1 %v9325_v13  ;;  %v9371_v13 = vcombine.high %v4359_v61, %v4363_v62 }
 0x463   :  { %7485 = vmatpush1.bf16.msra.mxu0 %v9322_v14  ;;  %v4371_v14 = vld [vmem:[#allocation8 + $0xe30] sm:$0xff] }
 0x464   :  { %7649 = vmatpush1.bf16.msra.mxu1 %v9324_v19  ;;  %7486 = vmatprep.subr.bf16.mxu0 %v9331_v20  ;;  %v4368_v19 = vld [vmem:[#allocation8 + $0xe18] sm:$0xff]  ;;  %v9379_v57 = vcombine.high %v4367_v11, %v4371_v14 }
 0x465   :  { %7650 = vmatprep.subr.bf16.mxu1 %v9333_v21  ;;  %v4372_v20 = vld [vmem:[#allocation8 + $0xe38] sm:$0xff]  ;;  %v9370_v21 = vcombine.low %v4359_v61, %v4363_v62 }
 0x466   :  { %v9381_v22 = vcombine.high %v4368_v19, %v4372_v20  ;;  %v9380_v17 = vcombine.low %v4368_v19, %v4372_v20  ;;  %v4420_v19 = vld [vmem:[#allocation8 + $0xfb8] sm:$0xff]  ;;  %v10262_v20 = vld [vmem:[#allocation10] sm:$0xff] }
 0x467   :  { %7487 = vmatpush1.bf16.msra.mxu0 %v9330_v26  ;;  %v4379_v26 = vld [vmem:[#allocation8 + $0xe70] sm:$0xff] }
 0x468   :  { %7651 = vmatpush1.bf16.msra.mxu1 %v9332_v27  ;;  %7488 = vmatprep.subr.bf16.mxu0 %v9339_v12  ;;  %v4376_v27 = vld [vmem:[#allocation8 + $0xe58] sm:$0xff]  ;;  %v9387_v29 = vcombine.high %v4375_v18, %v4379_v26 }
 0x469   :  { %7652 = vmatprep.subr.bf16.mxu1 %v9341_v28  ;;  %v4380_v12 = vld [vmem:[#allocation8 + $0xe78] sm:$0xff]  ;;  %v9378_v28 = vcombine.low %v4367_v11, %v4371_v14  ;;  %v4419_v11 = vld [vmem:[#allocation8 + $0xfb0] sm:$0xff] }
 0x46a   :  { %v9389_v30 = vcombine.high %v4376_v27, %v4380_v12  ;;  %v9388_v38 = vcombine.low %v4376_v27, %v4380_v12  ;;  %v4416_v14 = vld [vmem:[#allocation8 + $0xf98] sm:$0xff]  ;;  %v4438_v27 = vrot.slane %v10262_v20, %v651_v15 }
 0x46b   :  { %7489 = vmatpush1.bf16.msra.mxu0 %v9338_v35  ;;  %v4387_v35 = vld [vmem:[#allocation8 + $0xeb0] sm:$0xff]  ;;  %v4424_v12 = vld [vmem:[#allocation8 + $0xfd8] sm:$0xff] }
 0x46c   :  { %7653 = vmatpush1.bf16.msra.mxu1 %v9340_v8  ;;  %7490 = vmatprep.subr.bf16.mxu0 %v9347_v37  ;;  %v4384_v8 = vld [vmem:[#allocation8 + $0xe98] sm:$0xff]  ;;  %v9395_v40 = vcombine.high %v4383_v32, %v4387_v35 }
 0x46d   :  { %7654 = vmatprep.subr.bf16.mxu1 %v9349_v25  ;;  %v4388_v37 = vld [vmem:[#allocation8 + $0xeb8] sm:$0xff]  ;;  %v9386_v25 = vcombine.low %v4375_v18, %v4379_v26  ;;  %v4423_v18 = vld [vmem:[#allocation8 + $0xfd0] sm:$0xff] }
 0x46e   :  { %v9397_v41 = vcombine.high %v4384_v8, %v4388_v37  ;;  %v9396_v45 = vcombine.low %v4384_v8, %v4388_v37  ;;  %v4427_v26 = vld [vmem:[#allocation8 + $0xff0] sm:$0xff] }
 0x46f   :  { %7491 = vmatpush1.bf16.msra.mxu0 %v9346_v42  ;;  %v4395_v42 = vld [vmem:[#allocation8 + $0xef0] sm:$0xff]  ;;  %v9434_v15 = vcombine.low %v4423_v18, %v4427_v26 }
 0x470   :  { %7655 = vmatpush1.bf16.msra.mxu1 %v9348_v43  ;;  %7492 = vmatprep.subr.bf16.mxu0 %v9355_v49  ;;  %v4392_v43 = vld [vmem:[#allocation8 + $0xed8] sm:$0xff]  ;;  %v9403_v9 = vcombine.high %v4391_v36, %v4395_v42 }
 0x471   :  { %v10254_v51 = vpop.f32.mrb[8].mxu0  ;;  %v10256_v39 = vpop.f32.mrb[8].mxu1  ;;  %7656 = vmatprep.subr.bf16.mxu1 %v9357_v44  ;;  %v4396_v49 = vld [vmem:[#allocation8 + $0xef8] sm:$0xff]  ;;  %v9394_v44 = vcombine.low %v4383_v32, %v4387_v35  ;;  %v9435_v32 = vcombine.high %v4423_v18, %v4427_v26  ;;  %v9747_v18 = vld [vmem:[#allocation11 + $0x140] sm:$0xff]  }
 0x472   :  { %v10258_v59 = vpop.f32.mrb[9].mxu0  ;;  %v10260_v63 = vpop.f32.mrb[9].mxu1  ;;  %v9405_v34 = vcombine.high %v4392_v43, %v4396_v49  ;;  %v9404_v61 = vcombine.low %v4392_v43, %v4396_v49  ;;  %v9719_v43 = vld [vmem:[#allocation11 + $0x48] sm:$0xff]  }
 0x473   :  { %v7192_v4 = vpop.f32.mrb[10].mxu0  ;;  %v7356_v2 = vpop.f32.mrb[10].mxu1  ;;  %7493 = vmatpush1.bf16.msra.mxu0 %v9354_v48  ;;  %v4403_v48 = vld [vmem:[#allocation8 + $0xf30] sm:$0xff]  ;;  %v9600_v8 = vadd.f32 %v10258_v59, %v4438_v27  ;;  %v9748_v27 = vld [vmem:[#allocation11 + $0x1c0] sm:$0xff]  }
 0x474   :  { %7657 = vmatpush1.bf16.msra.mxu1 %v9356_v50  ;;  %v7193_v5 = vpop.f32.mrb[11].mxu0  ;;  %v7357_v6 = vpop.f32.mrb[11].mxu1  ;;  %7494 = vmatprep.subr.bf16.mxu0 %v9363_v46  ;;  %v4400_v50 = vld [vmem:[#allocation8 + $0xf18] sm:$0xff]  ;;  %v9411_v62 = vcombine.high %v4399_v47, %v4403_v48  ;;  %v4411_v4 = vld [vmem:[#allocation8 + $0xf70] sm:$0xff] }
 0x475   :  { %7658 = vmatprep.subr.bf16.mxu1 %v9365_v52  ;;  %v4404_v46 = vld [vmem:[#allocation8 + $0xf38] sm:$0xff]  ;;  %v9402_v52 = vcombine.low %v4391_v36, %v4395_v42  ;;  %v9410_v5 = vcombine.low %v4399_v47, %v4403_v48  ;;  %v9717_v36 = vld [vmem:[#allocation11] sm:$0xff]  }
 0x476   :  { %v9413_v54 = vcombine.high %v4400_v50, %v4404_v46  ;;  %v4408_v2 = vld [vmem:[#allocation8 + $0xf58] sm:$0xff]  ;;  %v9412_v6 = vcombine.low %v4400_v50, %v4404_v46  ;;  %v9718_v42 = vld [vmem:[#allocation11 + $0x80] sm:$0xff]   ;;  %v9727_v50 = vld [vmem:[#allocation11 + $0x58] sm:$0xff]  }
 0x477   :  { %7495 = vmatpush1.bf16.msra.mxu0 %v9362_v3  ;;  %v4412_v3 = vld [vmem:[#allocation8 + $0xf78] sm:$0xff]  ;;  %v9728_v46 = vld [vmem:[#allocation11 + $0xd8] sm:$0xff]  }
 0x478   :  { %7659 = vmatpush1.bf16.msra.mxu1 %v9364_v7  ;;  %7496 = vmatprep.subr.bf16.mxu0 %v9371_v13  ;;  %v9419_v7 = vcombine.high %v4407_v24, %v4411_v4  ;;  %v9421_v13 = vcombine.high %v4408_v2, %v4412_v3  ;;  %v9725_v47 = vld [vmem:[#allocation11 + $0x10] sm:$0xff]  }
 0x479   :  { %7660 = vmatprep.subr.bf16.mxu1 %v9373_v0  ;;  %v4415_v0 = vld [vmem:[#allocation8 + $0xf90] sm:$0xff]  ;;  %v9726_v48 = vld [vmem:[#allocation11 + $0x90] sm:$0xff]  }
 0x47b   :  { %7497 = vmatpush1.bf16.msra.mxu0 %v9370_v21  ;;  %v9418_v21 = vcombine.low %v4407_v24, %v4411_v4  ;;  %v9734_v24 = vld [vmem:[#allocation11 + $0xa0] sm:$0xff]   ;;  %v9735_v4 = vld [vmem:[#allocation11 + $0x68] sm:$0xff]  }
 0x47c   :  { %7661 = vmatpush1.bf16.msra.mxu1 %v9372_v10  ;;  %7498 = vmatprep.subr.bf16.mxu0 %v9379_v57  ;;  %v9420_v10 = vcombine.low %v4408_v2, %v4412_v3  ;;  %v9427_v57 = vcombine.high %v4415_v0, %v4419_v11  ;;  %v9736_v2 = vld [vmem:[#allocation11 + $0xe8] sm:$0xff]  }
 0x47d   :  { %7662 = vmatprep.subr.bf16.mxu1 %v9381_v22  ;;  %v9429_v22 = vcombine.high %v4416_v14, %v4420_v19  ;;  %v9737_v3 = vld [vmem:[#allocation11 + $0x28] sm:$0xff]  }
 0x47f   :  { %7499 = vmatpush1.bf16.msra.mxu0 %v9378_v28  ;;  %v4428_v28 = vld [vmem:[#allocation8 + $0xff8] sm:$0xff] }
 0x480   :  { %7663 = vmatpush1.bf16.msra.mxu1 %v9380_v17  ;;  %7500 = vmatprep.subr.bf16.mxu0 %v9387_v29  ;;  %v4446_v17 = vrot.slane %v10262_v20, %v659_v23  ;;  %v9426_v29 = vcombine.low %v4415_v0, %v4419_v11  ;;  %v9437_v35 = vcombine.high %v4424_v12, %v4428_v28  ;;  %v9716_v23 = vld [vmem:[#allocation11 + $0xc0] sm:$0xff]   ;;  %v9740_v0 = vld [vmem:[#allocation11 + $0xf0] sm:$0xff]  }
 0x481   :  { %7664 = vmatprep.subr.bf16.mxu1 %v9389_v30  ;;  %v9428_v30 = vcombine.low %v4416_v14, %v4420_v19  ;;  %v9741_v11 = vld [vmem:[#allocation11 + $0x30] sm:$0xff]  }
 0x482   :  { %v9602_v37 = vadd.f32 %v10260_v63, %v4446_v17  ;;  %v9720_v63 = vld [vmem:[#allocation11 + $0xc8] sm:$0xff]   ;;  %v9742_v19 = vld [vmem:[#allocation11 + $0xb0] sm:$0xff]  }
 0x483   :  { %7501 = vmatpush1.bf16.msra.mxu0 %v9386_v25  ;;  %v9436_v25 = vcombine.low %v4424_v12, %v4428_v28  ;;  %v9750_v28 = vld [vmem:[#allocation11 + $0x180] sm:$0xff]   ;;  %v9751_v17 = vld [vmem:[#allocation11 + $0x148] sm:$0xff]  }
 0x484   :  { %7665 = vmatpush1.bf16.msra.mxu1 %v9388_v38  ;;  %7502 = vmatprep.subr.bf16.mxu0 %v9395_v40  ;;  %v9715_v38 = vld [vmem:[#allocation11 + $0x40] sm:$0xff]   ;;  %v7688_v40 = vmax.f32 %v9600_v8, 0.0  ;;  %v9756_v8 = vld [vmem:[#allocation11 + $0x1d0] sm:$0xff]  }
 0x485   :  { %7666 = vmatprep.subr.bf16.mxu1 %v9397_v41  ;;  %v7690_v41 = vmax.f32 %v9602_v37, 0.0  ;;  %v9757_v37 = vld [vmem:[#allocation11 + $0x110] sm:$0xff]  }
 0x486   :  { %v7696_v59 = vpack.c.bf16 %v7688_v40, %v7688_v40  ;;  %v9762_v40 = vld [vmem:[#allocation11 + $0x198] sm:$0xff]  }
 0x487   :  { %7503 = vmatpush1.bf16.msra.mxu0 %v9394_v44  ;;  %v7698_v49 = vpack.c.bf16 %v7690_v41, %v7690_v41  ;;  %v9721_v44 = vld [vmem:[#allocation11 + $0x8] sm:$0xff]   ;;  %v9763_v41 = vld [vmem:[#allocation11 + $0x160] sm:$0xff]  }
 0x488   :  { %7667 = vmatpush1.bf16.msra.mxu1 %v9396_v45  ;;  %7504 = vmatprep.subr.bf16.mxu0 %v9403_v9  ;;  %v9722_v45 = vld [vmem:[#allocation11 + $0x88] sm:$0xff]   ;;  %v9723_v9 = vld [vmem:[#allocation11 + $0x50] sm:$0xff]  }
 0x489   :  { %7668 = vmatprep.subr.bf16.mxu1 %v9405_v34  ;;  %v9724_v34 = vld [vmem:[#allocation11 + $0xd0] sm:$0xff]  }
 0x48b   :  { %7505 = vmatpush1.bf16.msra.mxu0 %v9402_v52  ;;  %v9730_v52 = vld [vmem:[#allocation11 + $0x98] sm:$0xff]  }
 0x48c   :  { %7669 = vmatpush1.bf16.msra.mxu1 %v9404_v61  ;;  %7506 = vmatprep.subr.bf16.mxu0 %v9411_v62  ;;  %v9731_v61 = vld [vmem:[#allocation11 + $0x60] sm:$0xff]  }
 0x48d   :  { %7670 = vmatprep.subr.bf16.mxu1 %v9413_v54  ;;  %v9732_v62 = vld [vmem:[#allocation11 + $0xe0] sm:$0xff]  }
 0x48e   :  { %v9733_v54 = vld [vmem:[#allocation11 + $0x20] sm:$0xff]  }
 0x48f   :  { %7507 = vmatpush1.bf16.msra.mxu0 %v9410_v5  ;;  %v4434_v5 = vrot.slane %v10262_v20, %v647_v31 }
 0x490   :  { %7671 = vmatpush1.bf16.msra.mxu1 %v9412_v6  ;;  %7508 = vmatprep.subr.bf16.mxu0 %v9419_v7  ;;  %v9738_v6 = vld [vmem:[#allocation11 + $0xa8] sm:$0xff]   ;;  %v9739_v7 = vld [vmem:[#allocation11 + $0x70] sm:$0xff]  }
 0x491   :  { %7672 = vmatprep.subr.bf16.mxu1 %v9421_v13  ;;  %v4442_v13 = vrot.slane %v10262_v20, %v655_v60  ;;  %v9599_v14 = vadd.f32 %v10254_v51, %v4434_v5  ;;  %v9746_v60 = vld [vmem:[#allocation11 + $0xb8] sm:$0xff]   ;;  %v9749_v51 = vld [vmem:[#allocation11 + $0x100] sm:$0xff]  }
 0x493   :  { %7509 = vmatpush1.bf16.msra.mxu0 %v9418_v21  ;;  %v9743_v21 = vld [vmem:[#allocation11 + $0x78] sm:$0xff]   ;;  %v9601_v31 = vadd.f32 %v10256_v39, %v4442_v13 }
 0x494   :  { %7673 = vmatpush1.bf16.msra.mxu1 %v9420_v10  ;;  %7510 = vmatprep.subr.bf16.mxu0 %v9427_v57  ;;  %v9744_v10 = vld [vmem:[#allocation11 + $0xf8] sm:$0xff]  }
 0x495   :  { %7674 = vmatprep.subr.bf16.mxu1 %v9429_v22  ;;  %v9745_v57 = vld [vmem:[#allocation11 + $0x38] sm:$0xff]   ;;  %v7687_v22 = vmax.f32 %v9599_v14, 0.0  ;;  %v7689_v26 = vmax.f32 %v9601_v31, 0.0 }
 0x497   :  { %7511 = vmatpush1.bf16.msra.mxu0 %v9426_v29  ;;  %v7695_v12 = vpack.c.bf16 %v7687_v22, %v7687_v22  ;;  %v7697_v39 = vpack.c.bf16 %v7689_v26, %v7689_v26  ;;  %v9752_v29 = vld [vmem:[#allocation11 + $0x1c8] sm:$0xff]   ;;  %v9438_v22 = vld [vmem:[#allocation13] ss:$0 sm:$0xff] }
 0x498   :  { %7675 = vmatpush1.bf16.msra.mxu1 %v9428_v30  ;;  %7512 = vmatprep.subr.bf16.mxu0 %v9435_v32  ;;  %v9753_v30 = vld [vmem:[#allocation11 + $0x108] sm:$0xff]  }
 0x499   :  { %7676 = vmatprep.subr.bf16.mxu1 %v9437_v35  ;;  %v9754_v32 = vld [vmem:[#allocation11 + $0x188] sm:$0xff]   ;;  %v9755_v35 = vld [vmem:[#allocation11 + $0x150] sm:$0xff]  }
 0x49b   :  { %7513 = vmatpush1.bf16.msra.mxu0 %v9434_v15  ;;  %v9758_v15 = vld [vmem:[#allocation11 + $0x190] sm:$0xff]  }
 0x49c   :  { %7677 = vmatpush1.bf16.msra.mxu1 %v9436_v25  ;;  %9503 = vmatprep.subr.bf16.mxu0 %v9715_v38  ;;  %v9759_v25 = vld [vmem:[#allocation11 + $0x158] sm:$0xff]  }
 0x49d   :  { %9525 = vmatprep.subr.bf16.mxu1 %v9716_v23  ;;  %v9760_v38 = vld [vmem:[#allocation11 + $0x1d8] sm:$0xff]  }
 0x49e   :  { %7515 = vmatmul.mubr.bf16.vlgmr.msra.gmra.mrb[12].mxu0 %v10236_v16  ;;  %v9761_v23 = vld [vmem:[#allocation11 + $0x118] sm:$0xff]  }
 0x49f   :  { %7679 = vmatmul.mubr.bf16.vlgmr.msra.gmra.mrb[12].mxu1 %v10236_v16  ;;  %9504 = vmatpush3.bf16.msra.mxu0 %v9717_v36  ;;  %v9729_v16 = vld [vmem:[#allocation11 + $0x18] sm:$0xff]   ;;  %v9764_v36 = vld [vmem:[#allocation11 + $0x1e0] sm:$0xff]  }
 0x4a0   :  { %8254 = vmatprep.mubr.bf16.mxu0 %v7696_v59  ;;  %9526 = vmatpush3.bf16.msra.mxu1 %v9718_v42  ;;  %v9765_v42 = vld [vmem:[#allocation11 + $0x120] sm:$0xff]   ;;  %v9767_v59 = vld [vmem:[#allocation11 + $0x168] sm:$0xff]  }
 0x4a1   :  { %8294 = vmatprep.mubr.bf16.mxu1 %v7698_v49  ;;  %9505 = vmatprep.subr.bf16.mxu0 %v9719_v43  ;;  %v9766_v43 = vld [vmem:[#allocation11 + $0x1a0] sm:$0xff]   ;;  %v9769_v49 = vld [vmem:[#allocation11 + $0x128] sm:$0xff]  }
 0x4a2   :  { %9527 = vmatprep.subr.bf16.mxu1 %v9720_v63  ;;  %v9768_v63 = vld [vmem:[#allocation11 + $0x1e8] sm:$0xff]  }
 0x4a3   :  { %9506 = vmatpush3.bf16.msra.mxu0 %v9721_v44  ;;  %v9770_v44 = vld [vmem:[#allocation11 + $0x1a8] sm:$0xff]  }
 0x4a4   :  { %9528 = vmatpush3.bf16.msra.mxu1 %v9722_v45  ;;  %9507 = vmatprep.subr.bf16.mxu0 %v9723_v9  ;;  %v9771_v45 = vld [vmem:[#allocation11 + $0x170] sm:$0xff]  }
 0x4a5   :  { %9529 = vmatprep.subr.bf16.mxu1 %v9724_v34  ;;  %v9772_v9 = vld [vmem:[#allocation11 + $0x1f0] sm:$0xff]  }
 0x4a6   :  { %v9773_v34 = vld [vmem:[#allocation11 + $0x130] sm:$0xff]  }
 0x4a7   :  { %9508 = vmatpush3.bf16.msra.mxu0 %v9725_v47  ;;  %v9774_v47 = vld [vmem:[#allocation11 + $0x1b0] sm:$0xff]  }
 0x4a8   :  { %9530 = vmatpush3.bf16.msra.mxu1 %v9726_v48  ;;  %9509 = vmatprep.subr.bf16.mxu0 %v9727_v50  ;;  %v9775_v48 = vld [vmem:[#allocation11 + $0x178] sm:$0xff]  }
 0x4a9   :  { %9531 = vmatprep.subr.bf16.mxu1 %v9728_v46  ;;  %v9776_v50 = vld [vmem:[#allocation11 + $0x1f8] sm:$0xff]  }
 0x4aa   :  { %v9777_v46 = vld [vmem:[#allocation11 + $0x138] sm:$0xff]  }
 0x4ab   :  { %9510 = vmatpush3.bf16.msra.mxu0 %v9729_v16  ;;  %v9778_v16 = vld [vmem:[#allocation11 + $0x1b8] sm:$0xff]  }
 0x4ac   :  { %9532 = vmatpush3.bf16.msra.mxu1 %v9730_v52  ;;  %9511 = vmatprep.subr.bf16.mxu0 %v9731_v61  ;;  %v4450_v52 = vrot.slane %v10262_v20, %v663_v53  ;;  %v4458_v61 = vrot.slane %v10262_v20, %v671_v33 }
 0x4ad   :  { %9533 = vmatprep.subr.bf16.mxu1 %v9732_v62  ;;  %v4454_v62 = vrot.slane %v10262_v20, %v667_v56 }
 0x4af   :  { %9512 = vmatpush3.bf16.msra.mxu0 %v9733_v54  ;;  %v4462_v54 = vrot.slane %v10262_v20, %v675_v58 }
 0x4b0   :  { %9534 = vmatpush3.bf16.msra.mxu1 %v9734_v24  ;;  %9513 = vmatprep.subr.bf16.mxu0 %v9735_v4 }
 0x4b1   :  { %9535 = vmatprep.subr.bf16.mxu1 %v9736_v2 }
 0x4b3   :  { %9514 = vmatpush3.bf16.msra.mxu0 %v9737_v3 }
 0x4b4   :  { %9536 = vmatpush3.bf16.msra.mxu1 %v9738_v6  ;;  %9515 = vmatprep.subr.bf16.mxu0 %v9739_v7 }
 0x4b5   :  { %9537 = vmatprep.subr.bf16.mxu1 %v9740_v0 }
 0x4b7   :  { %9516 = vmatpush3.bf16.msra.mxu0 %v9741_v11 }
 0x4b8   :  { %9538 = vmatpush3.bf16.msra.mxu1 %v9742_v19  ;;  %9517 = vmatprep.subr.bf16.mxu0 %v9743_v21 }
 0x4b9   :  { %9539 = vmatprep.subr.bf16.mxu1 %v9744_v10 }
 0x4bb   :  { %9518 = vmatpush3.bf16.msra.mxu0 %v9745_v57 }
 0x4bc   :  { %9540 = vmatpush3.bf16.msra.mxu1 %v9746_v60  ;;  %9547 = vmatprep.subr.bf16.mxu0 %v9747_v18 }
 0x4bd   :  { %9569 = vmatprep.subr.bf16.mxu1 %v9748_v27 }
 0x4be   :  { %8255 = vmatmul.mubr.bf16.vlgmr.msra.gmra.mrb[16].mxu0 %v7695_v12 }
 0x4bf   :  { %8295 = vmatmul.mubr.bf16.vlgmr.msra.gmra.mrb[16].mxu1 %v7697_v39  ;;  %9548 = vmatpush3.bf16.msra.mxu0 %v9749_v51 }
 0x4c0   :  { %9570 = vmatpush3.bf16.msra.mxu1 %v9750_v28  ;;  %9549 = vmatprep.subr.bf16.mxu0 %v9751_v17 }
 0x4c1   :  { %9571 = vmatprep.subr.bf16.mxu1 %v9752_v29 }
 0x4c3   :  { %9550 = vmatpush3.bf16.msra.mxu0 %v9753_v30 }
 0x4c4   :  { %9572 = vmatpush3.bf16.msra.mxu1 %v9754_v32  ;;  %9551 = vmatprep.subr.bf16.mxu0 %v9755_v35 }
 0x4c5   :  { %9573 = vmatprep.subr.bf16.mxu1 %v9756_v8  ;;  %v8383_v8 = vand.u32 127, %v645_v55 }
 0x4c7   :  { %9552 = vmatpush3.bf16.msra.mxu0 %v9757_v37  ;;  %vm8384_vm0 = vcmp.lt.s32.totalorder %v8383_v8, 9 }
 0x4c8   :  { %9574 = vmatpush3.bf16.msra.mxu1 %v9758_v15  ;;  %9553 = vmatprep.subr.bf16.mxu0 %v9759_v25 }
 0x4c9   :  { %9575 = vmatprep.subr.bf16.mxu1 %v9760_v38 }
 0x4cb   :  { %9554 = vmatpush3.bf16.msra.mxu0 %v9761_v23 }
 0x4cc   :  { %9576 = vmatpush3.bf16.msra.mxu1 %v9762_v40  ;;  %9555 = vmatprep.subr.bf16.mxu0 %v9763_v41 }
 0x4cd   :  { %9577 = vmatprep.subr.bf16.mxu1 %v9764_v36 }
 0x4cf   :  { %9556 = vmatpush3.bf16.msra.mxu0 %v9765_v42 }
 0x4d0   :  { %9578 = vmatpush3.bf16.msra.mxu1 %v9766_v43  ;;  %9557 = vmatprep.subr.bf16.mxu0 %v9767_v59 }
 0x4d1   :  { %9579 = vmatprep.subr.bf16.mxu1 %v9768_v63 }
 0x4d3   :  { %9558 = vmatpush3.bf16.msra.mxu0 %v9769_v49 }
 0x4d4   :  { %9580 = vmatpush3.bf16.msra.mxu1 %v9770_v44  ;;  %9559 = vmatprep.subr.bf16.mxu0 %v9771_v45 }
 0x4d5   :  { %9581 = vmatprep.subr.bf16.mxu1 %v9772_v9 }
 0x4d7   :  { %9560 = vmatpush3.bf16.msra.mxu0 %v9773_v34 }
 0x4d8   :  { %9582 = vmatpush3.bf16.msra.mxu1 %v9774_v47  ;;  %9561 = vmatprep.subr.bf16.mxu0 %v9775_v48 }
 0x4d9   :  { %9583 = vmatprep.subr.bf16.mxu1 %v9776_v50 }
 0x4db   :  { %9562 = vmatpush3.bf16.msra.mxu0 %v9777_v46 }
 0x4dc   :  { %9584 = vmatpush3.bf16.msra.mxu1 %v9778_v16 }
 0x571   :  { %v7516_v24 = vpop.f32.mrb[12].mxu0 }
 0x572   :  { %v9603_v4 = vadd.f32 %v7516_v24, %v4450_v52  ;;  %v7680_v2 = vpop.f32.mrb[12].mxu1  ;;  %v7518_v3 = vpop.f32.mrb[13].mxu0 }
 0x573   :  { %v9605_v5 = vadd.f32 %v7680_v2, %v4458_v61  ;;  %v9604_v6 = vadd.f32 %v7518_v3, %v4454_v62  ;;  %v7682_v7 = vpop.f32.mrb[13].mxu1  ;;  %v7520_v53 = vpop.f32.mrb[14].mxu0 }
 0x574   :  { %v7691_v13 = vmax.f32 %v9603_v4, 0.0  ;;  %v9606_v0 = vadd.f32 %v7682_v7, %v4462_v54  ;;  %v7684_v11 = vpop.f32.mrb[14].mxu1  ;;  %v7521_v33 = vpop.f32.mrb[15].mxu0 }
 0x575   :  { %v7693_v14 = vmax.f32 %v9605_v5, 0.0  ;;  %v7692_v19 = vmax.f32 %v9604_v6, 0.0  ;;  %v7685_v21 = vpop.f32.mrb[15].mxu1 }
 0x576   :  { %v7694_v56 = vmax.f32 %v9606_v0, 0.0  ;;  %v7699_v1 = vpack.c.bf16 %v7691_v13, %v7691_v13 }
 0x577   :  { %v7700_v31 = vpack.c.bf16 %v7692_v19, %v7692_v19  ;;  %v7701_v58 = vpack.c.bf16 %v7693_v14, %v7693_v14 }
 0x578   :  { %v7702_v10 = vpack.c.bf16 %v7694_v56, %v7694_v56 }
 0x579   :  { %8334 = vmatprep.mubr.bf16.mxu0 %v7700_v31 }
 0x57a   :  { %8374 = vmatprep.mubr.bf16.mxu1 %v7702_v10  ;;  %8335 = vmatmul.mubr.bf16.vlgmr.msra.gmra.mrb[20].mxu0 %v7699_v1 }
 0x57b   :  { %8375 = vmatmul.mubr.bf16.vlgmr.msra.gmra.mrb[20].mxu1 %v7701_v58 }
 0x591   :  { %v9519_v20 = vpop.f32.mrb[16].mxu0 }
 0x592   :  { %v9541_v57 = vpop.f32.mrb[16].mxu1  ;;  %v9520_v60 = vpop.f32.mrb[17].mxu0 }
 0x593   :  { %v9521_v18 = vadd.f32 %v9520_v60, %v9519_v20  ;;  %v9542_v26 = vpop.f32.mrb[17].mxu1  ;;  %v9522_v27 = vpop.f32.mrb[18].mxu0 }
 0x594   :  { %v9543_v51 = vadd.f32 %v9542_v26, %v9541_v57  ;;  %v9544_v12 = vpop.f32.mrb[18].mxu1  ;;  %v9523_v28 = vpop.f32.mrb[19].mxu0 }
 0x595   :  { %v8257_v17 = vadd.f32 %v9521_v18, %v9438_v22  ;;  %v9545_v39 = vpop.f32.mrb[19].mxu1 }
 0x597   :  { %v8297_v29 = vadd.f32 %v9543_v51, %v8257_v17 }
 0x64d   :  { %v9563_v30 = vpop.f32.mrb[20].mxu0 }
 0x64e   :  { %v9585_v32 = vpop.f32.mrb[20].mxu1  ;;  %v9564_v35 = vpop.f32.mrb[21].mxu0 }
 0x64f   :  { %v9565_v37 = vadd.f32 %v9564_v35, %v9563_v30  ;;  %v9586_v15 = vpop.f32.mrb[21].mxu1  ;;  %v9566_v25 = vpop.f32.mrb[22].mxu0 }
 0x650   :  { %v9587_v38 = vadd.f32 %v9586_v15, %v9585_v32  ;;  %v9588_v23 = vpop.f32.mrb[22].mxu1  ;;  %v9567_v40 = vpop.f32.mrb[23].mxu0 }
 0x651   :  { %v8337_v41 = vadd.f32 %v9565_v37, %v8297_v29  ;;  %v9589_v36 = vpop.f32.mrb[23].mxu1 }
 0x653   :  { %v8377_v42 = vadd.f32 %v9587_v38, %v8337_v41 }
 0x655   :  { %v8385_v43 = vsel %vm8384_vm0, %v8377_v42, -inf }
 0x656   :  { %8386 = vmax.xlane.f32.xlu0 %v8385_v43 }
 0x6e3   :  { %v8387_v59 = vpop.xlane.xlu0 %8386 }
 0x6e4   :  { %v8388_v63 = vsub.f32 %v8385_v43, %v8387_v59 }
 0x6e6   :  { %v8389_v49 = vmul.f32 1.442695, %v8388_v63 }
 0x6e8   :  { %9779 = vpow2.f32 %v8389_v49 }
 0x6f2   :  { %v9780_v44 = vpop.eup %9779 }
 0x6f3   :  { %8391 = vadd.xlane.f32.xlu0 %v9780_v44 }
 0x780   :  { %v8392_v45 = vpop.xlane.xlu0 %8391 }
 0x781   :  { %9781 = vrcp.f32 %v8392_v45 }
 0x78b   :  { %v9782_v55 = vpop.eup %9781 }
 0x78c   :  { %v8394_v9 = vmul.f32 %v9782_v55, %v9780_v44 }
 0x78e   :  { %8395 = vst [vmem:[#allocation14] sm:$0xff] %v8394_v9 }
 0x78f   :  { %9949 = shalt.err (!%p9946_p4)
}
 0x790   :  { %s9950_s11 = scalar_lea.hbm %s10314_s7, 128 }
 0x791   :  { %p9951_p5 = scmp.ne.s32.totalorder %s10314_s7, %s9950_s11  ;;  %p9954_p6 = scmp.lt.u32.totalorder %s9950_s11, %s10314_s7 }
 0x793   :  { %p9956_p7 = pnand %p9954_p6, %p9951_p5 }
 0x795   :  { %9959 = shalt.err (!%p9956_p7)
}
 0x796   :  { %8405 = dma.vmem_to_hbm [thread:$0]  %s8403_s13, 128, %s10314_s7, [#allocation4]  }
 0x797   :  { %9968 = dma.done.wait [#allocation4], 128  }
 0x798   :  { %9969 = vsyncadd [#allocation4], 4294967168 }
 0x799   :  { %8409 = vsyncpa [#allocation3], 1 }
 0x79a   :  { %8410 = vsyncpa [#allocation6], 1 }
 0x79b   :  { %8411 = vsyncpa [#allocation9], 1 }
 0x79c   :  { %8412 = vsyncpa [#allocation12], 1 }
 0x79d   :  { %8413 = vsyncpa [#allocation4], 1 }

</bundles_post_ra>
